<compile_context>
chip_gen: v7x
topology: tpu7x:2x2x1
jax: 0.10.0
libtpu: 0.0.40
codegen_flags: <defaults>
</compile_context>

<pallas_src>
import math

import jax
import jax.numpy as jnp
import numpy as np
from jax import lax
from jax.experimental import pallas as pl
from jax.experimental.pallas import tpu as pltpu

INV_SQRT3 = 1.0 / math.sqrt(3.0)
INV_SQRT2 = 1.0 / math.sqrt(2.0)
LN_EPS = 1e-5  # torch.nn.LayerNorm default

# dot_general dimension numbers (2-D, no batch dims)
_NT = (((1,), (1,)), ((), ()))   # contract both minor dims:  A @ B^T


def _separable_fctp_kernel(
    x_ref, ea_ref, es_ref,
    w1t_ref, ln_g_ref, ln_b_ref, w2t_ref, off_ref,
    perm_ref, bfull_ref, wfm_ref,
    out_ref,
):
    f32 = jnp.float32
    C = perm_ref.shape[0] // 4
    H1 = w1t_ref.shape[0]
    te = x_ref.shape[0]

    # ---- RadialProfile (lane-dense: features on sublanes, edges on lanes) ----
    # h[j, e] = sum_i mlp_w1[i, j] * edge_scalars[e, i]  (NT matmul, no explicit
    # transpose of the E-major tile in user code).
    h = lax.dot_general(w1t_ref[...], es_ref[...], _NT,
                        preferred_element_type=f32)                 # (H1, TE)
    # LayerNorm over the feature (sublane) axis. The two reductions are
    # INDEPENDENT (both only read h) so they overlap in the MXU result FIFO;
    # var = E[h^2] - mu^2 (mild cancellation acceptable in f32 over H1 feats).
    ones_h1 = jnp.full((1, H1), 1.0 / H1, dtype=f32)
    mu = jnp.dot(ones_h1, h, preferred_element_type=f32)            # (1, TE)
    ms = jnp.dot(ones_h1, h * h, preferred_element_type=f32)        # (1, TE)
    var = ms - mu * mu
    hn = (h - mu) * lax.rsqrt(var + LN_EPS)
    hn = hn * ln_g_ref[...] + ln_b_ref[...]                         # (H1,1) lane bcast
    ha = hn * jax.nn.sigmoid(hn)                                    # SiLU
    w = jnp.dot(w2t_ref[...], ha, preferred_element_type=f32)       # (5C, TE)
    w = w + off_ref[...]

    # per-instruction depthwise weights, each a full (C, TE) vreg slab
    w_ss = w[0 * C:1 * C]      # 0e x 0e -> 0e
    w_sv = w[1 * C:2 * C]      # 0e x 1e -> 1e
    w_vs = w[2 * C:3 * C]      # 1e x 0e -> 1e
    w_dot = w[3 * C:4 * C]     # 1e x 1e -> 0e
    w_crs = w[4 * C:5 * C]     # 1e x 1e -> 1e

    # ---- de-interleave node features via permutation matmul (NT on the MXU) ----
    xt = lax.dot_general(perm_ref[...], x_ref[...], _NT,
                         preferred_element_type=f32)                # (4C, TE)
    xs = xt[0 * C:1 * C]
    xvx = xt[1 * C:2 * C]
    xvy = xt[2 * C:3 * C]
    xvz = xt[3 * C:4 * C]

    # ---- broadcast the l<=1 spherical harmonics across the C channels --------
    # edge_attr arrives in native (TE, 4) layout; one tiny NT dot both
    # "transposes" and broadcasts it to four (C, TE) slabs.
    yb = lax.dot_general(bfull_ref[...], ea_ref[...], _NT,
                         preferred_element_type=f32)                # (4C, TE)
    y0 = yb[0 * C:1 * C]
    yx = yb[1 * C:2 * C]
    yy = yb[2 * C:3 * C]
    yz = yb[3 * C:4 * C]

    # ---- Depthwise tensor product ('uvu', component normalization) ----------
    # Common sub-products factored per the review (each slab computed once).
    s0 = (w_ss * xs) * y0
    wd = w_dot * INV_SQRT3
    s1 = wd * (xvx * yx + xvy * yy + xvz * yz)

    t_sv = w_sv * xs
    sv_x = t_sv * yx
    sv_y = t_sv * yy
    sv_z = t_sv * yz

    t_vs = w_vs * y0
    vs_x = t_vs * xvx
    vs_y = t_vs * xvy
    vs_z = t_vs * xvz

    wc = w_crs * INV_SQRT2
    cr_x = wc * (xvy * yz - xvz * yy)
    cr_y = wc * (xvz * yx - xvx * yz)
    cr_z = wc * (xvx * yy - xvy * yx)

    # ---- LinearRS + e3nn re-interleave + bias as ONE feature-major matmul ----
    # The trailing (C, TE) ones block carries the l=0 bias (only its first row
    # has non-zero weight columns), so no broadcast add is needed afterwards.
    ones_blk = jnp.ones((C, te), dtype=f32)
    acts = jnp.concatenate(
        [s0, s1, sv_x, vs_x, cr_x, sv_y, vs_y, cr_y, sv_z, vs_z, cr_z, ones_blk],
        axis=0)                                                     # (12C, TE)
    out_fm = jnp.dot(wfm_ref[...], acts, preferred_element_type=f32)  # (4C, TE)
    out_ref[...] = out_fm.astype(out_ref.dtype)                     # lane-dense store


def _build_static_mats(C):
    """Permutation / broadcast constants (depend only on C)."""
    # P[r, k] = 1 iff blocked row r  <->  e3nn column k
    P = np.zeros((4 * C, 4 * C), np.float32)
    for c in range(C):
        P[c, c] = 1.0                               # scalars
        for m in range(3):
            P[C + m * C + c, C + 3 * c + m] = 1.0   # vector component m, channel c
    # Bfull broadcasts [Y0, Yx, Yy, Yz] across the C channels
    B = np.zeros((4 * C, 4), np.float32)
    for m in range(4):
        B[m * C:(m + 1) * C, m] = 1.0
    return jnp.asarray(P), jnp.asarray(B)


def _build_linear_rs_fused(lin_ws, lin_bs, lin_wv, P, C):
    """Fold LinearRS (scalar + 3 vector heads), the e3nn re-interleave and the
    l=0 bias into one feature-major (4C, 12C) weight (last C columns pair with
    the ones block appended to `acts`; only column 11C carries the bias)."""
    Wfull = jnp.zeros((4 * C, 11 * C), jnp.float32)
    Wfull = Wfull.at[0:C, 0:2 * C].set(lin_ws.T)                       # scalars
    for m in range(3):
        Wfull = Wfull.at[C + m * C:C + (m + 1) * C,
                         2 * C + m * 3 * C:2 * C + (m + 1) * 3 * C].set(lin_wv.T)
    Wperm_T = (Wfull.T @ P).T                                          # (4C_e3nn, 11C)
    b_blocked = jnp.zeros((4 * C,), jnp.float32).at[0:C].set(lin_bs.reshape(-1))
    bias_e3nn = b_blocked @ P                                          # (4C,)
    Wfm = jnp.zeros((4 * C, 12 * C), jnp.float32)
    Wfm = Wfm.at[:, :11 * C].set(Wperm_T)
    Wfm = Wfm.at[:, 11 * C].set(bias_e3nn)
    return Wfm


def _vmem_bytes_estimate(tile_e, C, H0, H1):
    lane = lambda n: -(-n // 128) * 128
    io = 2 * 4 * tile_e * (lane(4 * C) + lane(4) + lane(H0))   # dbl-buffered lane-padded inputs
    io += 2 * 4 * 4 * C * tile_e                               # dbl-buffered lane-dense output
    interm = 4 * tile_e * (2 * H1 + 5 * C + 3 * 4 * C + 12 * C)
    return io + interm


def separable_fctp(node_input, edge_attr, edge_scalars, params, *, C,
                   tile_e=2048, feature_major_output=False):
    """Fused SeparableFCTP forward.

    Returns the module-native (E, 4C) array by default (one extra XLA transpose
    of the output); pass feature_major_output=True to get the kernel-native,
    lane-dense (4C, E) slab for fused consumers (no extra HBM pass).
    """
    E = node_input.shape[0]
    H0 = edge_scalars.shape[-1]
    H1 = params["mlp_w1"].shape[1]

    tile_e = min(tile_e, E)
    # keep >= 2 grid steps (when divisibility allows) so both v7x TCs get work
    if tile_e == E and E % 16 == 0 and (E // 2) % 128 == 0:
        tile_e = E // 2
    assert E % tile_e == 0 and tile_e % 8 == 0, \
        "edge count must be a multiple of the tile size (tile multiple of 8)"
    assert tile_e % 128 == 0 or tile_e == E, \
        "tile_e must be a multiple of 128 (lane-dense output block)"
    grid = (E // tile_e,)

    p = params
    P, bfull = _build_static_mats(C)
    Wfm = _build_linear_rs_fused(p["lin_ws"], p["lin_bs"], p["lin_wv"], P, C)

    # tiny (parameter-sized) re-orientations, done once outside the kernel
    w1t = p["mlp_w1"].T                 # (H1, H0)
    w2t = p["mlp_w2"].T                 # (5C, H1)
    ln_g = p["ln_g"].reshape(H1, 1)
    ln_b = p["ln_b"].reshape(H1, 1)
    off = p["off"].reshape(5 * C, 1)

    def edge_map(i):
        return (i, 0)

    def out_map(i):
        return (0, i)

    def const_map(i):
        return (0, 0)

    in_specs = [
        pl.BlockSpec((tile_e, 4 * C), edge_map),     # node_input (e3nn slab)
        pl.BlockSpec((tile_e, 4), edge_map),         # edge_attr (native layout)
        pl.BlockSpec((tile_e, H0), edge_map),        # edge_scalars
        pl.BlockSpec(w1t.shape, const_map),
        pl.BlockSpec(ln_g.shape, const_map),
        pl.BlockSpec(ln_b.shape, const_map),
        pl.BlockSpec(w2t.shape, const_map),
        pl.BlockSpec(off.shape, const_map),
        pl.BlockSpec(P.shape, const_map),
        pl.BlockSpec(bfull.shape, const_map),
        pl.BlockSpec(Wfm.shape, const_map),
    ]
    out_spec = pl.BlockSpec((4 * C, tile_e), out_map)          # lane-dense output block
    out_shape = jax.ShapeDtypeStruct((4 * C, E), jnp.float32)  # feature-major HBM layout

    flops_per_edge = 2 * (H1 * H0 + 2 * H1 + 5 * C * H1
                          + 4 * C * 4 * C + 4 * C * 4 + 12 * C * 4 * C) + 70 * C
    param_bytes = 4 * (w1t.size + w2t.size + ln_g.size + ln_b.size + off.size
                       + P.size + bfull.size + Wfm.size)
    cost = pl.CostEstimate(
        flops=int(E * flops_per_edge),
        transcendentals=int(E * (H1 + 1)),
        bytes_accessed=int(E * 4 * (4 * C + 4 + H0 + 4 * C) + param_bytes),
    )

    vmem_limit = int(min(max(2 * _vmem_bytes_estimate(tile_e, C, H0, H1),
                             32 * 1024 * 1024),
                         56 * 1024 * 1024))

    out_fm = pl.pallas_call(
        _separable_fctp_kernel,
        out_shape=out_shape,
        grid_spec=pltpu.PrefetchScalarGridSpec(
            num_scalar_prefetch=0,
            grid=grid,
            in_specs=in_specs,
            out_specs=out_spec,
        ),
        compiler_params=pltpu.CompilerParams(
            dimension_semantics=("parallel",),
            vmem_limit_bytes=vmem_limit),
        cost_estimate=cost,
    )(node_input, edge_attr, edge_scalars,
      w1t, ln_g, ln_b, w2t, off, P, bfull, Wfm)

    if feature_major_output:
        return out_fm                    # (4C, E), lane-dense; preferred for fused consumers
    return out_fm.T                      # (E, 4C), module-native (extra XLA transpose pass)


def separable_fctp_reference(node_input, edge_attr, edge_scalars, params, *, C):
    """Pure-JAX reference with the module's math (for verification)."""
    E = node_input.shape[0]
    p = params
    xs = node_input[:, :C]
    xv = node_input[:, C:].reshape(E, C, 3)                  # (E, C, 3)
    y0 = edge_attr[:, 0:1]
    yv = edge_attr[:, 1:4]                                   # (E, 3)

    h = edge_scalars @ p["mlp_w1"]
    mu = h.mean(-1, keepdims=True)
    var = ((h - mu) ** 2).mean(-1, keepdims=True)
    hn = (h - mu) / jnp.sqrt(var + LN_EPS) * p["ln_g"] + p["ln_b"]
    ha = hn * jax.nn.sigmoid(hn)
    w = ha @ p["mlp_w2"] + p["off"]

    w_ss, w_sv, w_vs, w_dot, w_crs = [w[:, k * C:(k + 1) * C] for k in range(5)]

    s0 = w_ss * xs * y0
    s1 = w_dot * INV_SQRT3 * jnp.einsum("ecm,em->ec", xv, yv)
    v_sv = w_sv[:, :, None] * xs[:, :, None] * yv[:, None, :]
    v_vs = w_vs[:, :, None] * xv * y0[:, :, None]
    cross = jnp.cross(xv, yv[:, None, :])
    v_cr = w_crs[:, :, None] * INV_SQRT2 * cross

    out_s = (jnp.concatenate([s0, s1], -1) @ p["lin_ws"]) + p["lin_bs"]
    dtp_v = jnp.concatenate([v_sv, v_vs, v_cr], axis=1)      # (E, 3C, 3)
    out_v = jnp.einsum("ekm,kc->ecm", dtp_v, p["lin_wv"])    # (E, C, 3)
    return jnp.concatenate([out_s, out_v.reshape(E, 3 * C)], axis=-1)


if __name__ == "__main__":
    # edges, multiplicity, fc_neurons=[H0, H1]; wrapper picks tile_e=E/2=1024
    # so the grid has 2 steps (keeps both v7x TensorCores busy).
    E, C, H0, H1 = 2048, 8, 16, 32

    key = jax.random.PRNGKey(0)
    ks = jax.random.split(key, 11)
    node_input = jax.random.normal(ks[0], (E, 4 * C), jnp.float32)
    edge_attr = jax.random.normal(ks[1], (E, 4), jnp.float32)
    edge_scalars = jax.random.normal(ks[2], (E, H0), jnp.float32)

    params = {
        "mlp_w1": jax.random.normal(ks[3], (H0, H1), jnp.float32) / math.sqrt(H0),
        "ln_g": 1.0 + 0.1 * jax.random.normal(ks[4], (1, H1), jnp.float32),
        "ln_b": 0.05 * jax.random.normal(ks[5], (1, H1), jnp.float32),
        # slice_sqrt_k rescale of the last radial layer is baked into this init
        "mlp_w2": jax.random.normal(ks[6], (H1, 5 * C), jnp.float32) / math.sqrt(H1),
        "off": 0.1 * jax.random.normal(ks[7], (1, 5 * C), jnp.float32),
        "lin_ws": jax.random.normal(ks[8], (2 * C, C), jnp.float32) / math.sqrt(2 * C),
        "lin_bs": 0.1 * jax.random.normal(ks[9], (1, C), jnp.float32),
        "lin_wv": jax.random.normal(ks[10], (3 * C, C), jnp.float32) / math.sqrt(3 * C),
    }

    ref = separable_fctp_reference(node_input, edge_attr, edge_scalars, params, C=C)

    # Optimized, kernel-native path: lane-dense (4C, E) output for fused consumers.
    out_fm = separable_fctp(node_input, edge_attr, edge_scalars, params, C=C,
                            feature_major_output=True)
    out_fm = jax.block_until_ready(out_fm)
    np.testing.assert_allclose(np.asarray(out_fm).T, np.asarray(ref),
                               rtol=1e-4, atol=1e-4)

    # Module-semantics path: (E, 4C) via the thin wrapper transpose.
    out_em = separable_fctp(node_input, edge_attr, edge_scalars, params, C=C,
                            feature_major_output=False)
    out_em = jax.block_until_ready(out_em)
    np.testing.assert_allclose(np.asarray(out_em), np.asarray(ref),
                               rtol=1e-4, atol=1e-4)

    print("KERNEL_OK")
</pallas_src>

<mosaic_0001>
module attributes {stable_mosaic.version = 11 : i64} {
  func.func @_separable_fctp_kernel(%arg0: i32, %arg1: memref<1024x32xf32, #tpu.memory_space<vmem>>, %arg2: memref<1024x4xf32, #tpu.memory_space<vmem>>, %arg3: memref<1024x16xf32, #tpu.memory_space<vmem>>, %arg4: memref<32x16xf32, #tpu.memory_space<vmem>>, %arg5: memref<32x1xf32, #tpu.memory_space<vmem>>, %arg6: memref<32x1xf32, #tpu.memory_space<vmem>>, %arg7: memref<40x32xf32, #tpu.memory_space<vmem>>, %arg8: memref<40x1xf32, #tpu.memory_space<vmem>>, %arg9: memref<32x32xf32, #tpu.memory_space<vmem>>, %arg10: memref<32x4xf32, #tpu.memory_space<vmem>>, %arg11: memref<32x96xf32, #tpu.memory_space<vmem>>, %arg12: memref<32x1024xf32, #tpu.memory_space<vmem>>) attributes {dimension_semantics = [#tpu.dimension_semantics<parallel>], iteration_bounds = array<i64: 2>, scalar_prefetch = 0 : i64, scratch_operands = 0 : i64, tpu.core_type = #tpu.core_type<tc>, window_params = [{transform_indices = @transform_0, window_bounds = array<i64: 1024, 32>}, {transform_indices = @transform_1, window_bounds = array<i64: 1024, 4>}, {transform_indices = @transform_2, window_bounds = array<i64: 1024, 16>}, {pipeline_mode = #tpu.pipeline_mode<synchronous>, transform_indices = @transform_3, window_bounds = array<i64: 32, 16>}, {pipeline_mode = #tpu.pipeline_mode<synchronous>, transform_indices = @transform_4, window_bounds = array<i64: 32, 1>}, {pipeline_mode = #tpu.pipeline_mode<synchronous>, transform_indices = @transform_5, window_bounds = array<i64: 32, 1>}, {pipeline_mode = #tpu.pipeline_mode<synchronous>, transform_indices = @transform_6, window_bounds = array<i64: 40, 32>}, {pipeline_mode = #tpu.pipeline_mode<synchronous>, transform_indices = @transform_7, window_bounds = array<i64: 40, 1>}, {pipeline_mode = #tpu.pipeline_mode<synchronous>, transform_indices = @transform_8, window_bounds = array<i64: 32, 32>}, {pipeline_mode = #tpu.pipeline_mode<synchronous>, transform_indices = @transform_9, window_bounds = array<i64: 32, 4>}, {pipeline_mode = #tpu.pipeline_mode<synchronous>, transform_indices = @transform_10, window_bounds = array<i64: 32, 96>}, {transform_indices = @transform_11, window_bounds = array<i64: 32, 1024>}]} {
    %c0 = arith.constant 0 : index
    %c0_0 = arith.constant 0 : index
    %0 = vector.load %arg4[%c0, %c0_0] : memref<32x16xf32, #tpu.memory_space<vmem>>, vector<32x16xf32>
    %c0_1 = arith.constant 0 : index
    %c0_2 = arith.constant 0 : index
    %1 = vector.load %arg3[%c0_1, %c0_2] : memref<1024x16xf32, #tpu.memory_space<vmem>>, vector<1024x16xf32>
    %cst = arith.constant dense<0.000000e+00> : vector<32x1024xf32>
    %2 = tpu.matmul %0, %1, %cst {dimension_numbers = #tpu.dot_dimension_numbers<[1], [1], [0], [0], [0, 0, 1, 0], [], []>} : vector<32x16xf32>, vector<1024x16xf32>, vector<32x1024xf32> -> vector<32x1024xf32>
    %cst_3 = arith.constant 3.125000e-02 : f32
    %3 = vector.broadcast %cst_3 : f32 to vector<1x32xf32>
    %cst_4 = arith.constant dense<0.000000e+00> : vector<1x1024xf32>
    %4 = tpu.matmul %3, %2, %cst_4 {dimension_numbers = #tpu.dot_dimension_numbers<[1], [0], [0], [1], [0, 0, 1, 1], [], []>} : vector<1x32xf32>, vector<32x1024xf32>, vector<1x1024xf32> -> vector<1x1024xf32>
    %5 = arith.mulf %2, %2 : vector<32x1024xf32>
    %cst_5 = arith.constant dense<0.000000e+00> : vector<1x1024xf32>
    %6 = tpu.matmul %3, %5, %cst_5 {dimension_numbers = #tpu.dot_dimension_numbers<[1], [0], [0], [1], [0, 0, 1, 1], [], []>} : vector<1x32xf32>, vector<32x1024xf32>, vector<1x1024xf32> -> vector<1x1024xf32>
    %7 = arith.mulf %4, %4 : vector<1x1024xf32>
    %8 = arith.subf %6, %7 : vector<1x1024xf32>
    %9 = vector.broadcast %4 : vector<1x1024xf32> to vector<32x1024xf32>
    %10 = arith.subf %2, %9 : vector<32x1024xf32>
    %cst_6 = arith.constant 9.99999974E-6 : f32
    %11 = vector.broadcast %cst_6 : f32 to vector<1x1024xf32>
    %12 = arith.addf %8, %11 : vector<1x1024xf32>
    %13 = math.rsqrt %12 : vector<1x1024xf32>
    %14 = vector.broadcast %13 : vector<1x1024xf32> to vector<32x1024xf32>
    %15 = arith.mulf %10, %14 : vector<32x1024xf32>
    %c0_7 = arith.constant 0 : index
    %c0_8 = arith.constant 0 : index
    %16 = vector.load %arg5[%c0_7, %c0_8] : memref<32x1xf32, #tpu.memory_space<vmem>>, vector<32x1xf32>
    %17 = vector.broadcast %16 : vector<32x1xf32> to vector<32x1024xf32>
    %18 = arith.mulf %15, %17 : vector<32x1024xf32>
    %c0_9 = arith.constant 0 : index
    %c0_10 = arith.constant 0 : index
    %19 = vector.load %arg6[%c0_9, %c0_10] : memref<32x1xf32, #tpu.memory_space<vmem>>, vector<32x1xf32>
    %20 = vector.broadcast %19 : vector<32x1xf32> to vector<32x1024xf32>
    %21 = arith.addf %18, %20 : vector<32x1024xf32>
    %22 = arith.negf %21 : vector<32x1024xf32>
    %23 = math.exp %22 : vector<32x1024xf32>
    %cst_11 = arith.constant 1.000000e+00 : f32
    %24 = vector.broadcast %cst_11 : f32 to vector<32x1024xf32>
    %25 = arith.addf %24, %23 : vector<32x1024xf32>
    %26 = arith.divf %24, %25 : vector<32x1024xf32>
    %27 = arith.mulf %21, %26 : vector<32x1024xf32>
    %c0_12 = arith.constant 0 : index
    %c0_13 = arith.constant 0 : index
    %28 = vector.load %arg7[%c0_12, %c0_13] : memref<40x32xf32, #tpu.memory_space<vmem>>, vector<40x32xf32>
    %cst_14 = arith.constant dense<0.000000e+00> : vector<40x1024xf32>
    %29 = tpu.matmul %28, %27, %cst_14 {dimension_numbers = #tpu.dot_dimension_numbers<[1], [0], [0], [1], [0, 0, 1, 1], [], []>} : vector<40x32xf32>, vector<32x1024xf32>, vector<40x1024xf32> -> vector<40x1024xf32>
    %c0_15 = arith.constant 0 : index
    %c0_16 = arith.constant 0 : index
    %30 = vector.load %arg8[%c0_15, %c0_16] : memref<40x1xf32, #tpu.memory_space<vmem>>, vector<40x1xf32>
    %31 = vector.broadcast %30 : vector<40x1xf32> to vector<40x1024xf32>
    %32 = arith.addf %29, %31 : vector<40x1024xf32>
    %33 = vector.extract_strided_slice %32 {offsets = [0, 0], sizes = [8, 1024], strides = [1, 1]} : vector<40x1024xf32> to vector<8x1024xf32>
    %34 = vector.extract_strided_slice %32 {offsets = [8, 0], sizes = [8, 1024], strides = [1, 1]} : vector<40x1024xf32> to vector<8x1024xf32>
    %35 = vector.extract_strided_slice %32 {offsets = [16, 0], sizes = [8, 1024], strides = [1, 1]} : vector<40x1024xf32> to vector<8x1024xf32>
    %36 = vector.extract_strided_slice %32 {offsets = [24, 0], sizes = [8, 1024], strides = [1, 1]} : vector<40x1024xf32> to vector<8x1024xf32>
    %37 = vector.extract_strided_slice %32 {offsets = [32, 0], sizes = [8, 1024], strides = [1, 1]} : vector<40x1024xf32> to vector<8x1024xf32>
    %c0_17 = arith.constant 0 : index
    %c0_18 = arith.constant 0 : index
    %38 = vector.load %arg9[%c0_17, %c0_18] : memref<32x32xf32, #tpu.memory_space<vmem>>, vector<32x32xf32>
    %c0_19 = arith.constant 0 : index
    %c0_20 = arith.constant 0 : index
    %39 = vector.load %arg1[%c0_19, %c0_20] : memref<1024x32xf32, #tpu.memory_space<vmem>>, vector<1024x32xf32>
    %cst_21 = arith.constant dense<0.000000e+00> : vector<32x1024xf32>
    %40 = tpu.matmul %38, %39, %cst_21 {dimension_numbers = #tpu.dot_dimension_numbers<[1], [1], [0], [0], [0, 0, 1, 0], [], []>} : vector<32x32xf32>, vector<1024x32xf32>, vector<32x1024xf32> -> vector<32x1024xf32>
    %41 = vector.extract_strided_slice %40 {offsets = [0, 0], sizes = [8, 1024], strides = [1, 1]} : vector<32x1024xf32> to vector<8x1024xf32>
    %42 = vector.extract_strided_slice %40 {offsets = [8, 0], sizes = [8, 1024], strides = [1, 1]} : vector<32x1024xf32> to vector<8x1024xf32>
    %43 = vector.extract_strided_slice %40 {offsets = [16, 0], sizes = [8, 1024], strides = [1, 1]} : vector<32x1024xf32> to vector<8x1024xf32>
    %44 = vector.extract_strided_slice %40 {offsets = [24, 0], sizes = [8, 1024], strides = [1, 1]} : vector<32x1024xf32> to vector<8x1024xf32>
    %c0_22 = arith.constant 0 : index
    %c0_23 = arith.constant 0 : index
    %45 = vector.load %arg10[%c0_22, %c0_23] : memref<32x4xf32, #tpu.memory_space<vmem>>, vector<32x4xf32>
    %c0_24 = arith.constant 0 : index
    %c0_25 = arith.constant 0 : index
    %46 = vector.load %arg2[%c0_24, %c0_25] : memref<1024x4xf32, #tpu.memory_space<vmem>>, vector<1024x4xf32>
    %cst_26 = arith.constant dense<0.000000e+00> : vector<32x1024xf32>
    %47 = tpu.matmul %45, %46, %cst_26 {dimension_numbers = #tpu.dot_dimension_numbers<[1], [1], [0], [0], [0, 0, 1, 0], [], []>} : vector<32x4xf32>, vector<1024x4xf32>, vector<32x1024xf32> -> vector<32x1024xf32>
    %48 = vector.extract_strided_slice %47 {offsets = [0, 0], sizes = [8, 1024], strides = [1, 1]} : vector<32x1024xf32> to vector<8x1024xf32>
    %49 = vector.extract_strided_slice %47 {offsets = [8, 0], sizes = [8, 1024], strides = [1, 1]} : vector<32x1024xf32> to vector<8x1024xf32>
    %50 = vector.extract_strided_slice %47 {offsets = [16, 0], sizes = [8, 1024], strides = [1, 1]} : vector<32x1024xf32> to vector<8x1024xf32>
    %51 = vector.extract_strided_slice %47 {offsets = [24, 0], sizes = [8, 1024], strides = [1, 1]} : vector<32x1024xf32> to vector<8x1024xf32>
    %52 = arith.mulf %33, %41 : vector<8x1024xf32>
    %53 = arith.mulf %52, %48 : vector<8x1024xf32>
    %cst_27 = arith.constant 0.577350259 : f32
    %54 = vector.broadcast %cst_27 : f32 to vector<8x1024xf32>
    %55 = arith.mulf %36, %54 : vector<8x1024xf32>
    %56 = arith.mulf %42, %49 : vector<8x1024xf32>
    %57 = arith.mulf %43, %50 : vector<8x1024xf32>
    %58 = arith.addf %56, %57 : vector<8x1024xf32>
    %59 = arith.mulf %44, %51 : vector<8x1024xf32>
    %60 = arith.addf %58, %59 : vector<8x1024xf32>
    %61 = arith.mulf %55, %60 : vector<8x1024xf32>
    %62 = arith.mulf %34, %41 : vector<8x1024xf32>
    %63 = arith.mulf %62, %49 : vector<8x1024xf32>
    %64 = arith.mulf %62, %50 : vector<8x1024xf32>
    %65 = arith.mulf %62, %51 : vector<8x1024xf32>
    %66 = arith.mulf %35, %48 : vector<8x1024xf32>
    %67 = arith.mulf %66, %42 : vector<8x1024xf32>
    %68 = arith.mulf %66, %43 : vector<8x1024xf32>
    %69 = arith.mulf %66, %44 : vector<8x1024xf32>
    %cst_28 = arith.constant 0.707106769 : f32
    %70 = vector.broadcast %cst_28 : f32 to vector<8x1024xf32>
    %71 = arith.mulf %37, %70 : vector<8x1024xf32>
    %72 = arith.mulf %43, %51 : vector<8x1024xf32>
    %73 = arith.mulf %44, %50 : vector<8x1024xf32>
    %74 = arith.subf %72, %73 : vector<8x1024xf32>
    %75 = arith.mulf %71, %74 : vector<8x1024xf32>
    %76 = arith.mulf %44, %49 : vector<8x1024xf32>
    %77 = arith.mulf %42, %51 : vector<8x1024xf32>
    %78 = arith.subf %76, %77 : vector<8x1024xf32>
    %79 = arith.mulf %71, %78 : vector<8x1024xf32>
    %80 = arith.mulf %42, %50 : vector<8x1024xf32>
    %81 = arith.mulf %43, %49 : vector<8x1024xf32>
    %82 = arith.subf %80, %81 : vector<8x1024xf32>
    %83 = arith.mulf %71, %82 : vector<8x1024xf32>
    %cst_29 = arith.constant 1.000000e+00 : f32
    %84 = vector.broadcast %cst_29 : f32 to vector<8x1024xf32>
    %85 = tpu.concatenate %53, %61, %63, %67, %75, %64, %68, %79, %65, %69, %83, %84 in 0 : vector<8x1024xf32>, vector<8x1024xf32>, vector<8x1024xf32>, vector<8x1024xf32>, vector<8x1024xf32>, vector<8x1024xf32>, vector<8x1024xf32>, vector<8x1024xf32>, vector<8x1024xf32>, vector<8x1024xf32>, vector<8x1024xf32>, vector<8x1024xf32> -> vector<96x1024xf32>
    %c0_30 = arith.constant 0 : index
    %c0_31 = arith.constant 0 : index
    %86 = vector.load %arg11[%c0_30, %c0_31] : memref<32x96xf32, #tpu.memory_space<vmem>>, vector<32x96xf32>
    %cst_32 = arith.constant dense<0.000000e+00> : vector<32x1024xf32>
    %87 = tpu.matmul %86, %85, %cst_32 {dimension_numbers = #tpu.dot_dimension_numbers<[1], [0], [0], [1], [0, 0, 1, 1], [], []>} : vector<32x96xf32>, vector<96x1024xf32>, vector<32x1024xf32> -> vector<32x1024xf32>
    %c0_33 = arith.constant 0 : index
    %c0_34 = arith.constant 0 : index
    %88 = vector.load %arg12[%c0_33, %c0_34] : memref<32x1024xf32, #tpu.memory_space<vmem>>, vector<32x1024xf32>
    tpu.vector_store %arg12[%c0_33, %c0_34], %87 {strides = array<i32>} : memref<32x1024xf32, #tpu.memory_space<vmem>>, vector<32x1024xf32>,
    return
  }
  func.func @transform_0(%arg0: i32) -> (i32, i32) {
    %c0_i32 = arith.constant 0 : i32
    %c0_i32_0 = arith.constant 0 : i32
    return %arg0, %c0_i32 : i32, i32
  }
  func.func @transform_1(%arg0: i32) -> (i32, i32) {
    %c0_i32 = arith.constant 0 : i32
    %c0_i32_0 = arith.constant 0 : i32
    return %arg0, %c0_i32 : i32, i32
  }
  func.func @transform_2(%arg0: i32) -> (i32, i32) {
    %c0_i32 = arith.constant 0 : i32
    %c0_i32_0 = arith.constant 0 : i32
    return %arg0, %c0_i32 : i32, i32
  }
  func.func @transform_3(%arg0: i32) -> (i32, i32) {
    %c0_i32 = arith.constant 0 : i32
    %c0_i32_0 = arith.constant 0 : i32
    %c0_i32_1 = arith.constant 0 : i32
    return %c0_i32, %c0_i32_0 : i32, i32
  }
  func.func @transform_4(%arg0: i32) -> (i32, i32) {
    %c0_i32 = arith.constant 0 : i32
    %c0_i32_0 = arith.constant 0 : i32
    %c0_i32_1 = arith.constant 0 : i32
    return %c0_i32, %c0_i32_0 : i32, i32
  }
  func.func @transform_5(%arg0: i32) -> (i32, i32) {
    %c0_i32 = arith.constant 0 : i32
    %c0_i32_0 = arith.constant 0 : i32
    %c0_i32_1 = arith.constant 0 : i32
    return %c0_i32, %c0_i32_0 : i32, i32
  }
  func.func @transform_6(%arg0: i32) -> (i32, i32) {
    %c0_i32 = arith.constant 0 : i32
    %c0_i32_0 = arith.constant 0 : i32
    %c0_i32_1 = arith.constant 0 : i32
    return %c0_i32, %c0_i32_0 : i32, i32
  }
  func.func @transform_7(%arg0: i32) -> (i32, i32) {
    %c0_i32 = arith.constant 0 : i32
    %c0_i32_0 = arith.constant 0 : i32
    %c0_i32_1 = arith.constant 0 : i32
    return %c0_i32, %c0_i32_0 : i32, i32
  }
  func.func @transform_8(%arg0: i32) -> (i32, i32) {
    %c0_i32 = arith.constant 0 : i32
    %c0_i32_0 = arith.constant 0 : i32
    %c0_i32_1 = arith.constant 0 : i32
    return %c0_i32, %c0_i32_0 : i32, i32
  }
  func.func @transform_9(%arg0: i32) -> (i32, i32) {
    %c0_i32 = arith.constant 0 : i32
    %c0_i32_0 = arith.constant 0 : i32
    %c0_i32_1 = arith.constant 0 : i32
    return %c0_i32, %c0_i32_0 : i32, i32
  }
  func.func @transform_10(%arg0: i32) -> (i32, i32) {
    %c0_i32 = arith.constant 0 : i32
    %c0_i32_0 = arith.constant 0 : i32
    %c0_i32_1 = arith.constant 0 : i32
    return %c0_i32, %c0_i32_0 : i32, i32
  }
  func.func @transform_11(%arg0: i32) -> (i32, i32) {
    %c0_i32 = arith.constant 0 : i32
    %c0_i32_0 = arith.constant 0 : i32
    return %c0_i32, %arg0 : i32, i32
  }
}

</mosaic_0001>

<bundles_post_ra>
// kernel: tpu_custom_call.1
= control target key start
LH: loop header
LB: loop body
LE: loop exit
PB: predicated region body
PF: predicated region fallthrough
CT: control target
= control target key end

     0   :  { %s10259_s0 = inlined_call_operand.vmem [shape: f32[2048,32], index: 0, kind: input, shape index: {}]   ;;  %s10260_s1 = inlined_call_operand.vmem [shape: f32[2048,4], index: 1, kind: input, shape index: {}]   ;;  %s10261_s2 = inlined_call_operand.vmem [shape: f32[2048,16], index: 2, kind: input, shape index: {}]   ;;  %s10262_s3 = inlined_call_operand.vmem [shape: f32[32,16], index: 3, kind: input, shape index: {}]   ;;  %s10263_s4 = inlined_call_operand.vmem [shape: f32[32,1], index: 4, kind: input, shape index: {}]   ;;  %s10264_s5 = inlined_call_operand.vmem [shape: f32[32,1], index: 5, kind: input, shape index: {}]   ;;  %s10265_s6 = inlined_call_operand.vmem [shape: f32[40,32], index: 6, kind: input, shape index: {}]   ;;  %s10266_s7 = inlined_call_operand.vmem [shape: f32[40,1], index: 7, kind: input, shape index: {}]   ;;  %s10267_s8 = inlined_call_operand.vmem [shape: f32[32,32], index: 8, kind: input, shape index: {}]   ;;  %s10268_s9 = inlined_call_operand.vmem [shape: f32[32,4], index: 9, kind: input, shape index: {}]   ;;  %s10269_s10 = inlined_call_operand.vmem [shape: f32[32,96], index: 10, kind: input, shape index: {}]   ;;  %s10270_s11 = inlined_call_operand.hbm [shape: f32[32,2048], index: 11, kind: output, shape index: {}]  }
   0x1   :  { %10335 = sst [smem:[#allocation54_spill]] %s10261_s2 }
   0x2   :  { %16 = vsyncpa [#allocation3], 0 }
   0x3   :  { %18 = vsyncpa [#allocation3 + $0x1], 0  ;;  %s7458_s17 = smov 0   ;;  %s7460_s18 = smov 0  }
   0x4   :  { %s7462_s19 = smov 0   ;;  %s7464_s20 = smov 0  }
   0x5 LB: > { %s7479_s21 = sadd.s32 4294967295, %s7388_s20   ;;  %s5361_s22 = sadd.s32 4294967294, %s7388_s20   ;;  %s7388_s20 = sphi %s7464_s20, %s10556_s20   ;;  %s7384_s19 = sphi %s7462_s19, %s10555_s19   ;;  %s7380_s18 = sphi %s7460_s18, %s10554_s18   ;;  %s7376_s17 = sphi %s7458_s17, %s10553_s17  }
   0x6   : > { %s7483_s23 = sadd.s32 1, %s7388_s20   ;;  %s277_s24 = sadd.s32 1, %s7384_s19 }
   0x7   : > { %s274_s25 = ssub.s32 %s7388_s20, %s7483_s23  ;;  %p287_p0 = scmp.ne.s32.totalorder %s7384_s19, %s7380_s18 }
   0x8   : > { %p275_p1 = scmp.eq.s32.totalorder %s274_s25, 0  ;;  %p288_p2 = scmp.eq.s32.totalorder %s7479_s21, 1 }
   0x9   : > { %p293_p3 = scmp.ne.s32.totalorder %s7380_s18, %s7376_s17  ;;  %p294_p4 = scmp.eq.s32.totalorder %s5361_s22, 1 }
   0xa   : > { %s7494_s26 = scalar_select %p275_p1, %s7384_s19, %s277_s24  }
   0xb   : > { %p7496_p5 = por %p288_p2, %p287_p0  ;;  %p7500_p6 = por %p294_p4, %p293_p3 }
   0xc   : > { %p5364_p7 = scmp.ge.s32.totalorder %s7388_s20, 1  ;;  %p363_p8 = scmp.lt.s32.totalorder %s7388_s20, 3 }
   0xe   : > { %p364_p9 = pnand %p5364_p7, %p363_p8 }
  0x10   : > { %367 = sbr.rel (%p364_p9) target bundleno = 1492 (0x5d4), region = 64 }
  0x17   : > { %s5366_s29 = sshll.u32 %s7479_s21, 7  ;;  %vm564_vm0 = vcmask 130048   ;;  %v7510_v0 = vld [vmem:[%s10262_s3] sm:$0xff]  ;;  %s10338_s2 = sld [smem:[#allocation54_spill]]  ;;  %vm1317_vm2 = vcmask 261120   ;;  %vm3863_vm4 = vcmask 31744  }
  0x18   : > { %p414_p10 = scmp.lt.s32.totalorder %s5366_s29, 255  ;;  %5918 = vmatprep.mubr.msk.f32.mxu0 %vm564_vm0, %v7510_v0  ;;  %5958 = vmatprep.mubr.msk.f32.mxu1 %vm564_vm0, %v7510_v0  ;;  %vm7526_vm1 = vmpackc.low %vm564_vm0, %vm564_vm0  ;;  %v2081_v1 = vld [vmem:[%s10263_s4] sm:$0xff]  ;;  %vm4860_vm6 = vcmask 785408   ;;  %s410_s24 = sand.u32 1, %s7380_s18  }
  0x19   : > { %vm8666_vm3 = vmpackc.low %vm1317_vm2, %vm1317_vm2  ;;  %s5365_s25 = sshll.u32 %s410_s24, 8  ;;  %s5885_s30 = sshll.u32 %s7479_s21, 10 }
  0x1a   : > { %s10558_s29 = smov (!%p414_p10, %s5366_s29), 255  ;;  %vm9014_vm5 = vmpackc.low %vm3863_vm4, %vm3863_vm4  ;;  %s10218_s21 = scalar_lea.sflag [#allocation3], %s410_s24 }
  0x1b   : > { %s7516_s13 = sshll.u32 %s10558_s29, 3  ;;  %s10173_s29 = scalar_lea.vmem [#allocation2], %s5365_s25 }
  0x1c   : > { %s8648_s12 = scalar_lea.vmem %s10259_s0, %s7516_s13  ;;  %s8994_s15 = scalar_lea.vmem %s10260_s1, %s7516_s13 }
  0x1d   : > { %s7522_s16 = scalar_lea.vmem %s10338_s2, %s7516_s13  ;;  %s5275_s14 = sshll.u32 %s10173_s29, 4  ;;  %s10211_s14 = int_to_ptr.vmem [resolvable:$true] %s5275_s14 }
  0x1e   : > { %v452_v2 = vld [vmem:[%s7522_s16 + $0x80] sm:$0xff]  ;;  %v453_v3 = vld [vmem:[%s7522_s16 + $0x88] sm:$0xff]  ;;  %v454_v13 = vld [vmem:[%s7522_s16 + $0x90] sm:$0xff]  ;;  %s7394_s2 = smov [#allocation2]  }
  0x1f   : > { %v484_v4 = vld [vmem:[%s7522_s16 + $0x180] sm:$0xff]  ;;  %v6366_v5 = vpack.c.bf16 %v453_v3, %v452_v2  ;;  %v485_v6 = vld [vmem:[%s7522_s16 + $0x188] sm:$0xff]  ;;  %v455_v15 = vld [vmem:[%s7522_s16 + $0x98] sm:$0xff]  ;;  %s7330_s22 = sshll.u32 %s7394_s2, 4  ;;  %s7331_s22 = int_to_ptr.vmem [resolvable:$false] %s7330_s22 }
  0x20   : > { %v436_v7 = vld [vmem:[%s7522_s16] sm:$0xff]  ;;  %v437_v8 = vld [vmem:[%s7522_s16 + $0x8] sm:$0xff]  ;;  %v6414_v9 = vpack.c.bf16 %v485_v6, %v484_v4  ;;  %v486_v16 = vld [vmem:[%s7522_s16 + $0x190] sm:$0xff]  ;;  %v6372_v18 = vpack.c.bf16 %v455_v15, %v454_v13  ;;  %s7332_s25 = scalar_lea.vmem %s7331_s22, 8192  ;;  %p7333_p0 = scmp.lt.s32.totalorder %s10211_s14, %s7331_s22 }
  0x21   : > { %v6369_v10 = vpack.c.bf16 %v437_v8, %v436_v7  ;;  %v468_v11 = vld [vmem:[%s7522_s16 + $0x100] sm:$0xff]  ;;  %v469_v12 = vld [vmem:[%s7522_s16 + $0x108] sm:$0xff]  ;;  %6368 = vmatprep.subr.msk.bf16.mxu0 %vm7526_vm1, %v6366_v5  ;;  %v487_v17 = vld [vmem:[%s7522_s16 + $0x198] sm:$0xff] }
  0x22   : > { %v6417_v14 = vpack.c.bf16 %v469_v12, %v468_v11  ;;  %6416 = vmatprep.subr.msk.bf16.mxu1 %vm7526_vm1, %v6414_v9  ;;  %v6420_v19 = vpack.c.bf16 %v487_v17, %v486_v16  ;;  %v438_v20 = vld [vmem:[%s7522_s16 + $0x10] sm:$0xff]  ;;  %v439_v21 = vld [vmem:[%s7522_s16 + $0x18] sm:$0xff]  ;;  %v456_v24 = vld [vmem:[%s7522_s16 + $0xa0] sm:$0xff] }
  0x23   : > { %6371 = vmatpush3.bf16.xpose.msk.msra.mxu0 %vm7526_vm1, %v6369_v10  ;;  %v470_v22 = vld [vmem:[%s7522_s16 + $0x110] sm:$0xff]  ;;  %v471_v23 = vld [vmem:[%s7522_s16 + $0x118] sm:$0xff]  ;;  %v457_v25 = vld [vmem:[%s7522_s16 + $0xa8] sm:$0xff]  ;;  %v6375_v28 = vpack.c.bf16 %v439_v21, %v438_v20 }
  0x24   : > { %6419 = vmatpush3.bf16.xpose.msk.msra.mxu1 %vm7526_vm1, %v6417_v14  ;;  %6374 = vmatprep.subr.msk.bf16.mxu0 %vm7526_vm1, %v6372_v18  ;;  %v488_v26 = vld [vmem:[%s7522_s16 + $0x1a0] sm:$0xff]  ;;  %v489_v27 = vld [vmem:[%s7522_s16 + $0x1a8] sm:$0xff]  ;;  %v6423_v29 = vpack.c.bf16 %v471_v23, %v470_v22  ;;  %v6378_v30 = vpack.c.bf16 %v457_v25, %v456_v24  ;;  %v458_v36 = vld [vmem:[%s7522_s16 + $0xb0] sm:$0xff] }
  0x25   : > { %6422 = vmatprep.subr.msk.bf16.mxu1 %vm7526_vm1, %v6420_v19  ;;  %v6426_v31 = vpack.c.bf16 %v489_v27, %v488_v26  ;;  %v440_v32 = vld [vmem:[%s7522_s16 + $0x20] sm:$0xff]  ;;  %v441_v33 = vld [vmem:[%s7522_s16 + $0x28] sm:$0xff]  ;;  %v459_v37 = vld [vmem:[%s7522_s16 + $0xb8] sm:$0xff] }
  0x26   : > { %v472_v34 = vld [vmem:[%s7522_s16 + $0x120] sm:$0xff]  ;;  %v473_v35 = vld [vmem:[%s7522_s16 + $0x128] sm:$0xff]  ;;  %v490_v38 = vld [vmem:[%s7522_s16 + $0x1b0] sm:$0xff]  ;;  %v6381_v40 = vpack.c.bf16 %v441_v33, %v440_v32  ;;  %v6384_v42 = vpack.c.bf16 %v459_v37, %v458_v36 }
  0x27   : > { %v491_v39 = vld [vmem:[%s7522_s16 + $0x1b8] sm:$0xff]  ;;  %v6429_v41 = vpack.c.bf16 %v473_v35, %v472_v34  ;;  %v442_v44 = vld [vmem:[%s7522_s16 + $0x30] sm:$0xff]  ;;  %v460_v48 = vld [vmem:[%s7522_s16 + $0xc0] sm:$0xff] }
  0x28   : > { %v6432_v43 = vpack.c.bf16 %v491_v39, %v490_v38  ;;  %v443_v45 = vld [vmem:[%s7522_s16 + $0x38] sm:$0xff]  ;;  %v474_v46 = vld [vmem:[%s7522_s16 + $0x130] sm:$0xff]  ;;  %v461_v49 = vld [vmem:[%s7522_s16 + $0xc8] sm:$0xff] }
  0x29   : > { %v475_v47 = vld [vmem:[%s7522_s16 + $0x138] sm:$0xff]  ;;  %v492_v50 = vld [vmem:[%s7522_s16 + $0x1c0] sm:$0xff]  ;;  %v493_v51 = vld [vmem:[%s7522_s16 + $0x1c8] sm:$0xff]  ;;  %v6387_v52 = vpack.c.bf16 %v443_v45, %v442_v44  ;;  %v6390_v54 = vpack.c.bf16 %v461_v49, %v460_v48 }
  0x2a   : > { %v6435_v53 = vpack.c.bf16 %v475_v47, %v474_v46  ;;  %v6438_v55 = vpack.c.bf16 %v493_v51, %v492_v50  ;;  %v444_v56 = vld [vmem:[%s7522_s16 + $0x40] sm:$0xff]  ;;  %v445_v57 = vld [vmem:[%s7522_s16 + $0x48] sm:$0xff]  ;;  %v462_v60 = vld [vmem:[%s7522_s16 + $0xd0] sm:$0xff] }
  0x2b   : > { %6377 = vmatpush3.bf16.xpose.msk.msra.mxu0 %vm7526_vm1, %v6375_v28  ;;  %v476_v58 = vld [vmem:[%s7522_s16 + $0x140] sm:$0xff]  ;;  %v477_v59 = vld [vmem:[%s7522_s16 + $0x148] sm:$0xff]  ;;  %v463_v61 = vld [vmem:[%s7522_s16 + $0xd8] sm:$0xff]  ;;  %v6393_v2 = vpack.c.bf16 %v445_v57, %v444_v56 }
  0x2c   : > { %6425 = vmatpush3.bf16.xpose.msk.msra.mxu1 %vm7526_vm1, %v6423_v29  ;;  %6380 = vmatprep.subr.msk.bf16.mxu0 %vm7526_vm1, %v6378_v30  ;;  %v494_v62 = vld [vmem:[%s7522_s16 + $0x1d0] sm:$0xff]  ;;  %v495_v63 = vld [vmem:[%s7522_s16 + $0x1d8] sm:$0xff]  ;;  %v6441_v3 = vpack.c.bf16 %v477_v59, %v476_v58  ;;  %v6396_v4 = vpack.c.bf16 %v463_v61, %v462_v60  ;;  %v464_v10 = vld [vmem:[%s7522_s16 + $0xe0] sm:$0xff] }
  0x2d   : > { %6428 = vmatprep.subr.msk.bf16.mxu1 %vm7526_vm1, %v6426_v31  ;;  %v6444_v5 = vpack.c.bf16 %v495_v63, %v494_v62  ;;  %v446_v6 = vld [vmem:[%s7522_s16 + $0x50] sm:$0xff]  ;;  %v447_v7 = vld [vmem:[%s7522_s16 + $0x58] sm:$0xff]  ;;  %v465_v11 = vld [vmem:[%s7522_s16 + $0xe8] sm:$0xff] }
  0x2e   : > { %v478_v8 = vld [vmem:[%s7522_s16 + $0x150] sm:$0xff]  ;;  %v479_v9 = vld [vmem:[%s7522_s16 + $0x158] sm:$0xff]  ;;  %v496_v12 = vld [vmem:[%s7522_s16 + $0x1e0] sm:$0xff]  ;;  %v6399_v14 = vpack.c.bf16 %v447_v7, %v446_v6  ;;  %v6402_v16 = vpack.c.bf16 %v465_v11, %v464_v10 }
  0x2f   : > { %v497_v13 = vld [vmem:[%s7522_s16 + $0x1e8] sm:$0xff]  ;;  %v6447_v15 = vpack.c.bf16 %v479_v9, %v478_v8  ;;  %v448_v18 = vld [vmem:[%s7522_s16 + $0x60] sm:$0xff]  ;;  %v466_v22 = vld [vmem:[%s7522_s16 + $0xf0] sm:$0xff] }
  0x30   : > { %v6450_v17 = vpack.c.bf16 %v497_v13, %v496_v12  ;;  %v449_v19 = vld [vmem:[%s7522_s16 + $0x68] sm:$0xff]  ;;  %v480_v20 = vld [vmem:[%s7522_s16 + $0x160] sm:$0xff]  ;;  %v467_v23 = vld [vmem:[%s7522_s16 + $0xf8] sm:$0xff] }
  0x31   : > { %v481_v21 = vld [vmem:[%s7522_s16 + $0x168] sm:$0xff]  ;;  %v498_v24 = vld [vmem:[%s7522_s16 + $0x1f0] sm:$0xff]  ;;  %v499_v25 = vld [vmem:[%s7522_s16 + $0x1f8] sm:$0xff]  ;;  %v6405_v26 = vpack.c.bf16 %v449_v19, %v448_v18  ;;  %v6408_v28 = vpack.c.bf16 %v467_v23, %v466_v22 }
  0x32   : > { %v6453_v27 = vpack.c.bf16 %v481_v21, %v480_v20  ;;  %v6456_v29 = vpack.c.bf16 %v499_v25, %v498_v24  ;;  %v450_v30 = vld [vmem:[%s7522_s16 + $0x70] sm:$0xff]  ;;  %v451_v31 = vld [vmem:[%s7522_s16 + $0x78] sm:$0xff]  ;;  %v516_v34 = vld [vmem:[%s7522_s16 + $0x280] sm:$0xff] }
  0x33   : > { %6383 = vmatpush3.bf16.xpose.msk.msra.mxu0 %vm7526_vm1, %v6381_v40  ;;  %v482_v32 = vld [vmem:[%s7522_s16 + $0x170] sm:$0xff]  ;;  %v483_v33 = vld [vmem:[%s7522_s16 + $0x178] sm:$0xff]  ;;  %v517_v35 = vld [vmem:[%s7522_s16 + $0x288] sm:$0xff]  ;;  %v6411_v38 = vpack.c.bf16 %v451_v31, %v450_v30 }
  0x34   : > { %6431 = vmatpush3.bf16.xpose.msk.msra.mxu1 %vm7526_vm1, %v6429_v41  ;;  %6386 = vmatprep.subr.msk.bf16.mxu0 %vm7526_vm1, %v6384_v42  ;;  %v548_v36 = vld [vmem:[%s7522_s16 + $0x380] sm:$0xff]  ;;  %v549_v37 = vld [vmem:[%s7522_s16 + $0x388] sm:$0xff]  ;;  %v6459_v39 = vpack.c.bf16 %v483_v33, %v482_v32  ;;  %v6462_v40 = vpack.c.bf16 %v517_v35, %v516_v34  ;;  %v518_v46 = vld [vmem:[%s7522_s16 + $0x290] sm:$0xff] }
  0x35   : > { %6434 = vmatprep.subr.msk.bf16.mxu1 %vm7526_vm1, %v6432_v43  ;;  %v6510_v41 = vpack.c.bf16 %v549_v37, %v548_v36  ;;  %v500_v42 = vld [vmem:[%s7522_s16 + $0x200] sm:$0xff]  ;;  %v501_v43 = vld [vmem:[%s7522_s16 + $0x208] sm:$0xff]  ;;  %v519_v47 = vld [vmem:[%s7522_s16 + $0x298] sm:$0xff] }
  0x36   : > { %v532_v44 = vld [vmem:[%s7522_s16 + $0x300] sm:$0xff]  ;;  %v533_v45 = vld [vmem:[%s7522_s16 + $0x308] sm:$0xff]  ;;  %v6465_v48 = vpack.c.bf16 %v501_v43, %v500_v42  ;;  %v550_v49 = vld [vmem:[%s7522_s16 + $0x390] sm:$0xff] }
  0x37   : > { %v551_v50 = vld [vmem:[%s7522_s16 + $0x398] sm:$0xff]  ;;  %v6513_v51 = vpack.c.bf16 %v533_v45, %v532_v44  ;;  %v502_v56 = vld [vmem:[%s7522_s16 + $0x210] sm:$0xff]  ;;  %v520_v60 = vld [vmem:[%s7522_s16 + $0x2a0] sm:$0xff] }
  0x38   : > { %v503_v57 = vld [vmem:[%s7522_s16 + $0x218] sm:$0xff]  ;;  %v534_v58 = vld [vmem:[%s7522_s16 + $0x310] sm:$0xff]  ;;  %v521_v61 = vld [vmem:[%s7522_s16 + $0x2a8] sm:$0xff] }
  0x39   : > { %v535_v59 = vld [vmem:[%s7522_s16 + $0x318] sm:$0xff]  ;;  %v6471_v62 = vpack.c.bf16 %v503_v57, %v502_v56  ;;  %v552_v63 = vld [vmem:[%s7522_s16 + $0x3a0] sm:$0xff]  ;;  %v505_v8 = vld [vmem:[%s7522_s16 + $0x228] sm:$0xff] }
  0x3a   : > { %v504_v7 = vld [vmem:[%s7522_s16 + $0x220] sm:$0xff]  ;;  %v537_v10 = vld [vmem:[%s7522_s16 + $0x328] sm:$0xff]  ;;  %v522_v11 = vld [vmem:[%s7522_s16 + $0x2b0] sm:$0xff] }
  0x3b   : > { %6389 = vmatpush3.bf16.xpose.msk.msra.mxu0 %vm7526_vm1, %v6387_v52  ;;  %v7677_v52 = vld [vmem:[%s10262_s3 + $0x8] sm:$0xff]  ;;  %v536_v9 = vld [vmem:[%s7522_s16 + $0x320] sm:$0xff]  ;;  %v523_v12 = vld [vmem:[%s7522_s16 + $0x2b8] sm:$0xff] }
  0x3c   : > { %6437 = vmatpush3.bf16.xpose.msk.msra.mxu1 %vm7526_vm1, %v6435_v53  ;;  %6392 = vmatprep.subr.msk.bf16.mxu0 %vm7526_vm1, %v6390_v54  ;;  %v6468_v53 = vpack.c.bf16 %v519_v47, %v518_v46  ;;  %v6516_v54 = vpack.c.bf16 %v551_v50, %v550_v49  ;;  %v554_v13 = vld [vmem:[%s7522_s16 + $0x3b0] sm:$0xff]  ;;  %v507_v20 = vld [vmem:[%s7522_s16 + $0x238] sm:$0xff]  ;;  %v524_v23 = vld [vmem:[%s7522_s16 + $0x2c0] sm:$0xff] }
  0x3d   : > { %6440 = vmatprep.subr.msk.bf16.mxu1 %vm7526_vm1, %v6438_v55  ;;  %v7692_v55 = vld [vmem:[%s10262_s3 + $0x10] sm:$0xff]  ;;  %v539_v22 = vld [vmem:[%s7522_s16 + $0x338] sm:$0xff]  ;;  %v525_v24 = vld [vmem:[%s7522_s16 + $0x2c8] sm:$0xff] }
  0x3e   : > { %v506_v19 = vld [vmem:[%s7522_s16 + $0x230] sm:$0xff]  ;;  %v556_v25 = vld [vmem:[%s7522_s16 + $0x3c0] sm:$0xff]  ;;  %v509_v32 = vld [vmem:[%s7522_s16 + $0x248] sm:$0xff] }
  0x3f   : > { %v538_v21 = vld [vmem:[%s7522_s16 + $0x330] sm:$0xff]  ;;  %v508_v31 = vld [vmem:[%s7522_s16 + $0x240] sm:$0xff]  ;;  %v541_v34 = vld [vmem:[%s7522_s16 + $0x348] sm:$0xff] }
  0x40   : > { %v540_v33 = vld [vmem:[%s7522_s16 + $0x340] sm:$0xff]  ;;  %v526_v35 = vld [vmem:[%s7522_s16 + $0x2d0] sm:$0xff]  ;;  %v527_v36 = vld [vmem:[%s7522_s16 + $0x2d8] sm:$0xff] }
  0x41   : > { %v558_v37 = vld [vmem:[%s7522_s16 + $0x3d0] sm:$0xff]  ;;  %v511_v44 = vld [vmem:[%s7522_s16 + $0x258] sm:$0xff]  ;;  %v528_v47 = vld [vmem:[%s7522_s16 + $0x2e0] sm:$0xff] }
  0x42   : > { %v510_v43 = vld [vmem:[%s7522_s16 + $0x250] sm:$0xff]  ;;  %v543_v46 = vld [vmem:[%s7522_s16 + $0x358] sm:$0xff]  ;;  %v560_v49 = vld [vmem:[%s7522_s16 + $0x3e0] sm:$0xff] }
  0x43   : > { %6395 = vmatpush3.bf16.xpose.msk.msra.mxu0 %vm7526_vm1, %v6393_v2  ;;  %v553_v2 = vld [vmem:[%s7522_s16 + $0x3a8] sm:$0xff]  ;;  %v542_v45 = vld [vmem:[%s7522_s16 + $0x350] sm:$0xff]  ;;  %v512_v57 = vld [vmem:[%s7522_s16 + $0x260] sm:$0xff] }
  0x44   : > { %6443 = vmatpush3.bf16.xpose.msk.msra.mxu1 %vm7526_vm1, %v6441_v3  ;;  %6398 = vmatprep.subr.msk.bf16.mxu0 %vm7526_vm1, %v6396_v4  ;;  %v6519_v3 = vpack.c.bf16 %v535_v59, %v534_v58  ;;  %v7719_v4 = vld [vmem:[%s10262_s3 + $0x18] sm:$0xff]  ;;  %v6522_v6 = vpack.c.bf16 %v553_v2, %v552_v63  ;;  %v561_v50 = vld [vmem:[%s7522_s16 + $0x3e8] sm:$0xff]  ;;  %v544_v59 = vld [vmem:[%s7522_s16 + $0x360] sm:$0xff] }
  0x45   : > { %6446 = vmatprep.subr.msk.bf16.mxu1 %vm7526_vm1, %v6444_v5  ;;  %v6474_v5 = vpack.c.bf16 %v521_v61, %v520_v60  ;;  %v6546_v56 = vpack.c.bf16 %v561_v50, %v560_v49  ;;  %v513_v58 = vld [vmem:[%s7522_s16 + $0x268] sm:$0xff]  ;;  %v530_v61 = vld [vmem:[%s7522_s16 + $0x2f0] sm:$0xff]  ;;  %v563_v2 = vld [vmem:[%s7522_s16 + $0x3f8] sm:$0xff] }
  0x46   : > { %v545_v60 = vld [vmem:[%s7522_s16 + $0x368] sm:$0xff]  ;;  %v562_v63 = vld [vmem:[%s7522_s16 + $0x3f0] sm:$0xff] }
  0x4b   : > { %6401 = vmatpush3.bf16.xpose.msk.msra.mxu0 %vm7526_vm1, %v6399_v14  ;;  %v555_v14 = vld [vmem:[%s7522_s16 + $0x3b8] sm:$0xff] }
  0x4c   : > { %6449 = vmatpush3.bf16.xpose.msk.msra.mxu1 %vm7526_vm1, %v6447_v15  ;;  %6404 = vmatprep.subr.msk.bf16.mxu0 %vm7526_vm1, %v6402_v16  ;;  %v6477_v15 = vpack.c.bf16 %v505_v8, %v504_v7  ;;  %v6525_v16 = vpack.c.bf16 %v537_v10, %v536_v9  ;;  %v6528_v18 = vpack.c.bf16 %v555_v14, %v554_v13  ;;  %v514_v8 = vld [vmem:[%s7522_s16 + $0x270] sm:$0xff]  ;;  %v515_v9 = vld [vmem:[%s7522_s16 + $0x278] sm:$0xff]  ;;  %v2138_v14 = vld [vmem:[%s10264_s5 + $0x8] sm:$0xff] }
  0x4d   : > { %6452 = vmatprep.subr.msk.bf16.mxu1 %vm7526_vm1, %v6450_v17  ;;  %v6480_v17 = vpack.c.bf16 %v523_v12, %v522_v11  ;;  %v6552_v7 = vpack.c.bf16 %v563_v2, %v562_v63  ;;  %v546_v10 = vld [vmem:[%s7522_s16 + $0x370] sm:$0xff]  ;;  %v547_v11 = vld [vmem:[%s7522_s16 + $0x378] sm:$0xff]  ;;  %v6507_v12 = vpack.c.bf16 %v515_v9, %v514_v8 }
  0x4e   : > { %v6555_v13 = vpack.c.bf16 %v547_v11, %v546_v10 }
  0x53   : > { %6407 = vmatpush3.bf16.xpose.msk.msra.mxu0 %vm7526_vm1, %v6405_v26  ;;  %v557_v26 = vld [vmem:[%s7522_s16 + $0x3c8] sm:$0xff] }
  0x54   : > { %6455 = vmatpush3.bf16.xpose.msk.msra.mxu1 %vm7526_vm1, %v6453_v27  ;;  %6410 = vmatprep.subr.msk.bf16.mxu0 %vm7526_vm1, %v6408_v28  ;;  %v6483_v27 = vpack.c.bf16 %v507_v20, %v506_v19  ;;  %v6531_v28 = vpack.c.bf16 %v539_v22, %v538_v21  ;;  %v6534_v30 = vpack.c.bf16 %v557_v26, %v556_v25  ;;  %v2422_v19 = vld [vmem:[%s10266_s7] sm:$0xff]  ;;  %v2425_v20 = vld [vmem:[%s10266_s7 + $0x18] sm:$0xff]  ;;  %v2423_v21 = vld [vmem:[%s10266_s7 + $0x8] sm:$0xff] }
  0x55   : > { %6458 = vmatprep.subr.msk.bf16.mxu1 %vm7526_vm1, %v6456_v29  ;;  %v6486_v29 = vpack.c.bf16 %v525_v24, %v524_v23  ;;  %v2424_v22 = vld [vmem:[%s10266_s7 + $0x10] sm:$0xff]  ;;  %v2426_v23 = vld [vmem:[%s10266_s7 + $0x20] sm:$0xff] }
  0x5b   : > { %6413 = vmatpush3.bf16.xpose.msk.msra.mxu0 %vm7526_vm1, %v6411_v38  ;;  %v559_v38 = vld [vmem:[%s7522_s16 + $0x3d8] sm:$0xff] }
  0x5c   : > { %6461 = vmatpush3.bf16.xpose.msk.msra.mxu1 %vm7526_vm1, %v6459_v39  ;;  %6464 = vmatprep.subr.msk.bf16.mxu0 %vm7526_vm1, %v6462_v40  ;;  %v6489_v39 = vpack.c.bf16 %v509_v32, %v508_v31  ;;  %v6537_v40 = vpack.c.bf16 %v541_v34, %v540_v33  ;;  %v6540_v42 = vpack.c.bf16 %v559_v38, %v558_v37 }
  0x5d   : > { %6512 = vmatprep.subr.msk.bf16.mxu1 %vm7526_vm1, %v6510_v41  ;;  %v6492_v41 = vpack.c.bf16 %v527_v36, %v526_v35 }
  0x62   : > { %5919 = vmatmul.mubr.msk.f32.vlgmr.msra.gmra.mrb[0].mxu0 %vm564_vm0, %v7510_v0 }
  0x63   : > { %5959 = vmatmul.mubr.msk.f32.vlgmr.msra.gmra.mrb[0].mxu1 %vm564_vm0, %v7510_v0  ;;  %6467 = vmatpush3.bf16.xpose.msk.msra.mxu0 %vm7526_vm1, %v6465_v48  ;;  %v529_v48 = vld [vmem:[%s7522_s16 + $0x2e8] sm:$0xff] }
  0x64   : > { %6515 = vmatpush3.bf16.xpose.msk.msra.mxu1 %vm7526_vm1, %v6513_v51  ;;  %5920 = vmatprep.mubr.msk.f32.mxu0 %vm564_vm0, %v7677_v52  ;;  %v6495_v51 = vpack.c.bf16 %v511_v44, %v510_v43 }
  0x65   : > { %5960 = vmatprep.mubr.msk.f32.mxu1 %vm564_vm0, %v7677_v52  ;;  %6470 = vmatprep.subr.msk.bf16.mxu0 %vm7526_vm1, %v6468_v53  ;;  %v6543_v53 = vpack.c.bf16 %v543_v46, %v542_v45 }
  0x66   : > { %5921 = vmatmul.mubr.msk.f32.gmra.mrb[2].mxu0 %vm564_vm0, %v7677_v52  ;;  %6518 = vmatprep.subr.msk.bf16.mxu1 %vm7526_vm1, %v6516_v54  ;;  %v6498_v54 = vpack.c.bf16 %v529_v48, %v528_v47 }
  0x67   : > { %5961 = vmatmul.mubr.msk.f32.gmra.mrb[2].mxu1 %vm564_vm0, %v7677_v52  ;;  %5922 = vmatprep.mubr.msk.f32.mxu0 %vm564_vm0, %v7692_v55 }
  0x68   : > { %5962 = vmatprep.mubr.msk.f32.mxu1 %vm564_vm0, %v7692_v55 }
  0x6a   : > { %5923 = vmatmul.mubr.msk.f32.gmra.mrb[4].mxu0 %vm564_vm0, %v7692_v55 }
  0x6b   : > { %5963 = vmatmul.mubr.msk.f32.gmra.mrb[4].mxu1 %vm564_vm0, %v7692_v55  ;;  %6473 = vmatpush3.bf16.xpose.msk.msra.mxu0 %vm7526_vm1, %v6471_v62  ;;  %v531_v62 = vld [vmem:[%s7522_s16 + $0x2f8] sm:$0xff]  ;;  %s7326_s16 = scalar_lea.vmem %s10211_s14, 4096 }
  0x6c   : > { %6521 = vmatpush3.bf16.xpose.msk.msra.mxu1 %vm7526_vm1, %v6519_v3  ;;  %5924 = vmatprep.mubr.msk.f32.mxu0 %vm564_vm0, %v7719_v4  ;;  %v6501_v3 = vpack.c.bf16 %v513_v58, %v512_v57  ;;  %p7327_p11 = scmp.ne.s32.totalorder %s10211_s14, %s7326_s16  ;;  %p7334_p1 = scmp.lt.s32.totalorder %s7332_s25, %s7326_s16 }
  0x6d   : > { %5964 = vmatprep.mubr.msk.f32.mxu1 %vm564_vm0, %v7719_v4  ;;  %6476 = vmatprep.subr.msk.bf16.mxu0 %vm7526_vm1, %v6474_v5  ;;  %v6549_v5 = vpack.c.bf16 %v545_v60, %v544_v59 }
  0x6e   : > { %5925 = vmatmul.mubr.msk.f32.gmra.mrb[6].mxu0 %vm564_vm0, %v7719_v4  ;;  %6524 = vmatprep.subr.msk.bf16.mxu1 %vm7526_vm1, %v6522_v6  ;;  %v6504_v6 = vpack.c.bf16 %v531_v62, %v530_v61  ;;  %p7328_p12 = pnand %p7327_p11, %p7496_p5  ;;  %p7335_p2 = por %p7334_p1, %p7333_p0 }
  0x6f   : > { %5965 = vmatmul.mubr.msk.f32.gmra.mrb[6].mxu1 %vm564_vm0, %v7719_v4  ;;  %5998 = vmatprep.mubr.msk.f32.mxu0 %vm564_vm0, %v7510_v0 }
  0x70   : > { %6038 = vmatprep.mubr.msk.f32.mxu1 %vm564_vm0, %v7510_v0  ;;  %p7329_p13 = pneg %p7328_p12 }
  0x72   : > { %p7336_p3 = pnand %p7335_p2, %p7329_p13 }
  0x73   : > { %6479 = vmatpush3.bf16.xpose.msk.msra.mxu0 %vm7526_vm1, %v6477_v15  ;;  %v2083_v15 = vld [vmem:[%s10263_s4 + $0x10] sm:$0xff] }
  0x74   : > { %6527 = vmatpush3.bf16.xpose.msk.msra.mxu1 %vm7526_vm1, %v6525_v16  ;;  %6482 = vmatprep.subr.msk.bf16.mxu0 %vm7526_vm1, %v6480_v17  ;;  %v2084_v16 = vld [vmem:[%s10263_s4 + $0x18] sm:$0xff]  ;;  %v2139_v17 = vld [vmem:[%s10264_s5 + $0x10] sm:$0xff] }
  0x75   : > { %6530 = vmatprep.subr.msk.bf16.mxu1 %vm7526_vm1, %v6528_v18  ;;  %v2140_v18 = vld [vmem:[%s10264_s5 + $0x18] sm:$0xff] }
  0x7b   : > { %6485 = vmatpush3.bf16.xpose.msk.msra.mxu0 %vm7526_vm1, %v6483_v27 }
  0x7c   : > { %6533 = vmatpush3.bf16.xpose.msk.msra.mxu1 %vm7526_vm1, %v6531_v28  ;;  %6488 = vmatprep.subr.msk.bf16.mxu0 %vm7526_vm1, %v6486_v29 }
  0x7d   : > { %6536 = vmatprep.subr.msk.bf16.mxu1 %vm7526_vm1, %v6534_v30 }
  0x83   : > { %6491 = vmatpush3.bf16.xpose.msk.msra.mxu0 %vm7526_vm1, %v6489_v39 }
  0x84   : > { %6539 = vmatpush3.bf16.xpose.msk.msra.mxu1 %vm7526_vm1, %v6537_v40  ;;  %6494 = vmatprep.subr.msk.bf16.mxu0 %vm7526_vm1, %v6492_v41 }
  0x85   : > { %6542 = vmatprep.subr.msk.bf16.mxu1 %vm7526_vm1, %v6540_v42 }
  0x8b   : > { %6497 = vmatpush3.bf16.xpose.msk.msra.mxu0 %vm7526_vm1, %v6495_v51 }
  0x8c   : > { %6545 = vmatpush3.bf16.xpose.msk.msra.mxu1 %vm7526_vm1, %v6543_v53  ;;  %6500 = vmatprep.subr.msk.bf16.mxu0 %vm7526_vm1, %v6498_v54 }
  0x8d   : > { %6548 = vmatprep.subr.msk.bf16.mxu1 %vm7526_vm1, %v6546_v56 }
  0x93   : > { %6503 = vmatpush3.bf16.xpose.msk.msra.mxu0 %vm7526_vm1, %v6501_v3 }
  0x94   : > { %6551 = vmatpush3.bf16.xpose.msk.msra.mxu1 %vm7526_vm1, %v6549_v5  ;;  %6506 = vmatprep.subr.msk.bf16.mxu0 %vm7526_vm1, %v6504_v6 }
  0x95   : > { %6554 = vmatprep.subr.msk.bf16.mxu1 %vm7526_vm1, %v6552_v7 }
  0x9b   : > { %6509 = vmatpush3.bf16.xpose.msk.msra.mxu0 %vm7526_vm1, %v6507_v12 }
  0x9c   : > { %6557 = vmatpush3.bf16.xpose.msk.msra.mxu1 %vm7526_vm1, %v6555_v13  ;;  %v10273_v13 = vmov 0.03125  }
  0xa2   : > { %5999 = vmatmul.mubr.msk.f32.vlgmr.msra.gmra.mrb[8].mxu0 %vm564_vm0, %v7510_v0 }
  0xa3   : > { %6039 = vmatmul.mubr.msk.f32.vlgmr.msra.gmra.mrb[8].mxu1 %vm564_vm0, %v7510_v0  ;;  %6000 = vmatprep.mubr.msk.f32.mxu0 %vm564_vm0, %v7677_v52  ;;  %v10271_v0 = vmov 0.0  }
  0xa4   : > { %6040 = vmatprep.mubr.msk.f32.mxu1 %vm564_vm0, %v7677_v52 }
  0xa6   : > { %6001 = vmatmul.mubr.msk.f32.gmra.mrb[10].mxu0 %vm564_vm0, %v7677_v52 }
  0xa7   : > { %6041 = vmatmul.mubr.msk.f32.gmra.mrb[10].mxu1 %vm564_vm0, %v7677_v52  ;;  %6002 = vmatprep.mubr.msk.f32.mxu0 %vm564_vm0, %v7692_v55  ;;  %v2137_v52 = vld [vmem:[%s10264_s5] sm:$0xff] }
  0xa8   : > { %6042 = vmatprep.mubr.msk.f32.mxu1 %vm564_vm0, %v7692_v55 }
  0xaa   : > { %6003 = vmatmul.mubr.msk.f32.gmra.mrb[12].mxu0 %vm564_vm0, %v7692_v55 }
  0xab   : > { %6043 = vmatmul.mubr.msk.f32.gmra.mrb[12].mxu1 %vm564_vm0, %v7692_v55  ;;  %6004 = vmatprep.mubr.msk.f32.mxu0 %vm564_vm0, %v7719_v4  ;;  %v7391_v55 = vmov 0  }
  0xac   : > { %6044 = vmatprep.mubr.msk.f32.mxu1 %vm564_vm0, %v7719_v4  ;;  %7180 = vset.pattern.permute.xlu0 %v7391_v55 }
  0xad   : > { %7181 = vset.pattern.permute.xlu1 %v7391_v55  ;;  %2087 = vperm.xlu0 %7180, %v2081_v1  }
  0xae   : > { %6005 = vmatmul.mubr.msk.f32.gmra.mrb[14].mxu0 %vm564_vm0, %v7719_v4  ;;  %2143 = vperm.xlu1 %7181, %v2137_v52  }
  0xaf   : > { %6045 = vmatmul.mubr.msk.f32.gmra.mrb[14].mxu1 %vm564_vm0, %v7719_v4  ;;  %1385 = vmatprep.mubr.f32.mxu0 %v10271_v0  ;;  %v2082_v4 = vld [vmem:[%s10263_s4 + $0x8] sm:$0xff] }
  0xb0   : > { %1456 = vmatprep.mubr.f32.mxu1 %v10271_v0 }
  0xb1   : > { %2092 = vperm.xlu0 %7180, %v2082_v4  }
  0xb2   : > { %2148 = vperm.xlu1 %7181, %v2138_v14  }
  0xb5   : > { %2097 = vperm.xlu0 %7180, %v2083_v15  }
  0xb6   : > { %2102 = vperm.xlu1 %7181, %v2084_v16  }
  0xb9   : > { %2153 = vperm.xlu0 %7180, %v2139_v17  }
  0xba   : > { %2158 = vperm.xlu1 %7181, %v2140_v18  }
  0xbd   : > { %2429 = vperm.xlu0 %7180, %v2422_v19  }
  0xbe   : > { %2444 = vperm.xlu1 %7181, %v2425_v20  }
  0xc1   : > { %2434 = vperm.xlu0 %7180, %v2423_v21  }
  0xc2   : > { %2439 = vperm.xlu1 %7181, %v2424_v22  }
  0xc5   : > { %2449 = vperm.xlu0 %7180, %v2426_v23  }
 0x135   : > { %v7902_v24 = vpop.f32.mrb[0].mxu0 }
 0x136   : > { %v7904_v25 = vpop.f32.mrb[0].mxu1  ;;  %v7906_v26 = vpop.f32.mrb[1].mxu0  ;;  %v7912_v28 = vmul.f32 %v7902_v24, %v7902_v24 }
 0x137   : > { %v7908_v27 = vpop.f32.mrb[1].mxu1  ;;  %v7918_v30 = vmul.f32 %v7904_v25, %v7904_v25  ;;  %v7922_v31 = vmul.f32 %v7906_v26, %v7906_v26 }
 0x138   : > { %v7950_v41 = vmul.f32 %v7908_v27, %v7908_v27 }
 0x139   : > { %v7914_v29 = vpop.f32.mrb[2].mxu0 }
 0x13a   : > { %v6560_v32 = vpack.c.bf16 %v7914_v29, %v7902_v24  ;;  %v7928_v33 = vmul.f32 %v7914_v29, %v7914_v29  ;;  %v7930_v34 = vpop.f32.mrb[2].mxu1  ;;  %v7932_v35 = vpop.f32.mrb[3].mxu0 }
 0x13b   : > { %v6568_v36 = vpack.c.bf16 %v7930_v34, %v7904_v25  ;;  %v7938_v37 = vmul.f32 %v7930_v34, %v7930_v34  ;;  %v6558_v38 = vpack.c.bf16 %v7932_v35, %v7906_v26  ;;  %v7944_v39 = vmul.f32 %v7932_v35, %v7932_v35  ;;  %v7946_v40 = vpop.f32.mrb[3].mxu1 }
 0x13c   : > { %v6566_v43 = vpack.c.bf16 %v7946_v40, %v7908_v27  ;;  %v7958_v44 = vmul.f32 %v7946_v40, %v7946_v40 }
 0x13d   : > { %6559 = vmatprep.subr.bf16.mxu0 %v6558_v38  ;;  %v7962_v46 = vpop.f32.mrb[4].mxu0 }
 0x13e   : > { %6567 = vmatprep.subr.bf16.mxu1 %v6566_v43  ;;  %6561 = vmatpush1.bf16.msra.mxu0 %v6560_v32  ;;  %v7966_v48 = vpop.f32.mrb[4].mxu1  ;;  %v7968_v49 = vpop.f32.mrb[5].mxu0  ;;  %v7976_v53 = vmul.f32 %v7962_v46, %v7962_v46 }
 0x13f   : > { %6569 = vmatpush1.bf16.msra.mxu1 %v6568_v36  ;;  %v7972_v51 = vpop.f32.mrb[5].mxu1  ;;  %v7980_v54 = vmul.f32 %v7966_v48, %v7966_v48  ;;  %v7984_v56 = vmul.f32 %v7968_v49, %v7968_v49 }
 0x140   : > { %v7990_v58 = vmul.f32 %v7972_v51, %v7972_v51 }
 0x141   : > { %v7986_v57 = vpop.f32.mrb[6].mxu0 }
 0x142   : > { %v6564_v59 = vpack.c.bf16 %v7986_v57, %v7962_v46  ;;  %v7996_v60 = vmul.f32 %v7986_v57, %v7986_v57  ;;  %v7998_v61 = vpop.f32.mrb[6].mxu1  ;;  %v8000_v62 = vpop.f32.mrb[7].mxu0 }
 0x143   : > { %v6572_v63 = vpack.c.bf16 %v7998_v61, %v7966_v48  ;;  %v8006_v2 = vmul.f32 %v7998_v61, %v7998_v61  ;;  %v6562_v3 = vpack.c.bf16 %v8000_v62, %v7968_v49  ;;  %v8012_v5 = vmul.f32 %v8000_v62, %v8000_v62  ;;  %v8014_v6 = vpop.f32.mrb[7].mxu1 }
 0x144   : > { %v6570_v8 = vpack.c.bf16 %v8014_v6, %v7972_v51  ;;  %v8022_v9 = vmul.f32 %v8014_v6, %v8014_v6 }
 0x145   : > { %6563 = vmatprep.subr.bf16.mxu0 %v6562_v3 }
 0x146   : > { %6571 = vmatprep.subr.bf16.mxu1 %v6570_v8  ;;  %6565 = vmatpush1.bf16.msra.mxu0 %v6564_v59 }
 0x147   : > { %6573 = vmatpush1.bf16.msra.mxu1 %v6572_v63 }
 0x149   : > { %5516 = vmatmul.mubr.msk.f32.vlgmr.msra.gmra.mrb[16].mxu0 %vm1317_vm2, %v10273_v13 }
 0x14a   : > { %5517 = vmatmul.mubr.msk.f32.vlgmr.msra.gmra.mrb[16].mxu1 %vm1317_vm2, %v10273_v13  ;;  %1527 = vmatprep.mubr.f32.mxu0 %v10271_v0 }
 0x14b   : > { %1598 = vmatprep.mubr.f32.mxu1 %v10271_v0 }
 0x175   : > { %v8036_v1 = vpop.f32.mrb[8].mxu0 }
 0x176   : > { %v8038_v52 = vpop.f32.mrb[8].mxu1  ;;  %v8040_v55 = vpop.f32.mrb[9].mxu0  ;;  %v8046_v14 = vmul.f32 %v8036_v1, %v8036_v1 }
 0x177   : > { %v8042_v4 = vpop.f32.mrb[9].mxu1  ;;  %v8052_v16 = vmul.f32 %v8038_v52, %v8038_v52  ;;  %v1610_v17 = vmul.f32 %v8040_v55, %v8040_v55 }
 0x178   : > { %10341 = vst [vmem:[#allocation5_spill] sm:$0xff] %v8042_v4  ;;  %v1612_v43 = vmul.f32 %v8042_v4, %v8042_v4 }
 0x179   : > { %v8048_v15 = vpop.f32.mrb[10].mxu0 }
 0x17a   : > { %v6576_v18 = vpack.c.bf16 %v8048_v15, %v8036_v1  ;;  %v8060_v19 = vmul.f32 %v8048_v15, %v8048_v15  ;;  %v8062_v20 = vpop.f32.mrb[10].mxu1  ;;  %v8064_v21 = vpop.f32.mrb[11].mxu0 }
 0x17b   : > { %10342 = vst [vmem:[#allocation6_spill] sm:$0xff] %v8064_v21  ;;  %v6584_v22 = vpack.c.bf16 %v8062_v20, %v8038_v52  ;;  %v1619_v23 = vmul.f32 %v8062_v20, %v8062_v20  ;;  %v6574_v32 = vpack.c.bf16 %v8064_v21, %v8040_v55  ;;  %v1618_v36 = vmul.f32 %v8064_v21, %v8064_v21  ;;  %v8074_v38 = vpop.f32.mrb[11].mxu1 }
 0x17c   : > { %10343 = vst [vmem:[#allocation7_spill] sm:$0xff] %v8074_v38  ;;  %v6608_v59 = vpack.c.bf16 %v8060_v19, %v8046_v14  ;;  %v6582_v63 = vpack.c.bf16 %v8074_v38, %v8042_v4  ;;  %v1620_v3 = vmul.f32 %v8074_v38, %v8074_v38 }
 0x17d   : > { %v6616_v8 = vpack.c.bf16 %v1619_v23, %v8052_v16  ;;  %v8085_v10 = vpop.f32.mrb[12].mxu0  ;;  %6575 = vmatprep.subr.bf16.mxu0 %v6574_v32  ;;  %v6606_v7 = vpack.c.bf16 %v1618_v36, %v1610_v17 }
 0x17e   : > { %v8087_v0 = vpop.f32.mrb[12].mxu1  ;;  %6583 = vmatprep.subr.bf16.mxu1 %v6582_v63  ;;  %v8089_v12 = vpop.f32.mrb[13].mxu0  ;;  %6577 = vmatpush1.bf16.msra.mxu0 %v6576_v18  ;;  %v6614_v11 = vpack.c.bf16 %v1620_v3, %v1612_v43  ;;  %v1625_v19 = vmul.f32 %v8085_v10, %v8085_v10 }
 0x17f   : > { %10344 = vst [vmem:[#allocation8_spill] sm:$0xff] %v8087_v0  ;;  %10345 = vst [vmem:[#allocation9_spill] sm:$0xff] %v8089_v12  ;;  %v8091_v14 = vpop.f32.mrb[13].mxu1  ;;  %6585 = vmatpush1.bf16.msra.mxu1 %v6584_v22  ;;  %v1627_v16 = vmul.f32 %v8087_v0, %v8087_v0  ;;  %v1626_v17 = vmul.f32 %v8089_v12, %v8089_v12 }
 0x180   : > { %v1628_v13 = vmul.f32 %v8091_v14, %v8091_v14 }
 0x181   : > { %v8095_v45 = vpop.f32.mrb[14].mxu0 }
 0x182   : > { %10346 = vst [vmem:[#allocation10_spill] sm:$0xff] %v8095_v45  ;;  %v6580_v23 = vpack.c.bf16 %v8095_v45, %v8085_v10  ;;  %v1633_v18 = vmul.f32 %v8095_v45, %v8095_v45  ;;  %v8105_v32 = vpop.f32.mrb[14].mxu1  ;;  %v8107_v22 = vpop.f32.mrb[15].mxu0 }
 0x183   : > { %10347 = vst [vmem:[#allocation11_spill] sm:$0xff] %v8105_v32  ;;  %10348 = vst [vmem:[#allocation12_spill] sm:$0xff] %v8107_v22  ;;  %v6588_v36 = vpack.c.bf16 %v8105_v32, %v8087_v0  ;;  %v1635_v43 = vmul.f32 %v8105_v32, %v8105_v32  ;;  %v6578_v63 = vpack.c.bf16 %v8107_v22, %v8089_v12  ;;  %v8117_v42 = vpop.f32.mrb[15].mxu1 }
 0x184   : > { %v1634_v3 = vmul.f32 %v8107_v22, %v8107_v22  ;;  %v6612_v50 = vpack.c.bf16 %v1633_v18, %v1625_v19  ;;  %v6586_v47 = vpack.c.bf16 %v8117_v42, %v8091_v14  ;;  %v1636_v38 = vmul.f32 %v8117_v42, %v8117_v42 }
 0x185   : > { %v6620_v4 = vpack.c.bf16 %v1635_v43, %v1627_v16  ;;  %6579 = vmatprep.subr.bf16.mxu0 %v6578_v63  ;;  %v10349_v22 = vpack.c.bf16 %v7944_v39, %v7922_v31  ;;  %v10350_v19 = vpack.c.bf16 %v7958_v44, %v7950_v41  ;;  %v10351_v18 = vmov 0.03125  }
 0x186   : > { %v6610_v21 = vpack.c.bf16 %v1634_v3, %v1626_v17  ;;  %6587 = vmatprep.subr.bf16.mxu1 %v6586_v47  ;;  %6581 = vmatpush1.bf16.msra.mxu0 %v6580_v23  ;;  %v6618_v12 = vpack.c.bf16 %v1636_v38, %v1628_v13  ;;  %v10352_v47 = vpack.c.bf16 %v7928_v33, %v7912_v28  ;;  %v10356_v41 = vmov 0.0  }
 0x187   : > { %6589 = vmatpush1.bf16.msra.mxu1 %v6588_v36  ;;  %6591 = vmatprep.subr.bf16.mxu0 %v10349_v22  ;;  %v10353_v13 = vpack.c.bf16 %v7938_v37, %v7918_v30  ;;  %v10354_v31 = vpack.c.bf16 %v8012_v5, %v7984_v56  ;;  %v10355_v39 = vpack.c.bf16 %v8022_v9, %v7990_v58  ;;  %v1937_v33 = vlaneseq }
 0x188   : > { %6599 = vmatprep.subr.bf16.mxu1 %v10350_v19  ;;  %v10357_v28 = vpack.c.bf16 %v7996_v60, %v7976_v53  ;;  %v10358_v30 = vpack.c.bf16 %v8006_v2, %v7980_v54 }
 0x189   : > { %5518 = vmatmul.mubr.msk.f32.vlgmr.msra.gmra.mrb[18].mxu0 %vm1317_vm2, %v10351_v18  ;;  %v1938_v37 = vshrl.u32 %v1937_v33, 7  ;;  %v10359_v33 = vld [vmem:[#allocation6_spill] sm:$0xff] }
 0x18a   : > { %5519 = vmatmul.mubr.msk.f32.vlgmr.msra.gmra.mrb[18].mxu1 %vm1317_vm2, %v10351_v18  ;;  %6593 = vmatpush1.bf16.msra.mxu0 %v10352_v47  ;;  %v10361_v38 = vld [vmem:[#allocation12_spill] sm:$0xff] }
 0x18b   : > { %6601 = vmatpush1.bf16.msra.mxu1 %v10353_v13  ;;  %6595 = vmatprep.subr.bf16.mxu0 %v10354_v31  ;;  %v8167_v44 = vsub.s32 0, %v1938_v37  ;;  %v10360_v37 = vld [vmem:[#allocation9_spill] sm:$0xff] }
 0x18c   : > { %6603 = vmatprep.subr.bf16.mxu1 %v10355_v39  ;;  %1701 = vmatprep.mubr.f32.mxu0 %v10356_v41 }
 0x18d   : > { %1772 = vmatprep.mubr.f32.mxu1 %v10356_v41 }
 0x18e   : > { %6597 = vmatpush1.bf16.msra.mxu0 %v10357_v28  ;;  %v10362_v28 = vld [vmem:[#allocation5_spill] sm:$0xff] }
 0x18f   : > { %6605 = vmatpush1.bf16.msra.mxu1 %v10358_v30  ;;  %6607 = vmatprep.subr.bf16.mxu0 %v6606_v7  ;;  %v10363_v30 = vld [vmem:[#allocation7_spill] sm:$0xff] }
 0x190   : > { %6615 = vmatprep.subr.bf16.mxu1 %v6614_v11 }
 0x191   : > { %5520 = vmatmul.mubr.msk.f32.vlgmr.msra.gmra.mrb[20].mxu0 %vm1317_vm2, %v10351_v18 }
 0x192   : > { %5521 = vmatmul.mubr.msk.f32.vlgmr.msra.gmra.mrb[20].mxu1 %vm1317_vm2, %v10351_v18  ;;  %6609 = vmatpush1.bf16.msra.mxu0 %v6608_v59 }
 0x193   : > { %6617 = vmatpush1.bf16.msra.mxu1 %v6616_v8  ;;  %6611 = vmatprep.subr.bf16.mxu0 %v6610_v21 }
 0x194   : > { %6619 = vmatprep.subr.bf16.mxu1 %v6618_v12  ;;  %1843 = vmatprep.mubr.f32.mxu0 %v10356_v41 }
 0x195   : > { %1914 = vmatprep.mubr.f32.mxu1 %v10356_v41 }
 0x196   : > { %6613 = vmatpush1.bf16.msra.mxu0 %v6612_v50 }
 0x197   : > { %6621 = vmatpush1.bf16.msra.mxu1 %v6620_v4 }
 0x199   : > { %5522 = vmatmul.mubr.msk.f32.vlgmr.msra.gmra.mrb[22].mxu0 %vm1317_vm2, %v10351_v18 }
 0x19a   : > { %5523 = vmatmul.mubr.msk.f32.vlgmr.msra.gmra.mrb[22].mxu1 %vm1317_vm2, %v10351_v18  ;;  %2531 = vmatprep.mubr.f32.mxu0 %v10356_v41 }
 0x19b   : > { %2626 = vmatprep.mubr.f32.mxu1 %v10356_v41 }
 0x21c   : > { %v1387_v53 = vpop.f32.mrb[16].mxu0 }
 0x21d   : > { %v8170_v54 = vrot.slane %v1387_v53, %v8167_v44  ;;  %v1458_v50 = vpop.f32.mrb[16].mxu1  ;;  %v1389_v56 = vpop.f32.mrb[17].mxu0  ;;  %v1921_v36 = vmul.f32 %v1387_v53, %v1387_v53 }
 0x21e   : > { %v8173_v58 = vrot.slane %v1458_v50, %v8167_v44  ;;  %v8176_v60 = vrot.slane %v1389_v56, %v8167_v44  ;;  %v1460_v2 = vpop.f32.mrb[17].mxu1  ;;  %v1923_v63 = vmul.f32 %v1458_v50, %v1458_v50  ;;  %v1922_v22 = vmul.f32 %v1389_v56, %v1389_v56 }
 0x21f   : > { %v8203_v23 = vrot.slane %v1460_v2, %v8167_v44  ;;  %v1924_v16 = vmul.f32 %v1460_v2, %v1460_v2 }
 0x25c   : > { %v1529_v3 = vpop.f32.mrb[18].mxu0 }
 0x25d   : > { %v8214_v19 = vrot.slane %v1529_v3, %v8167_v44  ;;  %v1600_v18 = vpop.f32.mrb[18].mxu1  ;;  %v1531_v47 = vpop.f32.mrb[19].mxu0  ;;  %v1925_v32 = vmul.f32 %v1529_v3, %v1529_v3  ;;  %v10364_v3 = vsub.f32 %v7902_v24, %v8170_v54  ;;  %v10368_v24 = vsub.f32 %v7930_v34, %v8173_v58 }
 0x25e   : > { %v8217_v13 = vrot.slane %v1600_v18, %v8167_v44  ;;  %v8220_v31 = vrot.slane %v1531_v47, %v8167_v44  ;;  %v1602_v39 = vpop.f32.mrb[19].mxu1  ;;  %v1927_v43 = vmul.f32 %v1600_v18, %v1600_v18  ;;  %v1926_v0 = vmul.f32 %v1531_v47, %v1531_v47 }
 0x25f   : > { %v8247_v21 = vrot.slane %v1602_v39, %v8167_v44  ;;  %v1928_v2 = vmul.f32 %v1602_v39, %v1602_v39  ;;  %v10365_v47 = vsub.f32 %v7914_v29, %v8170_v54  ;;  %v10369_v29 = vsub.f32 %v7986_v57, %v8170_v54 }
 0x260   : > { %v10373_v57 = vsub.f32 %v7946_v40, %v8203_v23 }
 0x264   : > { %v1703_v11 = vpop.f32.mrb[20].mxu0 }
 0x265   : > { %v1929_v4 = vsub.f32 %v1703_v11, %v1921_v36  ;;  %v1774_v12 = vpop.f32.mrb[20].mxu1  ;;  %v1705_v9 = vpop.f32.mrb[21].mxu0 }
 0x266   : > { %v1931_v53 = vsub.f32 %v1774_v12, %v1923_v63  ;;  %v1930_v50 = vsub.f32 %v1705_v9, %v1922_v22  ;;  %v1776_v56 = vpop.f32.mrb[21].mxu1 }
 0x267   : > { %v2001_v7 = vadd.f32 1e-05, %v1929_v4  ;;  %v1932_v5 = vsub.f32 %v1776_v56, %v1924_v16 }
 0x268   : > { %v2003_v8 = vadd.f32 1e-05, %v1931_v53  ;;  %v2002_v41 = vadd.f32 1e-05, %v1930_v50  ;;  %v8257_v53 = vpop.permute.xlu0 %2087  ;;  %v10366_v50 = vsub.f32 %v7962_v46, %v8170_v54 }
 0x269   : > { %7182 = vrsqrt.f32 %v2001_v7  ;;  %v2004_v59 = vadd.f32 1e-05, %v1932_v5  ;;  %v8259_v7 = vpop.permute.xlu1 %2143 }
 0x26a   : > { %7184 = vrsqrt.f32 %v2003_v8 }
 0x26b   : > { %7186 = vrsqrt.f32 %v2002_v41 }
 0x26c   : > { %7188 = vrsqrt.f32 %v2004_v59  ;;  %v1845_v17 = vpop.f32.mrb[22].mxu0 }
 0x26d   : > { %v1933_v11 = vsub.f32 %v1845_v17, %v1925_v32  ;;  %v1916_v36 = vpop.f32.mrb[22].mxu1  ;;  %v1847_v45 = vpop.f32.mrb[23].mxu0 }
 0x26e   : > { %v1935_v12 = vsub.f32 %v1916_v36, %v1927_v43  ;;  %v1934_v9 = vsub.f32 %v1847_v45, %v1926_v0  ;;  %v1918_v22 = vpop.f32.mrb[23].mxu1  ;;  %v10367_v36 = vsub.f32 %v7904_v25, %v8173_v58  ;;  %v8289_v46 = vpop.permute.xlu1 %2148  ;;  %v10371_v25 = vsub.f32 %v7932_v35, %v8176_v60 }
 0x26f   : > { %v2005_v4 = vadd.f32 1e-05, %v1933_v11  ;;  %v1936_v16 = vsub.f32 %v1918_v22, %v1928_v2  ;;  %v8275_v2 = vpop.permute.xlu0 %2092 }
 0x270   : > { %v2006_v63 = vadd.f32 1e-05, %v1934_v9  ;;  %v2007_v0 = vadd.f32 1e-05, %v1935_v12 }
 0x271   : > { %v2008_v5 = vadd.f32 1e-05, %v1936_v16  ;;  %7190 = vrsqrt.f32 %v2005_v4  ;;  %v10370_v4 = vsub.f32 %v7906_v26, %v8176_v60 }
 0x272   : > { %7192 = vrsqrt.f32 %v2006_v63 }
 0x273   : > { %v7183_v41 = vpop.eup %7182  ;;  %7194 = vrsqrt.f32 %v2008_v5 }
 0x274   : > { %v7185_v8 = vpop.eup %7184  ;;  %v2020_v59 = vrot.slane %v7183_v41, %v8167_v44  ;;  %v10372_v41 = vsub.f32 %v7908_v27, %v8203_v23  ;;  %7196 = vrsqrt.f32 %v2007_v0 }
 0x275   : > { %v7187_v32 = vpop.eup %7186  ;;  %v8263_v17 = vrot.slane %v7185_v8, %v8167_v44 }
 0x276   : > { %v7189_v45 = vpop.eup %7188  ;;  %v2024_v43 = vrot.slane %v7187_v32, %v8167_v44  ;;  %v2049_v18 = vmul.f32 %v2020_v59, %v10364_v3  ;;  %v2057_v39 = vmul.f32 %v2020_v59, %v10365_v47  ;;  %v2065_v56 = vmul.f32 %v2020_v59, %v10366_v50 }
 0x277   : > { %v2032_v11 = vrot.slane %v7189_v45, %v8167_v44  ;;  %v2051_v12 = vmul.f32 %v8263_v17, %v10367_v36  ;;  %v2059_v9 = vmul.f32 %v8263_v17, %v10368_v24  ;;  %v2073_v22 = vmul.f32 %v2020_v59, %v10369_v29  ;;  %v8330_v24 = vpop.permute.xlu0 %2097 }
 0x278   : > { %v2050_v16 = vmul.f32 %v2024_v43, %v10370_v4  ;;  %v2058_v63 = vmul.f32 %v2024_v43, %v10371_v25  ;;  %v2105_v5 = vmul.f32 %v8257_v53, %v2049_v18  ;;  %v2113_v34 = vmul.f32 %v8275_v2, %v2057_v39  ;;  %v8339_v25 = vpop.permute.xlu1 %2102 }
 0x279   : > { %v2052_v8 = vmul.f32 %v2032_v11, %v10372_v41  ;;  %v2060_v54 = vmul.f32 %v2032_v11, %v10373_v57  ;;  %v2107_v59 = vmul.f32 %v8257_v53, %v2051_v12  ;;  %v2115_v26 = vmul.f32 %v8275_v2, %v2059_v9 }
 0x27a   : > { %v2106_v32 = vmul.f32 %v8257_v53, %v2050_v16  ;;  %v2114_v35 = vmul.f32 %v8275_v2, %v2058_v63  ;;  %v8310_v45 = vadd.f32 %v8259_v7, %v2105_v5  ;;  %v8313_v3 = vadd.f32 %v8289_v46, %v2113_v34 }
 0x27b   : > { %v2108_v27 = vmul.f32 %v8257_v53, %v2052_v8  ;;  %v2116_v18 = vmul.f32 %v8275_v2, %v2060_v54  ;;  %v8318_v40 = vadd.f32 %v8259_v7, %v2107_v59  ;;  %v8328_v36 = vadd.f32 %v8289_v46, %v2115_v26  ;;  %v7191_v12 = vpop.eup %7190 }
 0x27c   : > { %v8321_v47 = vadd.f32 %v8259_v7, %v2106_v32  ;;  %v8324_v39 = vadd.f32 %v8289_v46, %v2114_v35  ;;  %v5524_v50 = vmul.f32 -1.442695, %v8310_v45  ;;  %v5532_v4 = vmul.f32 -1.442695, %v8313_v3  ;;  %v7193_v16 = vpop.eup %7192 }
 0x27d   : > { %v8333_v9 = vadd.f32 %v8259_v7, %v2108_v27  ;;  %v8336_v29 = vadd.f32 %v8289_v46, %v2116_v18  ;;  %v7195_v34 = vpop.eup %7194  ;;  %v5526_v8 = vmul.f32 -1.442695, %v8318_v40  ;;  %v5534_v57 = vmul.f32 -1.442695, %v8328_v36 }
 0x27e   : > { %v5525_v63 = vmul.f32 -1.442695, %v8321_v47  ;;  %v5533_v5 = vmul.f32 -1.442695, %v8324_v39  ;;  %7198 = vpow2.f32 %v5524_v50  ;;  %v10374_v54 = vsub.f32 %v7968_v49, %v8176_v60  ;;  %v8361_v49 = vpop.permute.xlu0 %2153 }
 0x27f   : > { %v5527_v41 = vmul.f32 -1.442695, %v8333_v9  ;;  %v5535_v0 = vmul.f32 -1.442695, %v8336_v29  ;;  %7200 = vpow2.f32 %v5532_v4  ;;  %v10375_v26 = vsub.f32 %v8000_v62, %v8176_v60 }
 0x280   : > { %7202 = vpow2.f32 %v5525_v63  ;;  %v2066_v59 = vmul.f32 %v2024_v43, %v10374_v54  ;;  %v10376_v35 = vsub.f32 %v7972_v51, %v8203_v23  ;;  %v10377_v18 = vsub.f32 %v8014_v6, %v8203_v23  ;;  %v8366_v51 = vpop.permute.xlu1 %2158 }
 0x281   : > { %7204 = vpow2.f32 %v5533_v5  ;;  %v2074_v32 = vmul.f32 %v2024_v43, %v10375_v26  ;;  %v2121_v63 = vmul.f32 %v8330_v24, %v2065_v56  ;;  %v2129_v60 = vmul.f32 %v8339_v25, %v2073_v22 }
 0x282   : > { %v2068_v27 = vmul.f32 %v2032_v11, %v10376_v35  ;;  %v2076_v50 = vmul.f32 %v2032_v11, %v10377_v18  ;;  %7206 = vpow2.f32 %v5527_v41  ;;  %v2122_v4 = vmul.f32 %v8330_v24, %v2066_v59 }
 0x283   : > { %7208 = vpow2.f32 %v5535_v0  ;;  %v2130_v5 = vmul.f32 %v8339_v25, %v2074_v32  ;;  %v8369_v43 = vrot.slane %v7193_v16, %v8167_v44  ;;  %v8376_v56 = vrot.slane %v7195_v34, %v8167_v44 }
 0x284   : > { %v2124_v62 = vmul.f32 %v8330_v24, %v2068_v27  ;;  %7210 = vpow2.f32 %v5526_v8  ;;  %v8372_v6 = vadd.f32 %v8361_v49, %v2122_v4  ;;  %v2132_v23 = vmul.f32 %v8339_v25, %v2076_v50 }
 0x285   : > { %7212 = vpow2.f32 %v5534_v57  ;;  %v8379_v11 = vadd.f32 %v8366_v51, %v2130_v5  ;;  %v8385_v41 = vrot.slane %v7191_v12, %v8167_v44  ;;  %v8389_v0 = vadd.f32 %v8361_v49, %v2121_v63  ;;  %v7197_v57 = vpop.eup %7196 }
 0x286   : > { %v8382_v22 = vadd.f32 %v8361_v49, %v2124_v62  ;;  %v5541_v16 = vmul.f32 -1.442695, %v8372_v6  ;;  %v10378_v8 = vsub.f32 %v7966_v48, %v8173_v58  ;;  %v8398_v26 = vadd.f32 %v8366_v51, %v2129_v60 }
 0x287   : > { %v5549_v54 = vmul.f32 -1.442695, %v8379_v11  ;;  %v10379_v12 = vsub.f32 %v7998_v61, %v8173_v58  ;;  %v8405_v27 = vadd.f32 %v8366_v51, %v2132_v23  ;;  %v10380_v48 = vsub.f32 %v8040_v55, %v8220_v31 }
 0x288   : > { %v2067_v34 = vmul.f32 %v8263_v17, %v10378_v8  ;;  %v5543_v59 = vmul.f32 -1.442695, %v8382_v22  ;;  %v7199_v35 = vpop.eup %7198  ;;  %7214 = vpow2.f32 %v5541_v16  ;;  %v10381_v50 = vsub.f32 %v10359_v33, %v8220_v31 }
 0x289   : > { %v2075_v32 = vmul.f32 %v8263_v17, %v10379_v12  ;;  %v2054_v18 = vmul.f32 %v8369_v43, %v10380_v48  ;;  %v7201_v63 = vpop.eup %7200  ;;  %v2289_v5 = vadd.f32 1.0, %v7199_v35  ;;  %7216 = vpow2.f32 %v5549_v54 }
 0x28a   : > { %v2062_v4 = vmul.f32 %v8369_v43, %v10381_v50  ;;  %v2123_v61 = vmul.f32 %v8330_v24, %v2067_v34  ;;  %v10382_v58 = vsub.f32 %v10362_v28, %v8247_v21  ;;  %v7203_v62 = vpop.eup %7202  ;;  %v8421_v55 = vrot.slane %v7197_v57, %v8167_v44 }
 0x28b   : > { %v2297_v60 = vadd.f32 1.0, %v7201_v63  ;;  %7218 = vpow2.f32 %v5543_v59  ;;  %v2131_v33 = vmul.f32 %v8339_v25, %v2075_v32  ;;  %v7205_v23 = vpop.eup %7204  ;;  %v2290_v16 = vadd.f32 1.0, %v7203_v62 }
 0x28c   : > { %v2056_v17 = vmul.f32 %v8376_v56, %v10382_v58  ;;  %7220 = vrcp.f32 %v2289_v5  ;;  %v5540_v8 = vmul.f32 -1.442695, %v8389_v0  ;;  %v2110_v34 = vmul.f32 %v8257_v53, %v2054_v18  ;;  %v7207_v54 = vpop.eup %7206 }
 0x28d   : > { %v2298_v12 = vadd.f32 1.0, %v7205_v23  ;;  %7222 = vrcp.f32 %v2297_v60  ;;  %v5551_v28 = vmul.f32 -1.442695, %v8405_v27  ;;  %v5548_v35 = vmul.f32 -1.442695, %v8398_v26  ;;  %v7209_v44 = vpop.eup %7208 }
 0x28e   : > { %7224 = vrcp.f32 %v2290_v16  ;;  %v2292_v57 = vadd.f32 1.0, %v7207_v54  ;;  %v8429_v59 = vadd.f32 %v8361_v49, %v2123_v61  ;;  %v2118_v32 = vmul.f32 %v8275_v2, %v2062_v4  ;;  %v7211_v48 = vpop.eup %7210 }
 0x28f   : > { %7226 = vrcp.f32 %v2298_v12  ;;  %v2300_v50 = vadd.f32 1.0, %v7209_v44  ;;  %v8433_v18 = vadd.f32 %v8366_v51, %v2131_v33  ;;  %v10383_v63 = vsub.f32 %v10363_v30, %v8247_v21  ;;  %v7213_v58 = vpop.eup %7212 }
 0x290   : > { %7228 = vrcp.f32 %v2292_v57  ;;  %v2291_v62 = vadd.f32 1.0, %v7211_v48  ;;  %v8440_v60 = vadd.f32 %v8259_v7, %v2110_v34  ;;  %v2112_v61 = vmul.f32 %v8257_v53, %v2056_v17 }
 0x291   : > { %v2064_v5 = vmul.f32 %v8376_v56, %v10383_v63  ;;  %7230 = vrcp.f32 %v2300_v50  ;;  %v2299_v4 = vadd.f32 1.0, %v7213_v58  ;;  %v10384_v33 = vsub.f32 %v8036_v1, %v8214_v19 }
 0x292   : > { %7232 = vrcp.f32 %v2291_v62  ;;  %v8449_v30 = vadd.f32 %v8289_v46, %v2118_v32  ;;  %v10385_v54 = vsub.f32 %v8048_v15, %v8214_v19  ;;  %v10386_v17 = vsub.f32 %v8038_v52, %v8217_v13  ;;  %v7215_v44 = vpop.eup %7214 }
 0x293   : > { %v2120_v23 = vmul.f32 %v8275_v2, %v2064_v5  ;;  %v2053_v16 = vmul.f32 %v8385_v41, %v10384_v33  ;;  %7234 = vrcp.f32 %v2299_v4  ;;  %v8460_v1 = vadd.f32 %v8259_v7, %v2112_v61  ;;  %v7217_v15 = vpop.eup %7216 }
 0x294   : > { %v2061_v34 = vmul.f32 %v8385_v41, %v10385_v54  ;;  %v2055_v12 = vmul.f32 %v8421_v55, %v10386_v17  ;;  %v10387_v32 = vsub.f32 %v8062_v20, %v8217_v13  ;;  %v2306_v50 = vadd.f32 1.0, %v7215_v44 }
 0x295   : > { %v2109_v57 = vmul.f32 %v8257_v53, %v2053_v16  ;;  %7236 = vpow2.f32 %v5551_v28  ;;  %v5542_v63 = vmul.f32 -1.442695, %v8429_v59  ;;  %v8469_v52 = vadd.f32 %v8289_v46, %v2120_v23  ;;  %v7219_v5 = vpop.eup %7218 }
 0x296   : > { %v2063_v48 = vmul.f32 %v8421_v55, %v10387_v32  ;;  %v2314_v58 = vadd.f32 1.0, %v7217_v15  ;;  %7238 = vpow2.f32 %v5540_v8  ;;  %v5550_v62 = vmul.f32 -1.442695, %v8433_v18  ;;  %v7221_v4 = vpop.eup %7220 }
 0x297   : > { %v5529_v61 = vmul.f32 -1.442695, %v8440_v60  ;;  %7240 = vrcp.f32 %v2306_v50  ;;  %v2308_v20 = vadd.f32 1.0, %v7219_v5  ;;  %v5537_v33 = vmul.f32 -1.442695, %v8449_v30  ;;  %v7223_v28 = vpop.eup %7222 }
 0x298   : > { %v2117_v16 = vmul.f32 %v8275_v2, %v2061_v34  ;;  %v2385_v54 = vmul.f32 %v7221_v4, %v8310_v45  ;;  %7242 = vrcp.f32 %v2314_v58  ;;  %v5531_v23 = vmul.f32 -1.442695, %v8460_v1  ;;  %v7225_v8 = vpop.eup %7224 }
 0x299   : > { %v8478_v17 = vadd.f32 %v8259_v7, %v2109_v57  ;;  %v2393_v44 = vmul.f32 %v7223_v28, %v8313_v3  ;;  %7244 = vrcp.f32 %v2308_v20  ;;  %v5539_v32 = vmul.f32 -1.442695, %v8469_v52  ;;  %v7227_v50 = vpop.eup %7226 }
 0x29a   : > { %v2111_v15 = vmul.f32 %v8257_v53, %v2055_v12  ;;  %v2386_v34 = vmul.f32 %v7225_v8, %v8321_v47  ;;  %7246 = vpow2.f32 %v5548_v35  ;;  %v2119_v45 = vmul.f32 %v8275_v2, %v2063_v48  ;;  %v7229_v58 = vpop.eup %7228 }
 0x29b   : > { %v10388_v5 = vsub.f32 %v10360_v37, %v8220_v31  ;;  %v2394_v4 = vmul.f32 %v7227_v50, %v8324_v39  ;;  %v6624_v3 = vpack.c.bf16 %v2393_v44, %v2385_v54  ;;  %7248 = vpow2.f32 %v5542_v63  ;;  %v7231_v53 = vpop.eup %7230 }
 0x29c   : > { %v8491_v20 = vadd.f32 %v8289_v46, %v2117_v16  ;;  %v2388_v12 = vmul.f32 %v7229_v58, %v8333_v9  ;;  %7250 = vpow2.f32 %v5550_v62  ;;  %v5528_v47 = vmul.f32 -1.442695, %v8478_v17  ;;  %v7233_v35 = vpop.eup %7232 }
 0x29d   : > { %v2070_v57 = vmul.f32 %v8369_v43, %v10388_v5  ;;  %v10389_v2 = vsub.f32 %v10361_v38, %v8220_v31  ;;  %v6622_v48 = vpack.c.bf16 %v2394_v4, %v2386_v34  ;;  %v2396_v39 = vmul.f32 %v7231_v53, %v8336_v29  ;;  %v7235_v16 = vpop.eup %7234 }
 0x29e   : > { %7252 = vpow2.f32 %v5529_v61  ;;  %v8501_v63 = vadd.f32 %v8259_v7, %v2111_v15  ;;  %v2387_v28 = vmul.f32 %v7233_v35, %v8318_v40  ;;  %v8505_v9 = vadd.f32 %v8289_v46, %v2119_v45 }
 0x29f   : > { %v2078_v37 = vmul.f32 %v8369_v43, %v10389_v2  ;;  %7254 = vpow2.f32 %v5537_v33  ;;  %v10390_v38 = vsub.f32 %v8091_v14, %v8247_v21  ;;  %v7237_v43 = vpop.eup %7236  ;;  %6623 = vmatprep.subr.bf16.mxu0 %v6622_v48  ;;  %v6630_v62 = vpack.c.bf16 %v2396_v39, %v2388_v12  ;;  %v10395_v48 = vld [vmem:[#allocation8_spill] sm:$0xff] }
 0x2a0   : > { %v2395_v29 = vmul.f32 %v7235_v16, %v8328_v36  ;;  %7256 = vpow2.f32 %v5531_v23  ;;  %v5536_v7 = vmul.f32 -1.442695, %v8491_v20  ;;  %v7239_v61 = vpop.eup %7238  ;;  %6625 = vmatpush1.bf16.msra.mxu0 %v6624_v3  ;;  %v2316_v40 = vadd.f32 1.0, %v7237_v43  ;;  %v10397_v43 = vld [vmem:[#allocation11_spill] sm:$0xff] }
 0x2a1   : > { %v2072_v31 = vmul.f32 %v8376_v56, %v10390_v38  ;;  %7258 = vpow2.f32 %v5539_v32  ;;  %v2126_v46 = vmul.f32 %v8330_v24, %v2070_v57  ;;  %v10391_v33 = vsub.f32 %v8117_v42, %v8247_v21  ;;  %v7241_v54 = vpop.eup %7240  ;;  %6631 = vmatprep.subr.bf16.mxu1 %v6630_v62 }
 0x2a2   : > { %v6632_v8 = vpack.c.bf16 %v2395_v29, %v2387_v28  ;;  %v2305_v44 = vadd.f32 1.0, %v7239_v61  ;;  %7260 = vpow2.f32 %v5528_v47  ;;  %v5530_v36 = vmul.f32 -1.442695, %v8501_v63  ;;  %v7243_v23 = vpop.eup %7242 }
 0x2a3   : > { %v2080_v14 = vmul.f32 %v8376_v56, %v10391_v33  ;;  %v2402_v15 = vmul.f32 %v7241_v54, %v8372_v6  ;;  %7262 = vrcp.f32 %v2316_v40  ;;  %v5538_v32 = vmul.f32 -1.442695, %v8505_v9  ;;  %v7245_v50 = vpop.eup %7244  ;;  %v10393_v6 = vld [vmem:[#allocation10_spill] sm:$0xff] }
 0x2a4   : > { %6633 = vmatpush1.bf16.msra.mxu1 %v6632_v8  ;;  %v2410_v34 = vmul.f32 %v7243_v23, %v8379_v11  ;;  %7264 = vrcp.f32 %v2305_v44  ;;  %v2134_v42 = vmul.f32 %v8339_v25, %v2078_v37  ;;  %v10392_v21 = vsub.f32 %v8085_v10, %v8214_v19  ;;  %v7247_v45 = vpop.eup %7246 }
 0x2a5   : > { %7266 = vpow2.f32 %v5536_v7  ;;  %v8528_v5 = vadd.f32 %v8361_v49, %v2126_v46  ;;  %v10394_v57 = vsub.f32 %v10393_v6, %v8214_v19  ;;  %v7249_v4 = vpop.eup %7248  ;;  %v2313_v3 = vadd.f32 1.0, %v7247_v45 }
 0x2a6   : > { %v2069_v56 = vmul.f32 %v8385_v41, %v10392_v21  ;;  %v6626_v11 = vpack.c.bf16 %v2410_v34, %v2402_v15  ;;  %7268 = vpow2.f32 %v5530_v36  ;;  %v7251_v53 = vpop.eup %7250  ;;  %v2307_v12 = vadd.f32 1.0, %v7249_v4 }
 0x2a7   : > { %v2077_v58 = vmul.f32 %v8385_v41, %v10394_v57  ;;  %7270 = vpow2.f32 %v5538_v32  ;;  %v2128_v10 = vmul.f32 %v8330_v24, %v2072_v31  ;;  %v2315_v2 = vadd.f32 1.0, %v7251_v53 }
 0x2a8   : > { %v7253_v47 = vpop.eup %7252  ;;  %6627 = vmatprep.subr.bf16.mxu0 %v6626_v11  ;;  %7272 = vrcp.f32 %v2313_v3  ;;  %v8536_v37 = vadd.f32 %v8366_v51, %v2134_v42  ;;  %v5545_v41 = vmul.f32 -1.442695, %v8528_v5  ;;  %v10396_v39 = vsub.f32 %v10395_v48, %v8217_v13 }
 0x2a9   : > { %v7255_v35 = vpop.eup %7254  ;;  %7274 = vrcp.f32 %v2307_v12  ;;  %v2294_v19 = vadd.f32 1.0, %v7253_v47  ;;  %v2136_v31 = vmul.f32 %v8339_v25, %v2080_v14  ;;  %v10398_v62 = vsub.f32 %v10397_v43, %v8217_v13 }
 0x2aa   : > { %v2071_v16 = vmul.f32 %v8421_v55, %v10396_v39  ;;  %v7257_v28 = vpop.eup %7256  ;;  %7276 = vrcp.f32 %v2315_v2  ;;  %v2302_v38 = vadd.f32 1.0, %v7255_v35  ;;  %v8549_v40 = vadd.f32 %v8361_v49, %v2128_v10 }
 0x2ab   : > { %v2079_v29 = vmul.f32 %v8421_v55, %v10398_v62  ;;  %v7259_v7 = vpop.eup %7258  ;;  %7278 = vrcp.f32 %v2294_v19  ;;  %v2296_v61 = vadd.f32 1.0, %v7257_v28  ;;  %v2125_v46 = vmul.f32 %v8330_v24, %v2069_v56 }
 0x2ac   : > { %v7261_v33 = vpop.eup %7260  ;;  %v2404_v54 = vmul.f32 %v7245_v50, %v8382_v22  ;;  %7280 = vrcp.f32 %v2302_v38  ;;  %v2304_v8 = vadd.f32 1.0, %v7259_v7  ;;  %v2133_v14 = vmul.f32 %v8339_v25, %v2077_v58 }
 0x2ad   : > { %v7263_v44 = vpop.eup %7262  ;;  %7282 = vrcp.f32 %v2296_v61  ;;  %v2293_v13 = vadd.f32 1.0, %v7261_v33  ;;  %v5553_v55 = vmul.f32 -1.442695, %v8536_v37  ;;  %v2127_v36 = vmul.f32 %v8330_v24, %v2071_v16 }
 0x2ae   : > { %v7265_v23 = vpop.eup %7264  ;;  %v2412_v15 = vmul.f32 %v7263_v44, %v8405_v27  ;;  %7284 = vrcp.f32 %v2304_v8  ;;  %v8558_v32 = vadd.f32 %v8366_v51, %v2136_v31  ;;  %v2135_v22 = vmul.f32 %v8339_v25, %v2079_v29 }
 0x2af   : > { %v7267_v50 = vpop.eup %7266  ;;  %7286 = vrcp.f32 %v2293_v13  ;;  %v5547_v34 = vmul.f32 -1.442695, %v8549_v40  ;;  %v8563_v42 = vadd.f32 %v8361_v49, %v2125_v46  ;;  %v8566_v24 = vadd.f32 %v8366_v51, %v2133_v14 }
 0x2b0   : > { %v7269_v21 = vpop.eup %7268  ;;  %v6634_v56 = vpack.c.bf16 %v2412_v15, %v2404_v54  ;;  %v2301_v45 = vadd.f32 1.0, %v7267_v50  ;;  %7288 = vpow2.f32 %v5545_v41  ;;  %v2401_v6 = vmul.f32 %v7265_v23, %v8389_v0 }
 0x2b1   : > { %v7271_v27 = vpop.eup %7270  ;;  %v2295_v57 = vadd.f32 1.0, %v7269_v21  ;;  %7290 = vpow2.f32 %v5553_v55  ;;  %v8570_v25 = vadd.f32 %v8361_v49, %v2127_v36  ;;  %v5555_v11 = vmul.f32 -1.442695, %v8558_v32 }
 0x2b2   : > { %v7273_v58 = vpop.eup %7272  ;;  %6635 = vmatprep.subr.bf16.mxu1 %v6634_v56  ;;  %7292 = vrcp.f32 %v2301_v45  ;;  %v2303_v4 = vadd.f32 1.0, %v7271_v27  ;;  %v8574_v3 = vadd.f32 %v8366_v51, %v2135_v22  ;;  %v5544_v0 = vmul.f32 -1.442695, %v8563_v42  ;;  %v8624_v56 = vld [vmem:[%s10265_s6 + $0x18] sm:$0xff] }
 0x2b3   : > { %v7275_v53 = vpop.eup %7274  ;;  %v2409_v12 = vmul.f32 %v7273_v58, %v8398_v26  ;;  %7294 = vrcp.f32 %v2295_v57  ;;  %v5552_v49 = vmul.f32 -1.442695, %v8566_v24  ;;  %v5546_v51 = vmul.f32 -1.442695, %v8570_v25  ;;  %v8635_v58 = vld [vmem:[%s10265_s6 + $0x20] sm:$0xff] }
 0x2b4   : > { %v7277_v10 = vpop.eup %7276  ;;  %v2403_v47 = vmul.f32 %v7275_v53, %v8429_v59  ;;  %7296 = vrcp.f32 %v2303_v4  ;;  %v5554_v26 = vmul.f32 -1.442695, %v8574_v3  ;;  %v8587_v59 = vld [vmem:[%s10265_s6] sm:$0xff]  ;;  %v10399_v46 = vmov 0.0  }
 0x2b5   : > { %v7279_v2 = vpop.eup %7278  ;;  %v6628_v35 = vpack.c.bf16 %v2409_v12, %v2401_v6  ;;  %v2411_v19 = vmul.f32 %v7277_v10, %v8433_v18  ;;  %7298 = vpow2.f32 %v5547_v34 }
 0x2b6   : > { %v7281_v41 = vpop.eup %7280  ;;  %v2390_v48 = vmul.f32 %v7279_v2, %v8440_v60  ;;  %7300 = vpow2.f32 %v5555_v11  ;;  %v2868_v2 = vld [vmem:[%s8648_s12 + $0x88] sm:$0xff] }
 0x2b7   : > { %v7283_v39 = vpop.eup %7282  ;;  %6629 = vmatpush1.bf16.msra.mxu0 %v6628_v35  ;;  %v6636_v16 = vpack.c.bf16 %v2411_v19, %v2403_v47  ;;  %v2398_v28 = vmul.f32 %v7281_v41, %v8449_v30  ;;  %7302 = vpow2.f32 %v5544_v0 }
 0x2b8   : > { %v7285_v18 = vpop.eup %7284  ;;  %v2392_v38 = vmul.f32 %v7283_v39, %v8460_v1  ;;  %7304 = vpow2.f32 %v5552_v49  ;;  %v8599_v1 = vld [vmem:[%s10265_s6 + $0x8] sm:$0xff]  ;;  %v2867_v49 = vld [vmem:[%s8648_s12 + $0x80] sm:$0xff] }
 0x2b9   : > { %v7287_v31 = vpop.eup %7286  ;;  %6637 = vmatpush1.bf16.msra.mxu1 %v6636_v16  ;;  %v6638_v60 = vpack.c.bf16 %v2398_v28, %v2390_v48  ;;  %v2400_v43 = vmul.f32 %v7285_v18, %v8469_v52  ;;  %7306 = vpow2.f32 %v5546_v51  ;;  %v2900_v39 = vld [vmem:[%s8648_s12 + $0x188] sm:$0xff]  ;;  %v6654_v28 = vpack.c.bf16 %v2868_v2, %v2867_v49 }
 0x2ba   : > { %v7289_v62 = vpop.eup %7288  ;;  %5556 = vmatmul.mubr.msk.f32.vlgmr.msra.gmra.mrb[24].mxu0 %vm1317_vm2, %v8587_v59  ;;  %7308 = vpow2.f32 %v5554_v26  ;;  %v2389_v30 = vmul.f32 %v7287_v31, %v8478_v17  ;;  %v2899_v26 = vld [vmem:[%s8648_s12 + $0x180] sm:$0xff]  ;;  %v2852_v31 = vld [vmem:[%s8648_s12 + $0x8] sm:$0xff] }
 0x2bb   : > { %v7291_v29 = vpop.eup %7290  ;;  %6639 = vmatprep.subr.bf16.mxu0 %v6638_v60  ;;  %v6646_v7 = vpack.c.bf16 %v2400_v43, %v2392_v38  ;;  %v2310_v61 = vadd.f32 1.0, %v7289_v62  ;;  %2537 = vmatprep.mubr.f32.mxu0 %v10399_v46  ;;  %v2870_v60 = vld [vmem:[%s8648_s12 + $0x98] sm:$0xff]  ;;  %v2883_v43 = vld [vmem:[%s8648_s12 + $0x100] sm:$0xff]  ;;  %v2884_v62 = vld [vmem:[%s8648_s12 + $0x108] sm:$0xff] }
 0x2bc   : > { %v7293_v52 = vpop.eup %7292  ;;  %5561 = vmatmul.mubr.msk.f32.vlgmr.msra.gmra.mrb[24].mxu1 %vm1317_vm2, %v8587_v59  ;;  %v2318_v33 = vadd.f32 1.0, %v7291_v29 }
 0x2bd   : > { %v7295_v54 = vpop.eup %7294  ;;  %6647 = vmatprep.subr.bf16.mxu1 %v6646_v7  ;;  %v2397_v8 = vmul.f32 %v7293_v52, %v8491_v20  ;;  %7310 = vrcp.f32 %v2310_v61  ;;  %2632 = vmatprep.mubr.f32.mxu1 %v10399_v46  ;;  %v8613_v20 = vld [vmem:[%s10265_s6 + $0x10] sm:$0xff]  ;;  %v6705_v52 = vpack.c.bf16 %v2884_v62, %v2883_v43  ;;  %v2894_v43 = vld [vmem:[%s8648_s12 + $0x158] sm:$0xff] }
 0x2be   : > { %v7297_v17 = vpop.eup %7296  ;;  %v2391_v14 = vmul.f32 %v7295_v54, %v8501_v63  ;;  %7312 = vrcp.f32 %v2318_v33  ;;  %5557 = vmatmul.mubr.msk.f32.gmra.mrb[26].mxu0 %vm1317_vm2, %v8599_v1  ;;  %v2901_v7 = vld [vmem:[%s8648_s12 + $0x190] sm:$0xff]  ;;  %v2854_v54 = vld [vmem:[%s8648_s12 + $0x18] sm:$0xff] }
 0x2bf   : > { %v7299_v44 = vpop.eup %7298  ;;  %v6640_v13 = vpack.c.bf16 %v2397_v8, %v2389_v30  ;;  %v2399_v55 = vmul.f32 %v7297_v17, %v8505_v9  ;;  %2543 = vmatprep.mubr.f32.mxu0 %v10399_v46  ;;  %v2902_v30 = vld [vmem:[%s8648_s12 + $0x198] sm:$0xff]  ;;  %v2871_v8 = vld [vmem:[%s8648_s12 + $0xa0] sm:$0xff]  ;;  %v2872_v17 = vld [vmem:[%s8648_s12 + $0xa8] sm:$0xff] }
 0x2c0   : > { %v7301_v36 = vpop.eup %7300  ;;  %v2312_v23 = vadd.f32 1.0, %v7299_v44  ;;  %5562 = vmatmul.mubr.msk.f32.gmra.mrb[26].mxu1 %vm1317_vm2, %v8599_v1  ;;  %v6708_v33 = vpack.c.bf16 %v2902_v30, %v2901_v7  ;;  %v2912_v7 = vld [vmem:[%s8648_s12 + $0x1e8] sm:$0xff] }
 0x2c1   : > { %v7303_v63 = vpop.eup %7302  ;;  %6641 = vmatpush1.bf16.msra.mxu0 %v6640_v13  ;;  %v6648_v15 = vpack.c.bf16 %v2399_v55, %v2391_v14  ;;  %v2320_v22 = vadd.f32 1.0, %v7301_v36  ;;  %2638 = vmatprep.mubr.f32.mxu1 %v10399_v46  ;;  %v2886_v14 = vld [vmem:[%s8648_s12 + $0x118] sm:$0xff]  ;;  %v2903_v13 = vld [vmem:[%s8648_s12 + $0x1a0] sm:$0xff]  ;;  %v2904_v55 = vld [vmem:[%s8648_s12 + $0x1a8] sm:$0xff]  ;;  %v6666_v36 = vpack.c.bf16 %v2872_v17, %v2871_v8 }
 0x2c2   : > { %v7305_v50 = vpop.eup %7304  ;;  %7314 = vrcp.f32 %v2312_v23  ;;  %v2309_v9 = vadd.f32 1.0, %v7303_v63  ;;  %5558 = vmatmul.mubr.msk.f32.gmra.mrb[28].mxu0 %vm1317_vm2, %v8613_v20  ;;  %v6714_v63 = vpack.c.bf16 %v2904_v55, %v2903_v13  ;;  %v2882_v8 = vld [vmem:[%s8648_s12 + $0xf8] sm:$0xff]  ;;  %v2895_v17 = vld [vmem:[%s8648_s12 + $0x160] sm:$0xff] }
 0x2c3   : > { %v7307_v34 = vpop.eup %7306  ;;  %6649 = vmatpush1.bf16.msra.mxu1 %v6648_v15  ;;  %7316 = vrcp.f32 %v2320_v22  ;;  %v2317_v21 = vadd.f32 1.0, %v7305_v50  ;;  %2549 = vmatprep.mubr.f32.mxu0 %v10399_v46  ;;  %v2855_v15 = vld [vmem:[%s8648_s12 + $0x20] sm:$0xff]  ;;  %v2856_v22 = vld [vmem:[%s8648_s12 + $0x28] sm:$0xff]  ;;  %v2873_v50 = vld [vmem:[%s8648_s12 + $0xb0] sm:$0xff] }
 0x2c4   : > { %v7309_v45 = vpop.eup %7308  ;;  %7318 = vrcp.f32 %v2309_v9  ;;  %v2311_v27 = vadd.f32 1.0, %v7307_v34  ;;  %5563 = vmatmul.mubr.msk.f32.gmra.mrb[28].mxu1 %vm1317_vm2, %v8613_v20  ;;  %v2874_v9 = vld [vmem:[%s8648_s12 + $0xb8] sm:$0xff]  ;;  %v2887_v34 = vld [vmem:[%s8648_s12 + $0x120] sm:$0xff] }
 0x2c5   : > { %7320 = vrcp.f32 %v2317_v21  ;;  %v2319_v6 = vadd.f32 1.0, %v7309_v45  ;;  %2644 = vmatprep.mubr.f32.mxu1 %v10399_v46  ;;  %v2888_v21 = vld [vmem:[%s8648_s12 + $0x128] sm:$0xff]  ;;  %v2905_v45 = vld [vmem:[%s8648_s12 + $0x1b0] sm:$0xff]  ;;  %v2914_v13 = vld [vmem:[%s8648_s12 + $0x1f8] sm:$0xff] }
 0x2c6   : > { %7322 = vrcp.f32 %v2311_v27  ;;  %5559 = vmatmul.mubr.msk.f32.gmra.mrb[30].mxu0 %vm1317_vm2, %v8624_v56  ;;  %v2906_v27 = vld [vmem:[%s8648_s12 + $0x1b8] sm:$0xff] }
 0x2c7   : > { %v7311_v57 = vpop.eup %7310  ;;  %7324 = vrcp.f32 %v2319_v6  ;;  %2555 = vmatprep.mubr.f32.mxu0 %v10399_v46  ;;  %v6672_v6 = vpack.c.bf16 %v2874_v9, %v2873_v50  ;;  %v2932_v50 = vld [vmem:[%s8648_s12 + $0x288] sm:$0xff]  ;;  %v2897_v9 = vld [vmem:[%s8648_s12 + $0x170] sm:$0xff] }
 0x2c8   : > { %v7313_v4 = vpop.eup %7312  ;;  %v2406_v11 = vmul.f32 %v7311_v57, %v8528_v5  ;;  %5564 = vmatmul.mubr.msk.f32.gmra.mrb[30].mxu1 %vm1317_vm2, %v8624_v56  ;;  %v6717_v57 = vpack.c.bf16 %v2888_v21, %v2887_v34  ;;  %v2898_v34 = vld [vmem:[%s8648_s12 + $0x178] sm:$0xff] }
 0x2c9   : > { %v2414_v53 = vmul.f32 %v7313_v4, %v8536_v37  ;;  %2650 = vmatprep.mubr.f32.mxu1 %v10399_v46  ;;  %v6720_v4 = vpack.c.bf16 %v2906_v27, %v2905_v45  ;;  %v2964_v45 = vld [vmem:[%s8648_s12 + $0x388] sm:$0xff] }
 0x2ca   : > { %5560 = vmatmul.mubr.msk.f32.gmra.mrb[32].mxu0 %vm1317_vm2, %v8635_v58 }
 0x2cb   : > { %v6642_v12 = vpack.c.bf16 %v2414_v53, %v2406_v11  ;;  %2721 = vmatprep.mubr.f32.mxu0 %v10399_v46  ;;  %v2858_v11 = vld [vmem:[%s8648_s12 + $0x38] sm:$0xff]  ;;  %v2875_v53 = vld [vmem:[%s8648_s12 + $0xc0] sm:$0xff] }
 0x2cc   : > { %v7315_v5 = vpop.eup %7314  ;;  %5565 = vmatmul.mubr.msk.f32.gmra.mrb[32].mxu1 %vm1317_vm2, %v8635_v58 }
 0x2cd   : > { %v7317_v37 = vpop.eup %7316  ;;  %6643 = vmatprep.subr.bf16.mxu0 %v6642_v12  ;;  %v2408_v0 = vmul.f32 %v7315_v5, %v8549_v40  ;;  %2816 = vmatprep.mubr.f32.mxu1 %v10399_v46  ;;  %v2876_v12 = vld [vmem:[%s8648_s12 + $0xc8] sm:$0xff]  ;;  %v2889_v5 = vld [vmem:[%s8648_s12 + $0x130] sm:$0xff] }
 0x2ce   : > { %v7319_v10 = vpop.eup %7318  ;;  %v2416_v47 = vmul.f32 %v7317_v37, %v8558_v32  ;;  %v2890_v37 = vld [vmem:[%s8648_s12 + $0x138] sm:$0xff]  ;;  %v6678_v49 = vpack.c.bf16 %v2876_v12, %v2875_v53  ;;  %v2947_v12 = vld [vmem:[%s8648_s12 + $0x300] sm:$0xff] }
 0x2cf   : > { %v7321_v35 = vpop.eup %7320  ;;  %v2405_v19 = vmul.f32 %v7319_v10, %v8563_v42  ;;  %v2907_v10 = vld [vmem:[%s8648_s12 + $0x1c0] sm:$0xff]  ;;  %v6723_v2 = vpack.c.bf16 %v2890_v37, %v2889_v5  ;;  %v2934_v53 = vld [vmem:[%s8648_s12 + $0x298] sm:$0xff]  ;;  %v2948_v5 = vld [vmem:[%s8648_s12 + $0x308] sm:$0xff] }
 0x2d0   : > { %v7323_v51 = vpop.eup %7322  ;;  %v6650_v41 = vpack.c.bf16 %v2416_v47, %v2408_v0  ;;  %v2413_v48 = vmul.f32 %v7321_v35, %v8566_v24  ;;  %v6702_v24 = vpack.c.bf16 %v2900_v39, %v2899_v26  ;;  %v2908_v47 = vld [vmem:[%s8648_s12 + $0x1c8] sm:$0xff]  ;;  %v2891_v26 = vld [vmem:[%s8648_s12 + $0x140] sm:$0xff] }
 0x2d1   : > { %v7325_v16 = vpop.eup %7324  ;;  %v2407_v40 = vmul.f32 %v7323_v51, %v8570_v25  ;;  %v2851_v25 = vld [vmem:[%s8648_s12] sm:$0xff]  ;;  %v6726_v35 = vpack.c.bf16 %v2908_v47, %v2907_v10  ;;  %v2860_v51 = vld [vmem:[%s8648_s12 + $0x48] sm:$0xff]  ;;  %v2966_v10 = vld [vmem:[%s8648_s12 + $0x398] sm:$0xff] }
 0x2d2   : > { %6651 = vmatprep.subr.bf16.mxu1 %v6650_v41  ;;  %v6644_v32 = vpack.c.bf16 %v2413_v48, %v2405_v19  ;;  %v2415_v42 = vmul.f32 %v7325_v16, %v8574_v3  ;;  %v2869_v3 = vld [vmem:[%s8648_s12 + $0x90] sm:$0xff]  ;;  %v6657_v29 = vpack.c.bf16 %v2852_v31, %v2851_v25  ;;  %v2859_v19 = vld [vmem:[%s8648_s12 + $0x40] sm:$0xff]  ;;  %v2878_v48 = vld [vmem:[%s8648_s12 + $0xd8] sm:$0xff] }
 0x2d3   : > { %v6660_v61 = vpack.c.bf16 %v2870_v60, %v2869_v3  ;;  %v2877_v41 = vld [vmem:[%s8648_s12 + $0xd0] sm:$0xff]  ;;  %v2892_v39 = vld [vmem:[%s8648_s12 + $0x148] sm:$0xff]  ;;  %v6681_v16 = vpack.c.bf16 %v2860_v51, %v2859_v19  ;;  %v2862_v25 = vld [vmem:[%s8648_s12 + $0x58] sm:$0xff] }
 0x2d4   : > { %6645 = vmatpush1.bf16.msra.mxu0 %v6644_v32  ;;  %v6652_v38 = vpack.c.bf16 %v2415_v42, %v2407_v40  ;;  %v2909_v40 = vld [vmem:[%s8648_s12 + $0x1d0] sm:$0xff]  ;;  %v6684_v32 = vpack.c.bf16 %v2878_v48, %v2877_v41  ;;  %v6729_v42 = vpack.c.bf16 %v2892_v39, %v2891_v26  ;;  %v2879_v31 = vld [vmem:[%s8648_s12 + $0xe0] sm:$0xff]  ;;  %v2880_v3 = vld [vmem:[%s8648_s12 + $0xe8] sm:$0xff] }
 0x2d5   : > { %6656 = vmatprep.subr.msk.bf16.mxu0 %vm8666_vm3, %v6654_v28  ;;  %v2910_v28 = vld [vmem:[%s8648_s12 + $0x1d8] sm:$0xff]  ;;  %v2893_v60 = vld [vmem:[%s8648_s12 + $0x150] sm:$0xff]  ;;  %v6690_v30 = vpack.c.bf16 %v2880_v3, %v2879_v31  ;;  %v2935_v48 = vld [vmem:[%s8648_s12 + $0x2a0] sm:$0xff] }
 0x2d6   : > { %6653 = vmatpush1.bf16.msra.mxu1 %v6652_v38  ;;  %v2861_v38 = vld [vmem:[%s8648_s12 + $0x50] sm:$0xff]  ;;  %v2918_v51 = vld [vmem:[%s8648_s12 + $0x218] sm:$0xff]  ;;  %v2936_v26 = vld [vmem:[%s8648_s12 + $0x2a8] sm:$0xff] }
 0x2d7   : > { %6704 = vmatprep.subr.msk.bf16.mxu1 %vm8666_vm3, %v6702_v24  ;;  %5566 = vmatmul.mubr.msk.f32.vlgmr.msra.gmra.mrb[34].mxu0 %vm1317_vm2, %v8587_v59  ;;  %v6732_v24 = vpack.c.bf16 %v2910_v28, %v2909_v40  ;;  %v6687_v62 = vpack.c.bf16 %v2862_v25, %v2861_v38  ;;  %v2917_v19 = vld [vmem:[%s8648_s12 + $0x210] sm:$0xff]  ;;  %v2967_v28 = vld [vmem:[%s8648_s12 + $0x3a0] sm:$0xff]  ;;  %v2920_v3 = vld [vmem:[%s8648_s12 + $0x228] sm:$0xff] }
 0x2d8   : > { %2727 = vmatprep.mubr.f32.mxu0 %v10399_v46  ;;  %v8867_v41 = vld [vmem:[%s10267_s8 + $0x10] sm:$0xff]  ;;  %v6759_v40 = vpack.c.bf16 %v2918_v51, %v2917_v19  ;;  %v2919_v31 = vld [vmem:[%s8648_s12 + $0x220] sm:$0xff] }
 0x2d9   : > { %5571 = vmatmul.mubr.msk.f32.vlgmr.msra.gmra.mrb[34].mxu1 %vm1317_vm2, %v8587_v59  ;;  %v2853_v59 = vld [vmem:[%s8648_s12 + $0x10] sm:$0xff] }
 0x2da   : > { %2822 = vmatprep.mubr.f32.mxu1 %v10399_v46  ;;  %v6663_v44 = vpack.c.bf16 %v2854_v54, %v2853_v59  ;;  %v2864_v59 = vld [vmem:[%s8648_s12 + $0x68] sm:$0xff]  ;;  %v2881_v54 = vld [vmem:[%s8648_s12 + $0xf0] sm:$0xff] }
 0x2db   : > { %5567 = vmatmul.mubr.msk.f32.gmra.mrb[36].mxu0 %vm1317_vm2, %v8599_v1  ;;  %v6696_v55 = vpack.c.bf16 %v2882_v8, %v2881_v54  ;;  %v2949_v39 = vld [vmem:[%s8648_s12 + $0x310] sm:$0xff]  ;;  %v2922_v8 = vld [vmem:[%s8648_s12 + $0x238] sm:$0xff] }
 0x2dc   : > { %2733 = vmatprep.mubr.f32.mxu0 %v10399_v46  ;;  %v2921_v54 = vld [vmem:[%s8648_s12 + $0x230] sm:$0xff] }
 0x2dd   : > { %6659 = vmatpush3.bf16.xpose.msk.msra.mxu0 %vm8666_vm3, %v6657_v29  ;;  %5572 = vmatmul.mubr.msk.f32.gmra.mrb[36].mxu1 %vm1317_vm2, %v8599_v1  ;;  %v2885_v1 = vld [vmem:[%s8648_s12 + $0x110] sm:$0xff]  ;;  %v2911_v29 = vld [vmem:[%s8648_s12 + $0x1e0] sm:$0xff] }
 0x2de   : > { %2828 = vmatprep.mubr.f32.mxu1 %v10399_v46  ;;  %6662 = vmatprep.subr.msk.bf16.mxu0 %vm8666_vm3, %v6660_v61  ;;  %v6711_v23 = vpack.c.bf16 %v2886_v14, %v2885_v1  ;;  %v6735_v61 = vpack.c.bf16 %v2894_v43, %v2893_v60  ;;  %v2896_v1 = vld [vmem:[%s8648_s12 + $0x168] sm:$0xff]  ;;  %v2937_v60 = vld [vmem:[%s8648_s12 + $0x2b0] sm:$0xff]  ;;  %v2938_v43 = vld [vmem:[%s8648_s12 + $0x2b8] sm:$0xff] }
 0x2df   : > { %6707 = vmatpush3.bf16.xpose.msk.msra.mxu1 %vm8666_vm3, %v6705_v52  ;;  %5568 = vmatmul.mubr.msk.f32.gmra.mrb[38].mxu0 %vm1317_vm2, %v8613_v20  ;;  %v6738_v52 = vpack.c.bf16 %v2912_v7, %v2911_v29  ;;  %v2952_v29 = vld [vmem:[%s8648_s12 + $0x328] sm:$0xff]  ;;  %v6765_v7 = vpack.c.bf16 %v2920_v3, %v2919_v31 }
 0x2e0   : > { %6710 = vmatprep.subr.msk.bf16.mxu1 %vm8666_vm3, %v6708_v33  ;;  %2739 = vmatprep.mubr.f32.mxu0 %v10399_v46  ;;  %v2863_v33 = vld [vmem:[%s8648_s12 + $0x60] sm:$0xff] }
 0x2e1   : > { %5573 = vmatmul.mubr.msk.f32.gmra.mrb[38].mxu1 %vm1317_vm2, %v8613_v20  ;;  %v8726_v20 = vld [vmem:[%s10267_s8] sm:$0xff]  ;;  %v6693_v14 = vpack.c.bf16 %v2864_v59, %v2863_v33 }
 0x2e2   : > { %2834 = vmatprep.mubr.f32.mxu1 %v10399_v46 }
 0x2e3   : > { %5569 = vmatmul.mubr.msk.f32.gmra.mrb[40].mxu0 %vm1317_vm2, %v8624_v56 }
 0x2e4   : > { %2745 = vmatprep.mubr.f32.mxu0 %v10399_v46 }
 0x2e5   : > { %6665 = vmatpush3.bf16.xpose.msk.msra.mxu0 %vm8666_vm3, %v6663_v44  ;;  %5574 = vmatmul.mubr.msk.f32.gmra.mrb[40].mxu1 %vm1317_vm2, %v8624_v56  ;;  %v6669_v56 = vpack.c.bf16 %v2856_v22, %v2855_v15  ;;  %v2913_v44 = vld [vmem:[%s8648_s12 + $0x1f0] sm:$0xff]  ;;  %v2866_v15 = vld [vmem:[%s8648_s12 + $0x78] sm:$0xff]  ;;  %v2931_v22 = vld [vmem:[%s8648_s12 + $0x280] sm:$0xff] }
 0x2e6   : > { %2840 = vmatprep.mubr.f32.mxu1 %v10399_v46  ;;  %6668 = vmatprep.subr.msk.bf16.mxu0 %vm8666_vm3, %v6666_v36  ;;  %v6741_v36 = vpack.c.bf16 %v2896_v1, %v2895_v17  ;;  %v6750_v27 = vpack.c.bf16 %v2932_v50, %v2931_v22  ;;  %v2939_v17 = vld [vmem:[%s8648_s12 + $0x2c0] sm:$0xff]  ;;  %v2940_v1 = vld [vmem:[%s8648_s12 + $0x2c8] sm:$0xff] }
 0x2e7   : > { %6713 = vmatpush3.bf16.xpose.msk.msra.mxu1 %vm8666_vm3, %v6711_v23  ;;  %5570 = vmatmul.mubr.msk.f32.gmra.mrb[42].mxu0 %vm1317_vm2, %v8635_v58  ;;  %v6744_v23 = vpack.c.bf16 %v2914_v13, %v2913_v44  ;;  %v2954_v44 = vld [vmem:[%s8648_s12 + $0x338] sm:$0xff]  ;;  %v6771_v13 = vpack.c.bf16 %v2922_v8, %v2921_v54  ;;  %v2923_v22 = vld [vmem:[%s8648_s12 + $0x240] sm:$0xff]  ;;  %v2924_v50 = vld [vmem:[%s8648_s12 + $0x248] sm:$0xff] }
 0x2e8   : > { %6716 = vmatprep.subr.msk.bf16.mxu1 %vm8666_vm3, %v6714_v63  ;;  %6078 = vmatprep.mubr.msk.f32.mxu0 %vm1317_vm2, %v8726_v20  ;;  %v2865_v63 = vld [vmem:[%s8648_s12 + $0x70] sm:$0xff] }
 0x2e9   : > { %5575 = vmatmul.mubr.msk.f32.gmra.mrb[42].mxu1 %vm1317_vm2, %v8635_v58  ;;  %v2857_v58 = vld [vmem:[%s8648_s12 + $0x30] sm:$0xff]  ;;  %v6699_v21 = vpack.c.bf16 %v2866_v15, %v2865_v63 }
 0x2ea   : > { %6118 = vmatprep.mubr.msk.f32.mxu1 %vm1317_vm2, %v8726_v20  ;;  %v6675_v0 = vpack.c.bf16 %v2858_v11, %v2857_v58  ;;  %v2916_v58 = vld [vmem:[%s8648_s12 + $0x208] sm:$0xff]  ;;  %v2933_v11 = vld [vmem:[%s8648_s12 + $0x290] sm:$0xff] }
 0x2eb   : > { %v6756_v47 = vpack.c.bf16 %v2934_v53, %v2933_v11  ;;  %v2925_v11 = vld [vmem:[%s8648_s12 + $0x250] sm:$0xff]  ;;  %v2926_v53 = vld [vmem:[%s8648_s12 + $0x258] sm:$0xff] }
 0x2ed   : > { %6671 = vmatpush3.bf16.xpose.msk.msra.mxu0 %vm8666_vm3, %v6669_v56  ;;  %v2963_v56 = vld [vmem:[%s8648_s12 + $0x380] sm:$0xff] }
 0x2ee   : > { %6674 = vmatprep.subr.msk.bf16.mxu0 %vm8666_vm3, %v6672_v6  ;;  %v6747_v6 = vpack.c.bf16 %v2898_v34, %v2897_v9  ;;  %v2941_v9 = vld [vmem:[%s8648_s12 + $0x2d0] sm:$0xff]  ;;  %v2942_v34 = vld [vmem:[%s8648_s12 + $0x2d8] sm:$0xff] }
 0x2ef   : > { %6719 = vmatpush3.bf16.xpose.msk.msra.mxu1 %vm8666_vm3, %v6717_v57  ;;  %v6798_v57 = vpack.c.bf16 %v2964_v45, %v2963_v56  ;;  %v2956_v56 = vld [vmem:[%s8648_s12 + $0x348] sm:$0xff]  ;;  %v6777_v45 = vpack.c.bf16 %v2924_v50, %v2923_v22 }
 0x2f0   : > { %6722 = vmatprep.subr.msk.bf16.mxu1 %vm8666_vm3, %v6720_v4  ;;  %v2915_v4 = vld [vmem:[%s8648_s12 + $0x200] sm:$0xff] }
 0x2f1   : > { %v6753_v37 = vpack.c.bf16 %v2916_v58, %v2915_v4 }
 0x2f5   : > { %6677 = vmatpush3.bf16.xpose.msk.msra.mxu0 %vm8666_vm3, %v6675_v0  ;;  %v2965_v0 = vld [vmem:[%s8648_s12 + $0x390] sm:$0xff] }
 0x2f6   : > { %6680 = vmatprep.subr.msk.bf16.mxu0 %vm8666_vm3, %v6678_v49  ;;  %v8850_v49 = vld [vmem:[%s10267_s8 + $0x8] sm:$0xff] }
 0x2f7   : > { %6725 = vmatpush3.bf16.xpose.msk.msra.mxu1 %vm8666_vm3, %v6723_v2  ;;  %v6801_v2 = vpack.c.bf16 %v2948_v5, %v2947_v12  ;;  %v2943_v12 = vld [vmem:[%s8648_s12 + $0x2e0] sm:$0xff]  ;;  %v2944_v5 = vld [vmem:[%s8648_s12 + $0x2e8] sm:$0xff] }
 0x2f8   : > { %6728 = vmatprep.subr.msk.bf16.mxu1 %vm8666_vm3, %v6726_v35  ;;  %v6804_v35 = vpack.c.bf16 %v2966_v10, %v2965_v0  ;;  %v2958_v0 = vld [vmem:[%s8648_s12 + $0x358] sm:$0xff]  ;;  %v6783_v10 = vpack.c.bf16 %v2926_v53, %v2925_v11  ;;  %v3740_v53 = vld [vmem:[%s8994_s15 + $0x28] sm:$0xff] }
 0x2fd   : > { %6683 = vmatpush3.bf16.xpose.msk.msra.mxu0 %vm8666_vm3, %v6681_v16  ;;  %v2950_v16 = vld [vmem:[%s8648_s12 + $0x318] sm:$0xff] }
 0x2fe   : > { %6686 = vmatprep.subr.msk.bf16.mxu0 %vm8666_vm3, %v6684_v32  ;;  %v2968_v32 = vld [vmem:[%s8648_s12 + $0x3a8] sm:$0xff]  ;;  %v6807_v38 = vpack.c.bf16 %v2950_v16, %v2949_v39  ;;  %v2945_v39 = vld [vmem:[%s8648_s12 + $0x2f0] sm:$0xff]  ;;  %v2946_v16 = vld [vmem:[%s8648_s12 + $0x2f8] sm:$0xff] }
 0x2ff   : > { %6731 = vmatpush3.bf16.xpose.msk.msra.mxu1 %vm8666_vm3, %v6729_v42  ;;  %v6762_v42 = vpack.c.bf16 %v2936_v26, %v2935_v48  ;;  %v6810_v25 = vpack.c.bf16 %v2968_v32, %v2967_v28  ;;  %v2927_v48 = vld [vmem:[%s8648_s12 + $0x260] sm:$0xff]  ;;  %v2928_v26 = vld [vmem:[%s8648_s12 + $0x268] sm:$0xff] }
 0x300   : > { %6734 = vmatprep.subr.msk.bf16.mxu1 %vm8666_vm3, %v6732_v24  ;;  %v8890_v24 = vld [vmem:[%s10267_s8 + $0x18] sm:$0xff]  ;;  %v2960_v28 = vld [vmem:[%s8648_s12 + $0x368] sm:$0xff]  ;;  %v6789_v32 = vpack.c.bf16 %v2928_v26, %v2927_v48  ;;  %v3741_v48 = vld [vmem:[%s8994_s15 + $0x30] sm:$0xff] }
 0x301   : > { %v3742_v26 = vld [vmem:[%s8994_s15 + $0x38] sm:$0xff] }
 0x305   : > { %6689 = vmatpush3.bf16.xpose.msk.msra.mxu0 %vm8666_vm3, %v6687_v62  ;;  %v2951_v62 = vld [vmem:[%s8648_s12 + $0x320] sm:$0xff] }
 0x306   : > { %6692 = vmatprep.subr.msk.bf16.mxu0 %vm8666_vm3, %v6690_v30  ;;  %v2969_v30 = vld [vmem:[%s8648_s12 + $0x3b0] sm:$0xff]  ;;  %v6813_v33 = vpack.c.bf16 %v2952_v29, %v2951_v62  ;;  %v3751_v62 = vld [vmem:[%s8994_s15 + $0x80] sm:$0xff]  ;;  %v3752_v29 = vld [vmem:[%s8994_s15 + $0x88] sm:$0xff] }
 0x307   : > { %6737 = vmatpush3.bf16.xpose.msk.msra.mxu1 %vm8666_vm3, %v6735_v61  ;;  %v2970_v61 = vld [vmem:[%s8648_s12 + $0x3b8] sm:$0xff] }
 0x308   : > { %6740 = vmatprep.subr.msk.bf16.mxu1 %vm8666_vm3, %v6738_v52  ;;  %v6768_v52 = vpack.c.bf16 %v2938_v43, %v2937_v60  ;;  %v6816_v59 = vpack.c.bf16 %v2970_v61, %v2969_v30  ;;  %v2929_v60 = vld [vmem:[%s8648_s12 + $0x270] sm:$0xff]  ;;  %v2930_v43 = vld [vmem:[%s8648_s12 + $0x278] sm:$0xff] }
 0x309   : > { %v2962_v30 = vld [vmem:[%s8648_s12 + $0x378] sm:$0xff]  ;;  %v6795_v61 = vpack.c.bf16 %v2930_v43, %v2929_v60  ;;  %v3744_v60 = vld [vmem:[%s8994_s15 + $0x48] sm:$0xff]  ;;  %v3761_v43 = vld [vmem:[%s8994_s15 + $0xd0] sm:$0xff] }
 0x30d   : > { %6695 = vmatpush3.bf16.xpose.msk.msra.mxu0 %vm8666_vm3, %v6693_v14  ;;  %v2953_v14 = vld [vmem:[%s8648_s12 + $0x330] sm:$0xff] }
 0x30e   : > { %6698 = vmatprep.subr.msk.bf16.mxu0 %vm8666_vm3, %v6696_v55  ;;  %v2971_v55 = vld [vmem:[%s8648_s12 + $0x3c0] sm:$0xff]  ;;  %v6819_v63 = vpack.c.bf16 %v2954_v44, %v2953_v14  ;;  %v3736_v14 = vld [vmem:[%s8994_s15 + $0x8] sm:$0xff]  ;;  %v3753_v44 = vld [vmem:[%s8994_s15 + $0x90] sm:$0xff] }
 0x30f   : > { %6743 = vmatpush3.bf16.xpose.msk.msra.mxu1 %vm8666_vm3, %v6741_v36  ;;  %v2972_v36 = vld [vmem:[%s8648_s12 + $0x3c8] sm:$0xff] }
 0x310   : > { %6746 = vmatprep.subr.msk.bf16.mxu1 %vm8666_vm3, %v6744_v23  ;;  %v6774_v23 = vpack.c.bf16 %v2940_v1, %v2939_v17  ;;  %v6822_v15 = vpack.c.bf16 %v2972_v36, %v2971_v55  ;;  %v3735_v1 = vld [vmem:[%s8994_s15] sm:$0xff]  ;;  %v3768_v36 = vld [vmem:[%s8994_s15 + $0x108] sm:$0xff] }
 0x311   : > { %v3767_v55 = vld [vmem:[%s8994_s15 + $0x100] sm:$0xff] }
 0x312   : > { %v6897_v50 = vpack.c.bf16 %v3768_v36, %v3767_v55  ;;  %v3778_v55 = vld [vmem:[%s8994_s15 + $0x158] sm:$0xff] }
 0x315   : > { %6701 = vmatpush3.bf16.xpose.msk.msra.mxu0 %vm8666_vm3, %v6699_v21  ;;  %v2955_v21 = vld [vmem:[%s8648_s12 + $0x340] sm:$0xff] }
 0x316   : > { %6752 = vmatprep.subr.msk.bf16.mxu0 %vm8666_vm3, %v6750_v27  ;;  %v2973_v27 = vld [vmem:[%s8648_s12 + $0x3d0] sm:$0xff]  ;;  %v6825_v4 = vpack.c.bf16 %v2956_v56, %v2955_v21  ;;  %v3755_v21 = vld [vmem:[%s8994_s15 + $0xa0] sm:$0xff]  ;;  %v3756_v56 = vld [vmem:[%s8994_s15 + $0xa8] sm:$0xff] }
 0x317   : > { %6749 = vmatpush3.bf16.xpose.msk.msra.mxu1 %vm8666_vm3, %v6747_v6  ;;  %v2974_v6 = vld [vmem:[%s8648_s12 + $0x3d8] sm:$0xff] }
 0x318   : > { %6800 = vmatprep.subr.msk.bf16.mxu1 %vm8666_vm3, %v6798_v57  ;;  %v6780_v57 = vpack.c.bf16 %v2942_v34, %v2941_v9  ;;  %v6828_v58 = vpack.c.bf16 %v2974_v6, %v2973_v27  ;;  %v3737_v9 = vld [vmem:[%s8994_s15 + $0x10] sm:$0xff]  ;;  %v3738_v34 = vld [vmem:[%s8994_s15 + $0x18] sm:$0xff]  ;;  %v3787_v6 = vld [vmem:[%s8994_s15 + $0x1a0] sm:$0xff] }
 0x319   : > { %v3770_v27 = vld [vmem:[%s8994_s15 + $0x118] sm:$0xff] }
 0x31c   : > { %6079 = vmatmul.mubr.msk.f32.vlgmr.msra.gmra.mrb[44].mxu0 %vm1317_vm2, %v8726_v20 }
 0x31d   : > { %6755 = vmatpush3.bf16.xpose.msk.msra.mxu0 %vm8666_vm3, %v6753_v37  ;;  %6080 = vmatprep.mubr.msk.f32.mxu0 %vm1317_vm2, %v8850_v49  ;;  %v2957_v37 = vld [vmem:[%s8648_s12 + $0x350] sm:$0xff] }
 0x31e   : > { %6119 = vmatmul.mubr.msk.f32.vlgmr.msra.gmra.mrb[44].mxu1 %vm1317_vm2, %v8726_v20  ;;  %6758 = vmatprep.subr.msk.bf16.mxu0 %vm8666_vm3, %v6756_v47  ;;  %v2975_v47 = vld [vmem:[%s8648_s12 + $0x3e0] sm:$0xff]  ;;  %v6831_v19 = vpack.c.bf16 %v2958_v0, %v2957_v37  ;;  %v3758_v37 = vld [vmem:[%s8994_s15 + $0xb8] sm:$0xff] }
 0x31f   : > { %6803 = vmatpush3.bf16.xpose.msk.msra.mxu1 %vm8666_vm3, %v6801_v2  ;;  %6120 = vmatprep.mubr.msk.f32.mxu1 %vm1317_vm2, %v8850_v49  ;;  %v2976_v2 = vld [vmem:[%s8648_s12 + $0x3e8] sm:$0xff]  ;;  %v3771_v0 = vld [vmem:[%s8994_s15 + $0x120] sm:$0xff] }
 0x320   : > { %6806 = vmatprep.subr.msk.bf16.mxu1 %vm8666_vm3, %v6804_v35  ;;  %6081 = vmatmul.mubr.msk.f32.gmra.mrb[46].mxu0 %vm1317_vm2, %v8850_v49  ;;  %v6786_v35 = vpack.c.bf16 %v2944_v5, %v2943_v12  ;;  %v6834_v51 = vpack.c.bf16 %v2976_v2, %v2975_v47  ;;  %v9081_v12 = vld [vmem:[%s10268_s9] sm:$0xff]  ;;  %v3757_v5 = vld [vmem:[%s8994_s15 + $0xb0] sm:$0xff]  ;;  %v3790_v2 = vld [vmem:[%s8994_s15 + $0x1b8] sm:$0xff] }
 0x321   : > { %6082 = vmatprep.mubr.msk.f32.mxu0 %vm1317_vm2, %v8867_v41  ;;  %v3789_v47 = vld [vmem:[%s8994_s15 + $0x1b0] sm:$0xff] }
 0x322   : > { %6121 = vmatmul.mubr.msk.f32.gmra.mrb[46].mxu1 %vm1317_vm2, %v8850_v49 }
 0x323   : > { %6122 = vmatprep.mubr.msk.f32.mxu1 %vm1317_vm2, %v8867_v41 }
 0x324   : > { %6083 = vmatmul.mubr.msk.f32.gmra.mrb[48].mxu0 %vm1317_vm2, %v8867_v41 }
 0x325   : > { %6761 = vmatpush3.bf16.xpose.msk.msra.mxu0 %vm8666_vm3, %v6759_v40  ;;  %6084 = vmatprep.mubr.msk.f32.mxu0 %vm1317_vm2, %v8890_v24  ;;  %v2959_v40 = vld [vmem:[%s8648_s12 + $0x360] sm:$0xff] }
 0x326   : > { %6764 = vmatprep.subr.msk.bf16.mxu0 %vm8666_vm3, %v6762_v42  ;;  %6123 = vmatmul.mubr.msk.f32.gmra.mrb[48].mxu1 %vm1317_vm2, %v8867_v41  ;;  %v2977_v42 = vld [vmem:[%s8648_s12 + $0x3f0] sm:$0xff]  ;;  %v6837_v31 = vpack.c.bf16 %v2960_v28, %v2959_v40  ;;  %v3774_v40 = vld [vmem:[%s8994_s15 + $0x138] sm:$0xff]  ;;  %v6867_v28 = vpack.c.bf16 %v3742_v26, %v3741_v48 }
 0x327   : > { %6809 = vmatpush3.bf16.xpose.msk.msra.mxu1 %vm8666_vm3, %v6807_v38  ;;  %6124 = vmatprep.mubr.msk.f32.mxu1 %vm1317_vm2, %v8890_v24  ;;  %v2978_v38 = vld [vmem:[%s8648_s12 + $0x3f8] sm:$0xff] }
 0x328   : > { %6812 = vmatprep.subr.msk.bf16.mxu1 %vm8666_vm3, %v6810_v25  ;;  %6085 = vmatmul.mubr.msk.f32.gmra.mrb[50].mxu0 %vm1317_vm2, %v8890_v24  ;;  %v6792_v25 = vpack.c.bf16 %v2946_v16, %v2945_v39  ;;  %v6840_v3 = vpack.c.bf16 %v2978_v38, %v2977_v42  ;;  %v3760_v39 = vld [vmem:[%s8994_s15 + $0xc8] sm:$0xff]  ;;  %v3773_v16 = vld [vmem:[%s8994_s15 + $0x130] sm:$0xff] }
 0x329   : > { %6158 = vmatprep.mubr.msk.f32.mxu0 %vm1317_vm2, %v8726_v20  ;;  %v3792_v42 = vld [vmem:[%s8994_s15 + $0x1c8] sm:$0xff] }
 0x32a   : > { %6125 = vmatmul.mubr.msk.f32.gmra.mrb[50].mxu1 %vm1317_vm2, %v8890_v24 }
 0x32b   : > { %6198 = vmatprep.mubr.msk.f32.mxu1 %vm1317_vm2, %v8726_v20 }
 0x32d   : > { %6767 = vmatpush3.bf16.xpose.msk.msra.mxu0 %vm8666_vm3, %v6765_v7  ;;  %v2961_v7 = vld [vmem:[%s8648_s12 + $0x370] sm:$0xff]  ;;  %s10208_s12 = scalar_lea.hbm %s10270_s11, %s5885_s30 }
 0x32e   : > { %6770 = vmatprep.subr.msk.bf16.mxu0 %vm8666_vm3, %v6768_v52  ;;  %v3783_v52 = vld [vmem:[%s8994_s15 + $0x180] sm:$0xff]  ;;  %v6843_v54 = vpack.c.bf16 %v2962_v30, %v2961_v7  ;;  %v3776_v7 = vld [vmem:[%s8994_s15 + $0x148] sm:$0xff] }
 0x32f   : > { %6815 = vmatpush3.bf16.xpose.msk.msra.mxu1 %vm8666_vm3, %v6813_v33  ;;  %v3784_v33 = vld [vmem:[%s8994_s15 + $0x188] sm:$0xff] }
 0x330   : > { %6818 = vmatprep.subr.msk.bf16.mxu1 %vm8666_vm3, %v6816_v59  ;;  %v6846_v59 = vpack.c.bf16 %v3752_v29, %v3751_v62  ;;  %v6894_v17 = vpack.c.bf16 %v3784_v33, %v3783_v52  ;;  %v3762_v62 = vld [vmem:[%s8994_s15 + $0xd8] sm:$0xff]  ;;  %v3775_v29 = vld [vmem:[%s8994_s15 + $0x140] sm:$0xff] }
 0x331   : > { %v3794_v52 = vld [vmem:[%s8994_s15 + $0x1d8] sm:$0xff]  ;;  %v6876_v33 = vpack.c.bf16 %v3762_v62, %v3761_v43  ;;  %v3831_v43 = vld [vmem:[%s8994_s15 + $0x300] sm:$0xff]  ;;  %v3832_v62 = vld [vmem:[%s8994_s15 + $0x308] sm:$0xff] }
 0x335   : > { %6773 = vmatpush3.bf16.xpose.msk.msra.mxu0 %vm8666_vm3, %v6771_v13  ;;  %v3754_v13 = vld [vmem:[%s8994_s15 + $0x98] sm:$0xff] }
 0x336   : > { %6776 = vmatprep.subr.msk.bf16.mxu0 %vm8666_vm3, %v6774_v23  ;;  %v6849_v23 = vpack.c.bf16 %v3736_v14, %v3735_v1  ;;  %v6852_v22 = vpack.c.bf16 %v3754_v13, %v3753_v44  ;;  %v3746_v1 = vld [vmem:[%s8994_s15 + $0x58] sm:$0xff]  ;;  %v3763_v14 = vld [vmem:[%s8994_s15 + $0xe0] sm:$0xff]  ;;  %v3764_v44 = vld [vmem:[%s8994_s15 + $0xe8] sm:$0xff] }
 0x337   : > { %6821 = vmatpush3.bf16.xpose.msk.msra.mxu1 %vm8666_vm3, %v6819_v63  ;;  %v3785_v63 = vld [vmem:[%s8994_s15 + $0x190] sm:$0xff] }
 0x338   : > { %6824 = vmatprep.subr.msk.bf16.mxu1 %vm8666_vm3, %v6822_v15  ;;  %v3786_v15 = vld [vmem:[%s8994_s15 + $0x198] sm:$0xff]  ;;  %v3777_v13 = vld [vmem:[%s8994_s15 + $0x150] sm:$0xff] }
 0x339   : > { %v6900_v18 = vpack.c.bf16 %v3786_v15, %v3785_v63  ;;  %v3796_v63 = vld [vmem:[%s8994_s15 + $0x1e8] sm:$0xff]  ;;  %v6882_v15 = vpack.c.bf16 %v3764_v44, %v3763_v14 }
 0x33d   : > { %6779 = vmatpush3.bf16.xpose.msk.msra.mxu0 %vm8666_vm3, %v6777_v45  ;;  %v3769_v45 = vld [vmem:[%s8994_s15 + $0x110] sm:$0xff] }
 0x33e   : > { %6782 = vmatprep.subr.msk.bf16.mxu0 %vm8666_vm3, %v6780_v57  ;;  %v3788_v57 = vld [vmem:[%s8994_s15 + $0x1a8] sm:$0xff] }
 0x33f   : > { %6827 = vmatpush3.bf16.xpose.msk.msra.mxu1 %vm8666_vm3, %v6825_v4  ;;  %v6858_v4 = vpack.c.bf16 %v3756_v56, %v3755_v21  ;;  %v6906_v11 = vpack.c.bf16 %v3788_v57, %v3787_v6  ;;  %v3766_v21 = vld [vmem:[%s8994_s15 + $0xf8] sm:$0xff]  ;;  %v3779_v56 = vld [vmem:[%s8994_s15 + $0x160] sm:$0xff] }
 0x340   : > { %6830 = vmatprep.subr.msk.bf16.mxu1 %vm8666_vm3, %v6828_v58  ;;  %v6903_v58 = vpack.c.bf16 %v3770_v27, %v3769_v45  ;;  %v3780_v45 = vld [vmem:[%s8994_s15 + $0x168] sm:$0xff]  ;;  %v3798_v6 = vld [vmem:[%s8994_s15 + $0x1f8] sm:$0xff] }
 0x345   : > { %6785 = vmatpush3.bf16.xpose.msk.msra.mxu0 %vm8666_vm3, %v6783_v10 }
 0x346   : > { %6788 = vmatprep.subr.msk.bf16.mxu0 %vm8666_vm3, %v6786_v35  ;;  %v6864_v35 = vpack.c.bf16 %v3758_v37, %v3757_v5 }
 0x347   : > { %6833 = vmatpush3.bf16.xpose.msk.msra.mxu1 %vm8666_vm3, %v6831_v19 }
 0x348   : > { %6836 = vmatprep.subr.msk.bf16.mxu1 %vm8666_vm3, %v6834_v51  ;;  %v6912_v51 = vpack.c.bf16 %v3790_v2, %v3789_v47  ;;  %v3782_v47 = vld [vmem:[%s8994_s15 + $0x178] sm:$0xff] }
 0x34d   : > { %6791 = vmatpush3.bf16.xpose.msk.msra.mxu0 %vm8666_vm3, %v6789_v32  ;;  %v3791_v32 = vld [vmem:[%s8994_s15 + $0x1c0] sm:$0xff] }
 0x34e   : > { %6794 = vmatprep.subr.msk.bf16.mxu0 %vm8666_vm3, %v6792_v25  ;;  %v6915_v25 = vpack.c.bf16 %v3774_v40, %v3773_v16 }
 0x34f   : > { %6839 = vmatpush3.bf16.xpose.msk.msra.mxu1 %vm8666_vm3, %v6837_v31  ;;  %v6918_v31 = vpack.c.bf16 %v3792_v42, %v3791_v32  ;;  %v3799_v42 = vld [vmem:[%s8994_s15 + $0x200] sm:$0xff] }
 0x350   : > { %6842 = vmatprep.subr.msk.bf16.mxu1 %vm8666_vm3, %v6840_v3  ;;  %v3743_v3 = vld [vmem:[%s8994_s15 + $0x40] sm:$0xff] }
 0x351   : > { %v6873_v30 = vpack.c.bf16 %v3744_v60, %v3743_v3  ;;  %v3817_v3 = vld [vmem:[%s8994_s15 + $0x290] sm:$0xff]  ;;  %v3818_v60 = vld [vmem:[%s8994_s15 + $0x298] sm:$0xff] }
 0x355   : > { %6797 = vmatpush3.bf16.xpose.msk.msra.mxu0 %vm8666_vm3, %v6795_v61  ;;  %v3793_v61 = vld [vmem:[%s8994_s15 + $0x1d0] sm:$0xff] }
 0x356   : > { %6848 = vmatprep.subr.msk.bf16.mxu0 %vm9014_vm5, %v6846_v59  ;;  %v6921_v59 = vpack.c.bf16 %v3776_v7, %v3775_v29 }
 0x357   : > { %6845 = vmatpush3.bf16.xpose.msk.msra.mxu1 %vm8666_vm3, %v6843_v54  ;;  %v6924_v54 = vpack.c.bf16 %v3794_v52, %v3793_v61  ;;  %v3850_v61 = vld [vmem:[%s8994_s15 + $0x398] sm:$0xff] }
 0x358   : > { %6896 = vmatprep.subr.msk.bf16.mxu1 %vm9014_vm5, %v6894_v17  ;;  %v3745_v17 = vld [vmem:[%s8994_s15 + $0x50] sm:$0xff] }
 0x359   : > { %v6879_v36 = vpack.c.bf16 %v3746_v1, %v3745_v17  ;;  %v6993_v17 = vpack.c.bf16 %v3832_v62, %v3831_v43  ;;  %v3805_v62 = vld [vmem:[%s8994_s15 + $0x230] sm:$0xff] }
 0x35c   : > { %6159 = vmatmul.mubr.msk.f32.vlgmr.msra.gmra.mrb[52].mxu0 %vm1317_vm2, %v8726_v20 }
 0x35d   : > { %6851 = vmatpush3.bf16.xpose.msk.msra.mxu0 %vm9014_vm5, %v6849_v23  ;;  %6160 = vmatprep.mubr.msk.f32.mxu0 %vm1317_vm2, %v8850_v49  ;;  %v3795_v23 = vld [vmem:[%s8994_s15 + $0x1e0] sm:$0xff] }
 0x35e   : > { %6199 = vmatmul.mubr.msk.f32.vlgmr.msra.gmra.mrb[52].mxu1 %vm1317_vm2, %v8726_v20  ;;  %6854 = vmatprep.subr.msk.bf16.mxu0 %vm9014_vm5, %v6852_v22  ;;  %v6855_v20 = vpack.c.bf16 %v3738_v34, %v3737_v9  ;;  %v6927_v22 = vpack.c.bf16 %v3778_v55, %v3777_v13  ;;  %v3748_v9 = vld [vmem:[%s8994_s15 + $0x68] sm:$0xff]  ;;  %v3765_v34 = vld [vmem:[%s8994_s15 + $0xf0] sm:$0xff] }
 0x35f   : > { %6899 = vmatpush3.bf16.xpose.msk.msra.mxu1 %vm9014_vm5, %v6897_v50  ;;  %6200 = vmatprep.mubr.msk.f32.mxu1 %vm1317_vm2, %v8850_v49  ;;  %v6930_v50 = vpack.c.bf16 %v3796_v63, %v3795_v23  ;;  %v6888_v57 = vpack.c.bf16 %v3766_v21, %v3765_v34  ;;  %v9249_v55 = vld [vmem:[%s10268_s9 + $0x10] sm:$0xff]  ;;  %v3802_v23 = vld [vmem:[%s8994_s15 + $0x218] sm:$0xff] }
 0x360   : > { %6902 = vmatprep.subr.msk.bf16.mxu1 %vm9014_vm5, %v6900_v18  ;;  %6161 = vmatmul.mubr.msk.f32.gmra.mrb[54].mxu0 %vm1317_vm2, %v8850_v49  ;;  %v3747_v18 = vld [vmem:[%s8994_s15 + $0x60] sm:$0xff] }
 0x361   : > { %6162 = vmatprep.mubr.msk.f32.mxu0 %vm1317_vm2, %v8867_v41  ;;  %v6885_v27 = vpack.c.bf16 %v3748_v9, %v3747_v18  ;;  %v3833_v18 = vld [vmem:[%s8994_s15 + $0x310] sm:$0xff]  ;;  %v3834_v9 = vld [vmem:[%s8994_s15 + $0x318] sm:$0xff] }
 0x362   : > { %6201 = vmatmul.mubr.msk.f32.gmra.mrb[54].mxu1 %vm1317_vm2, %v8850_v49  ;;  %v3739_v49 = vld [vmem:[%s8994_s15 + $0x20] sm:$0xff] }
 0x363   : > { %6202 = vmatprep.mubr.msk.f32.mxu1 %vm1317_vm2, %v8867_v41  ;;  %v6861_v10 = vpack.c.bf16 %v3740_v53, %v3739_v49  ;;  %v3749_v49 = vld [vmem:[%s8994_s15 + $0x70] sm:$0xff]  ;;  %v3750_v53 = vld [vmem:[%s8994_s15 + $0x78] sm:$0xff] }
 0x364   : > { %6163 = vmatmul.mubr.msk.f32.gmra.mrb[56].mxu0 %vm1317_vm2, %v8867_v41 }
 0x365   : > { %6857 = vmatpush3.bf16.xpose.msk.msra.mxu0 %vm9014_vm5, %v6855_v20  ;;  %6164 = vmatprep.mubr.msk.f32.mxu0 %vm1317_vm2, %v8890_v24  ;;  %v3797_v20 = vld [vmem:[%s8994_s15 + $0x1f0] sm:$0xff] }
 0x366   : > { %6860 = vmatprep.subr.msk.bf16.mxu0 %vm9014_vm5, %v6858_v4  ;;  %6203 = vmatmul.mubr.msk.f32.gmra.mrb[56].mxu1 %vm1317_vm2, %v8867_v41  ;;  %v3772_v41 = vld [vmem:[%s8994_s15 + $0x128] sm:$0xff]  ;;  %v6933_v4 = vpack.c.bf16 %v3780_v45, %v3779_v56  ;;  %v3851_v56 = vld [vmem:[%s8994_s15 + $0x3a0] sm:$0xff] }
 0x367   : > { %6905 = vmatpush3.bf16.xpose.msk.msra.mxu1 %vm9014_vm5, %v6903_v58  ;;  %6204 = vmatprep.mubr.msk.f32.mxu1 %vm1317_vm2, %v8890_v24  ;;  %v6909_v19 = vpack.c.bf16 %v3772_v41, %v3771_v0  ;;  %v6936_v58 = vpack.c.bf16 %v3798_v6, %v3797_v20  ;;  %v3815_v0 = vld [vmem:[%s8994_s15 + $0x280] sm:$0xff]  ;;  %v3816_v41 = vld [vmem:[%s8994_s15 + $0x288] sm:$0xff]  ;;  %v6999_v6 = vpack.c.bf16 %v3834_v9, %v3833_v18 }
 0x368   : > { %6908 = vmatprep.subr.msk.bf16.mxu1 %vm9014_vm5, %v6906_v11  ;;  %6165 = vmatmul.mubr.msk.f32.gmra.mrb[58].mxu0 %vm1317_vm2, %v8890_v24  ;;  %v6942_v26 = vpack.c.bf16 %v3816_v41, %v3815_v0  ;;  %v3852_v45 = vld [vmem:[%s8994_s15 + $0x3a8] sm:$0xff]  ;;  %v3835_v0 = vld [vmem:[%s8994_s15 + $0x320] sm:$0xff] }
 0x369   : > { %6238 = vmatprep.mubr.msk.f32.mxu0 %vm3863_vm4, %v9081_v12  ;;  %v3836_v41 = vld [vmem:[%s8994_s15 + $0x328] sm:$0xff] }
 0x36a   : > { %6205 = vmatmul.mubr.msk.f32.gmra.mrb[58].mxu1 %vm1317_vm2, %v8890_v24  ;;  %v3759_v24 = vld [vmem:[%s8994_s15 + $0xc0] sm:$0xff]  ;;  %v3856_v18 = vld [vmem:[%s8994_s15 + $0x3c8] sm:$0xff] }
 0x36b   : > { %6278 = vmatprep.mubr.msk.f32.mxu1 %vm3863_vm4, %v9081_v12  ;;  %v6870_v38 = vpack.c.bf16 %v3760_v39, %v3759_v24 }
 0x36d   : > { %6863 = vmatpush3.bf16.xpose.msk.msra.mxu0 %vm9014_vm5, %v6861_v10  ;;  %v3781_v10 = vld [vmem:[%s8994_s15 + $0x170] sm:$0xff] }
 0x36e   : > { %6866 = vmatprep.subr.msk.bf16.mxu0 %vm9014_vm5, %v6864_v35  ;;  %v6891_v35 = vpack.c.bf16 %v3750_v53, %v3749_v49  ;;  %v6939_v39 = vpack.c.bf16 %v3782_v47, %v3781_v10  ;;  %v3821_v49 = vld [vmem:[%s8994_s15 + $0x2b0] sm:$0xff]  ;;  %v3822_v53 = vld [vmem:[%s8994_s15 + $0x2b8] sm:$0xff] }
 0x36f   : > { %6911 = vmatpush3.bf16.xpose.msk.msra.mxu1 %vm9014_vm5, %v6909_v19  ;;  %v3847_v19 = vld [vmem:[%s8994_s15 + $0x380] sm:$0xff]  ;;  %v3853_v47 = vld [vmem:[%s8994_s15 + $0x3b0] sm:$0xff] }
 0x370   : > { %6914 = vmatprep.subr.msk.bf16.mxu1 %vm9014_vm5, %v6912_v51  ;;  %v3848_v51 = vld [vmem:[%s8994_s15 + $0x388] sm:$0xff] }
 0x371   : > { %v6990_v40 = vpack.c.bf16 %v3848_v51, %v3847_v19  ;;  %v6960_v51 = vpack.c.bf16 %v3822_v53, %v3821_v49 }
 0x375   : > { %6869 = vmatpush3.bf16.xpose.msk.msra.mxu0 %vm9014_vm5, %v6867_v28 }
 0x376   : > { %6872 = vmatprep.subr.msk.bf16.mxu0 %vm9014_vm5, %v6870_v38  ;;  %v3800_v38 = vld [vmem:[%s8994_s15 + $0x208] sm:$0xff] }
 0x377   : > { %6917 = vmatpush3.bf16.xpose.msk.msra.mxu1 %vm9014_vm5, %v6915_v25  ;;  %v6945_v7 = vpack.c.bf16 %v3800_v38, %v3799_v42 }
 0x378   : > { %6920 = vmatprep.subr.msk.bf16.mxu1 %vm9014_vm5, %v6918_v31 }
 0x37d   : > { %6875 = vmatpush3.bf16.xpose.msk.msra.mxu0 %vm9014_vm5, %v6873_v30  ;;  %v3849_v30 = vld [vmem:[%s8994_s15 + $0x390] sm:$0xff] }
 0x37e   : > { %6878 = vmatprep.subr.msk.bf16.mxu0 %vm9014_vm5, %v6876_v33  ;;  %v9228_v33 = vld [vmem:[%s10268_s9 + $0x8] sm:$0xff]  ;;  %v6996_v14 = vpack.c.bf16 %v3850_v61, %v3849_v30  ;;  %v3823_v61 = vld [vmem:[%s8994_s15 + $0x2c0] sm:$0xff] }
 0x37f   : > { %6923 = vmatpush3.bf16.xpose.msk.msra.mxu1 %vm9014_vm5, %v6921_v59  ;;  %v6948_v59 = vpack.c.bf16 %v3818_v60, %v3817_v3  ;;  %v9330_v60 = vpop.permute.xlu0 %2429 }
 0x380   : > { %6926 = vmatprep.subr.msk.bf16.mxu1 %vm9014_vm5, %v6924_v54 }
 0x385   : > { %6881 = vmatpush3.bf16.xpose.msk.msra.mxu0 %vm9014_vm5, %v6879_v36  ;;  %v3801_v36 = vld [vmem:[%s8994_s15 + $0x210] sm:$0xff] }
 0x386   : > { %6884 = vmatprep.subr.msk.bf16.mxu0 %vm9014_vm5, %v6882_v15  ;;  %v6951_v21 = vpack.c.bf16 %v3802_v23, %v3801_v36  ;;  %v3838_v36 = vld [vmem:[%s8994_s15 + $0x338] sm:$0xff] }
 0x387   : > { %6929 = vmatpush3.bf16.xpose.msk.msra.mxu1 %vm9014_vm5, %v6927_v22  ;;  %v3819_v22 = vld [vmem:[%s8994_s15 + $0x2a0] sm:$0xff] }
 0x388   : > { %6932 = vmatprep.subr.msk.bf16.mxu1 %vm9014_vm5, %v6930_v50  ;;  %v3820_v50 = vld [vmem:[%s8994_s15 + $0x2a8] sm:$0xff] }
 0x389   : > { %v6954_v20 = vpack.c.bf16 %v3820_v50, %v3819_v22  ;;  %v3855_v50 = vld [vmem:[%s8994_s15 + $0x3c0] sm:$0xff] }
 0x38a   : > { %v7014_v49 = vpack.c.bf16 %v3856_v18, %v3855_v50 }
 0x38d   : > { %6887 = vmatpush3.bf16.xpose.msk.msra.mxu0 %vm9014_vm5, %v6885_v27  ;;  %v9169_v11 = vpop.f32.mrb[24].mxu0  ;;  %v9282_v27 = vld [vmem:[%s10268_s9 + $0x18] sm:$0xff] }
 0x38e   : > { %6890 = vmatprep.subr.msk.bf16.mxu0 %vm9014_vm5, %v6888_v57  ;;  %v9175_v5 = vpop.f32.mrb[25].mxu0  ;;  %v7002_v57 = vpack.c.bf16 %v3852_v45, %v3851_v56  ;;  %v2534_v8 = vadd.f32 %v9169_v11, %v9330_v60 }
 0x38f   : > { %6935 = vmatpush3.bf16.xpose.msk.msra.mxu1 %vm9014_vm5, %v6933_v4  ;;  %v9179_v37 = vpop.f32.mrb[24].mxu1  ;;  %v3803_v4 = vld [vmem:[%s8994_s15 + $0x220] sm:$0xff] }
 0x390   : > { %6938 = vmatprep.subr.msk.bf16.mxu1 %vm9014_vm5, %v6936_v58  ;;  %v9187_v2 = vpop.f32.mrb[25].mxu1  ;;  %v3804_v58 = vld [vmem:[%s8994_s15 + $0x228] sm:$0xff] }
 0x391   : > { %v9191_v48 = vpop.f32.mrb[26].mxu0  ;;  %v6957_v10 = vpack.c.bf16 %v3804_v58, %v3803_v4 }
 0x392   : > { %v9193_v24 = vpop.f32.mrb[27].mxu0 }
 0x393   : > { %v9195_v16 = vpop.f32.mrb[26].mxu1 }
 0x394   : > { %v9197_v28 = vpop.f32.mrb[27].mxu1 }
 0x395   : > { %6893 = vmatpush3.bf16.xpose.msk.msra.mxu0 %vm9014_vm5, %v6891_v35  ;;  %v9201_v32 = vpop.f32.mrb[28].mxu0  ;;  %v3854_v35 = vld [vmem:[%s8994_s15 + $0x3b8] sm:$0xff] }
 0x396   : > { %6944 = vmatprep.subr.msk.bf16.mxu0 %vm9014_vm5, %v6942_v26  ;;  %v9207_v25 = vpop.f32.mrb[29].mxu0  ;;  %v7005_v26 = vpack.c.bf16 %v3836_v41, %v3835_v0  ;;  %v7008_v38 = vpack.c.bf16 %v3854_v35, %v3853_v47  ;;  %v3807_v47 = vld [vmem:[%s8994_s15 + $0x240] sm:$0xff]  ;;  %v3808_v35 = vld [vmem:[%s8994_s15 + $0x248] sm:$0xff] }
 0x397   : > { %6941 = vmatpush3.bf16.xpose.msk.msra.mxu1 %vm9014_vm5, %v6939_v39  ;;  %v9211_v31 = vpop.f32.mrb[28].mxu1 }
 0x398   : > { %6992 = vmatprep.subr.msk.bf16.mxu1 %vm9014_vm5, %v6990_v40  ;;  %v9219_v29 = vpop.f32.mrb[29].mxu1  ;;  %v9322_v40 = vpop.permute.xlu1 %2444 }
 0x399   : > { %v9223_v52 = vpop.f32.mrb[30].mxu0  ;;  %10404 = vst [vmem:[#allocation6_spill] sm:$0xff] %v9322_v40 }
 0x39a   : > { %v9230_v54 = vpop.f32.mrb[31].mxu0 }
 0x39b   : > { %v9232_v1 = vpop.f32.mrb[30].mxu1 }
 0x39c   : > { %6239 = vmatmul.mubr.msk.f32.vlgmr.msra.gmra.mrb[60].mxu0 %vm3863_vm4, %v9081_v12  ;;  %v9236_v44 = vpop.f32.mrb[31].mxu1  ;;  %v9354_v9 = vpop.permute.xlu1 %2439 }
 0x39d   : > { %6947 = vmatpush3.bf16.xpose.msk.msra.mxu0 %vm9014_vm5, %v6945_v7  ;;  %6240 = vmatprep.mubr.msk.f32.mxu0 %vm3863_vm4, %v9228_v33  ;;  %v9242_v13 = vpop.f32.mrb[32].mxu0  ;;  %v3806_v7 = vld [vmem:[%s8994_s15 + $0x238] sm:$0xff] }
 0x39e   : > { %6279 = vmatmul.mubr.msk.f32.vlgmr.msra.gmra.mrb[60].mxu1 %vm3863_vm4, %v9081_v12  ;;  %6950 = vmatprep.subr.msk.bf16.mxu0 %vm9014_vm5, %v6948_v59  ;;  %v9255_v63 = vpop.f32.mrb[33].mxu0  ;;  %v3824_v59 = vld [vmem:[%s8994_s15 + $0x2c8] sm:$0xff]  ;;  %v6963_v22 = vpack.c.bf16 %v3806_v7, %v3805_v62  ;;  %v3839_v7 = vld [vmem:[%s8994_s15 + $0x340] sm:$0xff] }
 0x39f   : > { %6995 = vmatpush3.bf16.xpose.msk.msra.mxu1 %vm9014_vm5, %v6993_v17  ;;  %6280 = vmatprep.mubr.msk.f32.mxu1 %vm3863_vm4, %v9228_v33  ;;  %v9261_v15 = vpop.f32.mrb[32].mxu1  ;;  %v6966_v56 = vpack.c.bf16 %v3824_v59, %v3823_v61  ;;  %v3840_v61 = vld [vmem:[%s8994_s15 + $0x348] sm:$0xff] }
 0x3a0   : > { %6241 = vmatmul.mubr.msk.f32.gmra.mrb[62].mxu0 %vm3863_vm4, %v9228_v33  ;;  %6998 = vmatprep.subr.msk.bf16.mxu1 %vm9014_vm5, %v6996_v14  ;;  %v9271_v34 = vpop.f32.mrb[33].mxu1  ;;  %v3837_v14 = vld [vmem:[%s8994_s15 + $0x330] sm:$0xff] }
 0x3a1   : > { %6242 = vmatprep.mubr.msk.f32.mxu0 %vm3863_vm4, %v9249_v55  ;;  %v7011_v45 = vpack.c.bf16 %v3838_v36, %v3837_v14  ;;  %v6969_v14 = vpack.c.bf16 %v3808_v35, %v3807_v47  ;;  %v3857_v36 = vld [vmem:[%s8994_s15 + $0x3d0] sm:$0xff] }
 0x3a2   : > { %6281 = vmatmul.mubr.msk.f32.gmra.mrb[62].mxu1 %vm3863_vm4, %v9228_v33 }
 0x3a3   : > { %6282 = vmatprep.mubr.msk.f32.mxu1 %vm3863_vm4, %v9249_v55 }
 0x3a4   : > { %6243 = vmatmul.mubr.msk.f32.gmra.mrb[64].mxu0 %vm3863_vm4, %v9249_v55 }
 0x3a5   : > { %6953 = vmatpush3.bf16.xpose.msk.msra.mxu0 %vm9014_vm5, %v6951_v21  ;;  %6244 = vmatprep.mubr.msk.f32.mxu0 %vm3863_vm4, %v9282_v27 }
 0x3a6   : > { %6283 = vmatmul.mubr.msk.f32.gmra.mrb[64].mxu1 %vm3863_vm4, %v9249_v55  ;;  %6956 = vmatprep.subr.msk.bf16.mxu0 %vm9014_vm5, %v6954_v20 }
 0x3a7   : > { %7001 = vmatpush3.bf16.xpose.msk.msra.mxu1 %vm9014_vm5, %v6999_v6  ;;  %6284 = vmatprep.mubr.msk.f32.mxu1 %vm3863_vm4, %v9282_v27 }
 0x3a8   : > { %6245 = vmatmul.mubr.msk.f32.gmra.mrb[66].mxu0 %vm3863_vm4, %v9282_v27  ;;  %7004 = vmatprep.subr.msk.bf16.mxu1 %vm9014_vm5, %v7002_v57  ;;  %v9359_v57 = vpop.permute.xlu0 %2434 }
 0x3a9   : > { %6318 = vmatprep.mubr.msk.f32.mxu0 %vm3863_vm4, %v9081_v12 }
 0x3aa   : > { %6285 = vmatmul.mubr.msk.f32.gmra.mrb[66].mxu1 %vm3863_vm4, %v9282_v27  ;;  %v9316_v19 = vpop.f32.mrb[34].mxu0 }
 0x3ab   : > { %v9318_v39 = vpop.f32.mrb[35].mxu0  ;;  %6358 = vmatprep.mubr.msk.f32.mxu1 %vm3863_vm4, %v9081_v12 }
 0x3ac   : > { %v9324_v42 = vpop.f32.mrb[34].mxu1  ;;  %v9394_v50 = vpop.permute.xlu0 %2449 }
 0x3ad   : > { %6959 = vmatpush3.bf16.xpose.msk.msra.mxu0 %vm9014_vm5, %v6957_v10  ;;  %v9328_v3 = vpop.f32.mrb[35].mxu1 }
 0x3ae   : > { %v9332_v43 = vpop.f32.mrb[36].mxu0  ;;  %6962 = vmatprep.subr.msk.bf16.mxu0 %vm9014_vm5, %v6960_v51 }
 0x3af   : > { %7007 = vmatpush3.bf16.xpose.msk.msra.mxu1 %vm9014_vm5, %v7005_v26  ;;  %v9340_v30 = vpop.f32.mrb[37].mxu0  ;;  %v3825_v26 = vld [vmem:[%s8994_s15 + $0x2d0] sm:$0xff] }
 0x3b0   : > { %v9344_v17 = vpop.f32.mrb[36].mxu1  ;;  %7010 = vmatprep.subr.msk.bf16.mxu1 %vm9014_vm5, %v7008_v38  ;;  %v3826_v38 = vld [vmem:[%s8994_s15 + $0x2d8] sm:$0xff] }
 0x3b1   : > { %v9350_v23 = vpop.f32.mrb[37].mxu1 }
 0x3b2   : > { %v2735_v21 = vpop.f32.mrb[38].mxu0 }
 0x3b3   : > { %v9357_v20 = vadd.f32 %v2735_v21, %v9354_v9  ;;  %v2737_v6 = vpop.f32.mrb[39].mxu0  ;;  %v6972_v21 = vpack.c.bf16 %v3826_v38, %v3825_v26  ;;  %v3809_v38 = vld [vmem:[%s8994_s15 + $0x250] sm:$0xff] }
 0x3b4   : > { %v2830_v4 = vpop.f32.mrb[38].mxu1  ;;  %v9362_v58 = vadd.f32 %v2737_v6, %v9354_v9 }
 0x3b5   : > { %10405 = vst [vmem:[#allocation9_spill] sm:$0xff] %v9357_v20  ;;  %6965 = vmatpush3.bf16.xpose.msk.msra.mxu0 %vm9014_vm5, %v6963_v22  ;;  %v9367_v53 = vadd.f32 %v2830_v4, %v9354_v9  ;;  %v2832_v0 = vpop.f32.mrb[39].mxu1  ;;  %v3858_v22 = vld [vmem:[%s8994_s15 + $0x3d8] sm:$0xff] }
 0x3b6   : > { %10406 = vst [vmem:[#allocation12_spill] sm:$0xff] %v9362_v58  ;;  %v9370_v41 = vadd.f32 %v2832_v0, %v9354_v9  ;;  %v9372_v10 = vpop.f32.mrb[40].mxu0  ;;  %6968 = vmatprep.subr.msk.bf16.mxu0 %vm9014_vm5, %v6966_v56  ;;  %v7017_v56 = vpack.c.bf16 %v3840_v61, %v3839_v7  ;;  %v7020_v0 = vpack.c.bf16 %v3858_v22, %v3857_v36  ;;  %v3810_v7 = vld [vmem:[%s8994_s15 + $0x258] sm:$0xff]  ;;  %v3827_v61 = vld [vmem:[%s8994_s15 + $0x2e0] sm:$0xff]  ;;  %v3841_v36 = vld [vmem:[%s8994_s15 + $0x350] sm:$0xff] }
 0x3b7   : > { %10407 = vst [vmem:[#allocation5_spill] sm:$0xff] %v9367_v53  ;;  %10409 = vst [vmem:[#allocation10_spill] sm:$0xff] %v9372_v10  ;;  %7013 = vmatpush3.bf16.xpose.msk.msra.mxu1 %vm9014_vm5, %v7011_v45  ;;  %v9380_v51 = vpop.f32.mrb[41].mxu0  ;;  %v3842_v22 = vld [vmem:[%s8994_s15 + $0x358] sm:$0xff] }
 0x3b8   : > { %10408 = vst [vmem:[#allocation7_spill] sm:$0xff] %v9370_v41  ;;  %10410 = vst [vmem:[#allocation8_spill] sm:$0xff] %v9380_v51  ;;  %v9384_v62 = vpop.f32.mrb[40].mxu1  ;;  %7016 = vmatprep.subr.msk.bf16.mxu1 %vm9014_vm5, %v7014_v49  ;;  %v3814_v53 = vld [vmem:[%s8994_s15 + $0x278] sm:$0xff] }
 0x3b9   : > { %10411 = vst [vmem:[#allocation11_spill] sm:$0xff] %v9384_v62  ;;  %v9390_v59 = vpop.f32.mrb[41].mxu1 }
 0x3ba   : > { %10412 = vst [vmem:[#allocation13_spill] sm:$0xff] %v9390_v59  ;;  %v2747_v18 = vpop.f32.mrb[42].mxu0 }
 0x3bb   : > { %v9397_v45 = vadd.f32 %v2747_v18, %v9394_v50  ;;  %v2749_v6 = vpop.f32.mrb[43].mxu0  ;;  %v6975_v18 = vpack.c.bf16 %v3810_v7, %v3809_v38  ;;  %v3829_v38 = vld [vmem:[%s8994_s15 + $0x2f0] sm:$0xff]  ;;  %v3830_v7 = vld [vmem:[%s8994_s15 + $0x2f8] sm:$0xff] }
 0x3bc   : > { %v2842_v4 = vpop.f32.mrb[42].mxu1  ;;  %v9400_v49 = vadd.f32 %v2749_v6, %v9394_v50  ;;  %v3860_v6 = vld [vmem:[%s8994_s15 + $0x3e8] sm:$0xff] }
 0x3bd   : > { %10413 = vst [vmem:[#allocation14_spill] sm:$0xff] %v9397_v45  ;;  %6971 = vmatpush3.bf16.xpose.msk.msra.mxu0 %vm9014_vm5, %v6969_v14  ;;  %v9405_v47 = vadd.f32 %v2842_v4, %v9394_v50  ;;  %v2844_v35 = vpop.f32.mrb[43].mxu1  ;;  %v3828_v14 = vld [vmem:[%s8994_s15 + $0x2e8] sm:$0xff] }
 0x3be   : > { %10414 = vst [vmem:[#allocation15_spill] sm:$0xff] %v9400_v49  ;;  %v9408_v26 = vadd.f32 %v2844_v35, %v9394_v50  ;;  %6974 = vmatprep.subr.msk.bf16.mxu0 %vm9014_vm5, %v6972_v21  ;;  %v3859_v21 = vld [vmem:[%s8994_s15 + $0x3e0] sm:$0xff]  ;;  %v6978_v4 = vpack.c.bf16 %v3828_v14, %v3827_v61  ;;  %v7023_v35 = vpack.c.bf16 %v3842_v22, %v3841_v36  ;;  %v3844_v14 = vld [vmem:[%s8994_s15 + $0x368] sm:$0xff]  ;;  %v3861_v22 = vld [vmem:[%s8994_s15 + $0x3f0] sm:$0xff] }
 0x3bf   : > { %10415 = vst [vmem:[#allocation16_spill] sm:$0xff] %v9405_v47  ;;  %7019 = vmatpush3.bf16.xpose.msk.msra.mxu1 %vm9014_vm5, %v7017_v56  ;;  %v7026_v41 = vpack.c.bf16 %v3860_v6, %v3859_v21  ;;  %v3811_v56 = vld [vmem:[%s8994_s15 + $0x260] sm:$0xff]  ;;  %v6984_v21 = vpack.c.bf16 %v3830_v7, %v3829_v38  ;;  %v2629_v7 = vadd.f32 %v9179_v37, %v9330_v60 }
 0x3c0   : > { %10416 = vst [vmem:[#allocation17_spill] sm:$0xff] %v9408_v26  ;;  %7022 = vmatprep.subr.msk.bf16.mxu1 %vm9014_vm5, %v7020_v0  ;;  %v3812_v0 = vld [vmem:[%s8994_s15 + $0x268] sm:$0xff]  ;;  %v3843_v61 = vld [vmem:[%s8994_s15 + $0x360] sm:$0xff] }
 0x3c1   : > { %v6981_v36 = vpack.c.bf16 %v3812_v0, %v3811_v56  ;;  %v7029_v6 = vpack.c.bf16 %v3844_v14, %v3843_v61  ;;  %v3846_v56 = vld [vmem:[%s8994_s15 + $0x378] sm:$0xff] }
 0x3c5   : > { %6977 = vmatpush3.bf16.xpose.msk.msra.mxu0 %vm9014_vm5, %v6975_v18  ;;  %v3862_v18 = vld [vmem:[%s8994_s15 + $0x3f8] sm:$0xff] }
 0x3c6   : > { %6980 = vmatprep.subr.msk.bf16.mxu0 %vm9014_vm5, %v6978_v4  ;;  %v7032_v4 = vpack.c.bf16 %v3862_v18, %v3861_v22 }
 0x3c7   : > { %7025 = vmatpush3.bf16.xpose.msk.msra.mxu1 %vm9014_vm5, %v7023_v35  ;;  %v3813_v35 = vld [vmem:[%s8994_s15 + $0x270] sm:$0xff] }
 0x3c8   : > { %7028 = vmatprep.subr.msk.bf16.mxu1 %vm9014_vm5, %v7026_v41  ;;  %v3845_v41 = vld [vmem:[%s8994_s15 + $0x370] sm:$0xff]  ;;  %v6987_v0 = vpack.c.bf16 %v3814_v53, %v3813_v35 }
 0x3c9   : > { %v7035_v38 = vpack.c.bf16 %v3846_v56, %v3845_v41 }
 0x3cd   : > { %6983 = vmatpush3.bf16.xpose.msk.msra.mxu0 %vm9014_vm5, %v6981_v36 }
 0x3ce   : > { %6986 = vmatprep.subr.msk.bf16.mxu0 %vm9014_vm5, %v6984_v21 }
 0x3cf   : > { %7031 = vmatpush3.bf16.xpose.msk.msra.mxu1 %vm9014_vm5, %v7029_v6 }
 0x3d0   : > { %7034 = vmatprep.subr.msk.bf16.mxu1 %vm9014_vm5, %v7032_v4 }
 0x3d5   : > { %6989 = vmatpush3.bf16.xpose.msk.msra.mxu0 %vm9014_vm5, %v6987_v0 }
 0x3d7   : > { %7037 = vmatpush3.bf16.xpose.msk.msra.mxu1 %vm9014_vm5, %v7035_v38 }
 0x3dc   : > { %6319 = vmatmul.mubr.msk.f32.vlgmr.msra.gmra.mrb[68].mxu0 %vm3863_vm4, %v9081_v12 }
 0x3dd   : > { %6320 = vmatprep.mubr.msk.f32.mxu0 %vm3863_vm4, %v9228_v33 }
 0x3de   : > { %6359 = vmatmul.mubr.msk.f32.vlgmr.msra.gmra.mrb[68].mxu1 %vm3863_vm4, %v9081_v12  ;;  %v2540_v12 = vadd.f32 %v9191_v48, %v9359_v57  ;;  %v2631_v48 = vadd.f32 %v9187_v2, %v9330_v60 }
 0x3df   : > { %6360 = vmatprep.mubr.msk.f32.mxu1 %vm3863_vm4, %v9228_v33 }
 0x3e0   : > { %6321 = vmatmul.mubr.msk.f32.gmra.mrb[70].mxu0 %vm3863_vm4, %v9228_v33 }
 0x3e1   : > { %6322 = vmatprep.mubr.msk.f32.mxu0 %vm3863_vm4, %v9249_v55 }
 0x3e2   : > { %6361 = vmatmul.mubr.msk.f32.gmra.mrb[70].mxu1 %vm3863_vm4, %v9228_v33  ;;  %v2536_v33 = vadd.f32 %v9175_v5, %v9330_v60  ;;  %v2637_v5 = vadd.f32 %v9197_v28, %v9359_v57 }
 0x3e3   : > { %6362 = vmatprep.mubr.msk.f32.mxu1 %vm3863_vm4, %v9249_v55 }
 0x3e4   : > { %6323 = vmatmul.mubr.msk.f32.gmra.mrb[72].mxu0 %vm3863_vm4, %v9249_v55 }
 0x3e5   : > { %6324 = vmatprep.mubr.msk.f32.mxu0 %vm3863_vm4, %v9282_v27 }
 0x3e6   : > { %6363 = vmatmul.mubr.msk.f32.gmra.mrb[72].mxu1 %vm3863_vm4, %v9249_v55  ;;  %v2542_v55 = vadd.f32 %v9193_v24, %v9359_v57 }
 0x3e7   : > { %6364 = vmatprep.mubr.msk.f32.mxu1 %vm3863_vm4, %v9282_v27 }
 0x3e8   : > { %6325 = vmatmul.mubr.msk.f32.gmra.mrb[74].mxu0 %vm3863_vm4, %v9282_v27 }
 0x3e9   : > { %4937 = vmatprep.mubr.f32.mxu0 %v10399_v46 }
 0x3ea   : > { %6365 = vmatmul.mubr.msk.f32.gmra.mrb[74].mxu1 %vm3863_vm4, %v9282_v27  ;;  %v2635_v27 = vadd.f32 %v9195_v16, %v9359_v57 }
 0x3eb   : > { %5026 = vmatprep.mubr.f32.mxu1 %v10399_v46 }
 0x3ef   : > { %v3441_v53 = vpop.f32.mrb[44].mxu0 }
 0x3f0   : > { %v9498_v61 = vmul.f32 %v3441_v53, %v2534_v8  ;;  %v9500_v14 = vmul.f32 %v3441_v53, %v2540_v12  ;;  %v3443_v11 = vpop.f32.mrb[45].mxu0  ;;  %v2724_v53 = vadd.f32 %v9316_v19, %v9330_v60 }
 0x3f1   : > { %v3530_v36 = vpop.f32.mrb[44].mxu1  ;;  %v9506_v24 = vmul.f32 %v3443_v11, %v2536_v33  ;;  %v9508_v22 = vmul.f32 %v3443_v11, %v2542_v55  ;;  %v2732_v11 = vadd.f32 %v9340_v30, %v9359_v57 }
 0x3f2   : > { %v9510_v37 = vmul.f32 %v3530_v36, %v2629_v7  ;;  %v9512_v18 = vmul.f32 %v3530_v36, %v2635_v27  ;;  %v3532_v16 = vpop.f32.mrb[45].mxu1  ;;  %v2730_v7 = vadd.f32 %v9332_v43, %v9359_v57  ;;  %v2726_v27 = vadd.f32 %v9318_v39, %v9330_v60 }
 0x3f3   : > { %v9514_v21 = vmul.f32 %v3532_v16, %v2631_v48  ;;  %v9516_v6 = vmul.f32 %v3532_v16, %v2637_v5  ;;  %v9518_v4 = vpop.f32.mrb[46].mxu0  ;;  %v2819_v5 = vadd.f32 %v9324_v42, %v9330_v60  ;;  %v2825_v36 = vadd.f32 %v9344_v17, %v9359_v57 }
 0x3f4   : > { %v9520_v2 = vpop.f32.mrb[47].mxu0  ;;  %v2821_v43 = vadd.f32 %v9328_v3, %v9330_v60  ;;  %v2827_v39 = vadd.f32 %v9350_v23, %v9359_v57 }
 0x3f5   : > { %v9522_v35 = vpop.f32.mrb[46].mxu1 }
 0x3f6   : > { %v9524_v28 = vpop.f32.mrb[47].mxu1 }
 0x3f7   : > { %v9526_v41 = vpop.f32.mrb[48].mxu0 }
 0x3f8   : > { %v9528_v56 = vpop.f32.mrb[49].mxu0 }
 0x3f9   : > { %v9530_v0 = vpop.f32.mrb[48].mxu1 }
 0x3fa   : > { %v9532_v38 = vpop.f32.mrb[49].mxu1 }
 0x3fb   : > { %v9534_v8 = vpop.f32.mrb[50].mxu0 }
 0x3fc   : > { %v9536_v12 = vpop.f32.mrb[51].mxu0 }
 0x3fd   : > { %v9538_v33 = vpop.f32.mrb[50].mxu1 }
 0x3fe   : > { %v9540_v55 = vpop.f32.mrb[51].mxu1 }
 0x42f   : > { %v3619_v48 = vpop.f32.mrb[52].mxu0 }
 0x430   : > { %v9554_v16 = vmul.f32 %v3619_v48, %v2724_v53  ;;  %v9556_v58 = vmul.f32 %v3619_v48, %v2730_v7  ;;  %v3621_v19 = vpop.f32.mrb[53].mxu0 }
 0x431   : > { %v3708_v26 = vpop.f32.mrb[52].mxu1  ;;  %v9562_v30 = vmul.f32 %v3621_v19, %v2726_v27  ;;  %v9564_v47 = vmul.f32 %v3621_v19, %v2732_v11 }
 0x432   : > { %10417 = vst [vmem:[#allocation18_spill] sm:$0xff] %v9554_v16  ;;  %10418 = vst [vmem:[#allocation19_spill] sm:$0xff] %v9556_v58  ;;  %v9566_v42 = vmul.f32 %v3708_v26, %v2819_v5  ;;  %v9568_v20 = vmul.f32 %v3708_v26, %v2825_v36  ;;  %v3710_v17 = vpop.f32.mrb[53].mxu1 }
 0x433   : > { %10419 = vst [vmem:[#allocation20_spill] sm:$0xff] %v9562_v30  ;;  %10420 = vst [vmem:[#allocation21_spill] sm:$0xff] %v9564_v47  ;;  %v9570_v53 = vmul.f32 %v3710_v17, %v2821_v43  ;;  %v9572_v7 = vmul.f32 %v3710_v17, %v2827_v39  ;;  %v9574_v48 = vpop.f32.mrb[54].mxu0  ;;  %v2552_v39 = vadd.f32 %v9223_v52, %v9322_v40 }
 0x434   : > { %10421 = vst [vmem:[#allocation22_spill] sm:$0xff] %v9566_v42  ;;  %10422 = vst [vmem:[#allocation23_spill] sm:$0xff] %v9568_v20  ;;  %v9576_v3 = vpop.f32.mrb[55].mxu0  ;;  %v2554_v17 = vadd.f32 %v9230_v54, %v9322_v40  ;;  %v2655_v52 = vadd.f32 %v9271_v34, %v9394_v50  ;;  %v2546_v54 = vadd.f32 %v9201_v32, %v9354_v9 }
 0x435   : > { %10423 = vst [vmem:[#allocation24_spill] sm:$0xff] %v9570_v53  ;;  %10424 = vst [vmem:[#allocation25_spill] sm:$0xff] %v9572_v7  ;;  %v9578_v60 = vpop.f32.mrb[54].mxu1  ;;  %v2647_v7 = vadd.f32 %v9232_v1, %v9322_v40  ;;  %v2548_v1 = vadd.f32 %v9207_v25, %v9354_v9 }
 0x436   : > { %10425 = vst [vmem:[#allocation26_spill] sm:$0xff] %v9574_v48  ;;  %10426 = vst [vmem:[#allocation27_spill] sm:$0xff] %v9576_v3  ;;  %v9580_v23 = vpop.f32.mrb[55].mxu1 }
 0x437   : > { %10427 = vst [vmem:[#allocation28_spill] sm:$0xff] %v9578_v60  ;;  %10428 = vst [vmem:[#allocation29_spill] sm:$0xff] %v9580_v23  ;;  %v9582_v57 = vpop.f32.mrb[56].mxu0  ;;  %v2558_v23 = vadd.f32 %v9242_v13, %v9394_v50  ;;  %v2641_v13 = vadd.f32 %v9211_v31, %v9354_v9  ;;  %v9639_v31 = vmul.f32 0.70710677, %v2655_v52 }
 0x438   : > { %10429 = vst [vmem:[#allocation30_spill] sm:$0xff] %v9582_v57  ;;  %v9584_v27 = vpop.f32.mrb[57].mxu0 }
 0x439   : > { %10430 = vst [vmem:[#allocation31_spill] sm:$0xff] %v9584_v27  ;;  %v9586_v11 = vpop.f32.mrb[56].mxu1  ;;  %v2560_v27 = vadd.f32 %v9255_v63, %v9394_v50  ;;  %v2643_v63 = vadd.f32 %v9219_v29, %v9354_v9 }
 0x43a   : > { %10431 = vst [vmem:[#allocation32_spill] sm:$0xff] %v9586_v11  ;;  %v9588_v26 = vpop.f32.mrb[57].mxu1 }
 0x43b   : > { %10432 = vst [vmem:[#allocation33_spill] sm:$0xff] %v9588_v26  ;;  %v9590_v5 = vpop.f32.mrb[58].mxu0  ;;  %v2649_v26 = vadd.f32 %v9236_v44, %v9322_v40  ;;  %v9620_v44 = vmul.f32 0.57735026, %v2554_v17  ;;  %v9632_v32 = vmul.f32 0.70710677, %v2560_v27 }
 0x43c   : > { %10433 = vst [vmem:[#allocation34_spill] sm:$0xff] %v9590_v5  ;;  %v9592_v36 = vpop.f32.mrb[59].mxu0 }
 0x43d   : > { %10434 = vst [vmem:[#allocation35_spill] sm:$0xff] %v9592_v36  ;;  %v9594_v19 = vpop.f32.mrb[58].mxu1  ;;  %v9618_v36 = vmul.f32 0.57735026, %v2552_v39  ;;  %v9628_v47 = vmul.f32 0.57735026, %v2649_v26 }
 0x43e   : > { %10435 = vst [vmem:[#allocation36_spill] sm:$0xff] %v9594_v19  ;;  %v9596_v43 = vpop.f32.mrb[59].mxu1 }
 0x43f   : > { %10436 = vst [vmem:[#allocation37_spill] sm:$0xff] %v9596_v43  ;;  %v2653_v43 = vadd.f32 %v9261_v15, %v9394_v50  ;;  %v9626_v15 = vmul.f32 0.57735026, %v2647_v7  ;;  %v9630_v50 = vmul.f32 0.70710677, %v2558_v23 }
 0x441   : > { %10437 = vst [vmem:[#allocation38_spill] sm:$0xff] %v9630_v50  ;;  %v9637_v20 = vmul.f32 0.70710677, %v2653_v43 }
 0x443   : > { %10438 = vst [vmem:[#allocation39_spill] sm:$0xff] %v9637_v20 }
 0x46f   : > { %v4326_v34 = vpop.f32.mrb[60].mxu0 }
 0x470   : > { %v9635_v25 = vmul.f32 %v9498_v61, %v4326_v34  ;;  %v4720_v39 = vmul.f32 %v4326_v34, %v2546_v54  ;;  %v4328_v17 = vpop.f32.mrb[61].mxu0 }
 0x471   : > { %v4415_v19 = vpop.f32.mrb[60].mxu1  ;;  %v9642_v29 = vmul.f32 %v9506_v24, %v4328_v17  ;;  %v9644_v9 = vmul.f32 %v4328_v17, %v2548_v1 }
 0x472   : > { %v9647_v7 = vmul.f32 %v4720_v39, %v9518_v4  ;;  %v9650_v23 = vmul.f32 %v4720_v39, %v9526_v41  ;;  %v9653_v61 = vmul.f32 %v4720_v39, %v9534_v8  ;;  %v9656_v27 = vmul.f32 %v9510_v37, %v4415_v19  ;;  %v4417_v26 = vpop.f32.mrb[61].mxu1 }
 0x473   : > { %10439 = vst [vmem:[#allocation40_spill] sm:$0xff] %v9644_v9  ;;  %v4722_v43 = vmul.f32 %v4415_v19, %v2641_v13  ;;  %v9659_v52 = vmul.f32 %v9514_v21, %v4417_v26  ;;  %v9661_v24 = vmul.f32 %v4417_v26, %v2643_v63  ;;  %v4332_v54 = vpop.f32.mrb[62].mxu0  ;;  %v9665_v1 = vmul.f32 %v9644_v9, %v9520_v2 }
 0x474   : > { %10440 = vst [vmem:[#allocation41_spill] sm:$0xff] %v9650_v23  ;;  %10441 = vst [vmem:[#allocation42_spill] sm:$0xff] %v9653_v61  ;;  %v4640_v34 = vmul.f32 %v4332_v54, %v9518_v4  ;;  %v9669_v39 = vmul.f32 %v9500_v14, %v4332_v54  ;;  %v9672_v37 = vmul.f32 %v4332_v54, %v9534_v8  ;;  %v4334_v21 = vpop.f32.mrb[63].mxu0 }
 0x475   : > { %v9675_v19 = vmul.f32 %v4332_v54, %v9526_v41  ;;  %v9678_v13 = vmul.f32 %v4722_v43, %v9522_v35  ;;  %v9681_v63 = vmul.f32 %v4722_v43, %v9530_v0  ;;  %v9684_v17 = vmul.f32 %v4722_v43, %v9538_v33  ;;  %v4421_v26 = vpop.f32.mrb[62].mxu1 }
 0x476   : > { %v4641_v11 = vmul.f32 %v4334_v21, %v9520_v2  ;;  %v4642_v60 = vmul.f32 %v4421_v26, %v9522_v35  ;;  %v9689_v58 = vmul.f32 %v9512_v18, %v4421_v26  ;;  %v9692_v54 = vmul.f32 %v4421_v26, %v9538_v33  ;;  %v4423_v53 = vpop.f32.mrb[63].mxu1 }
 0x477   : > { %10442 = vst [vmem:[#allocation43_spill] sm:$0xff] %v9675_v19  ;;  %10443 = vst [vmem:[#allocation44_spill] sm:$0xff] %v9681_v63  ;;  %v9695_v3 = vmul.f32 %v4421_v26, %v9530_v0  ;;  %v9698_v42 = vmul.f32 %v9508_v22, %v4334_v21  ;;  %v9701_v43 = vmul.f32 %v4334_v21, %v9536_v12  ;;  %v4338_v48 = vpop.f32.mrb[64].mxu0 }
 0x478   : > { %10444 = vst [vmem:[#allocation45_spill] sm:$0xff] %v9684_v17  ;;  %v9704_v5 = vmul.f32 %v4334_v21, %v9528_v56  ;;  %v4643_v57 = vmul.f32 %v4423_v53, %v9524_v28  ;;  %v9708_v30 = vmul.f32 %v9516_v6, %v4423_v53  ;;  %v9711_v16 = vmul.f32 %v4423_v53, %v9540_v55  ;;  %v4340_v45 = vpop.f32.mrb[65].mxu0 }
 0x479   : > { %10445 = vst [vmem:[#allocation46_spill] sm:$0xff] %v9695_v3  ;;  %v9714_v26 = vmul.f32 %v4423_v53, %v9532_v38  ;;  %v4648_v49 = vmul.f32 %v4338_v48, %v9526_v41  ;;  %v9718_v59 = vmul.f32 %v9500_v14, %v4338_v48  ;;  %v9721_v21 = vmul.f32 %v4338_v48, %v9534_v8  ;;  %v4427_v51 = vpop.f32.mrb[64].mxu1 }
 0x47a   : > { %10446 = vst [vmem:[#allocation47_spill] sm:$0xff] %v9708_v30  ;;  %v9724_v62 = vmul.f32 %v4338_v48, %v9518_v4  ;;  %v4649_v10 = vmul.f32 %v4340_v45, %v9528_v56  ;;  %v4650_v46 = vmul.f32 %v4427_v51, %v9530_v0  ;;  %v9729_v53 = vmul.f32 %v9512_v18, %v4427_v51  ;;  %v4429_v23 = vpop.f32.mrb[65].mxu1 }
 0x47b   : > { %10447 = vst [vmem:[#allocation48_spill] sm:$0xff] %v9718_v59  ;;  %v4656_v40 = vadd.f32 %v4648_v49, %v4640_v34  ;;  %v9732_v63 = vmul.f32 %v4427_v51, %v9538_v33  ;;  %v9737_v61 = vmul.f32 %v4427_v51, %v9522_v35  ;;  %v9740_v59 = vmul.f32 %v9508_v22, %v4340_v45  ;;  %v4344_v49 = vpop.f32.mrb[66].mxu0 }
 0x47c   : > { %10448 = vst [vmem:[#allocation49_spill] sm:$0xff] %v9724_v62  ;;  %10449 = vst [vmem:[#allocation50_spill] sm:$0xff] %v9729_v53  ;;  %v4657_v48 = vadd.f32 %v4649_v10, %v4641_v11  ;;  %v4658_v34 = vadd.f32 %v4650_v46, %v4642_v60  ;;  %v4769_v9 = vmul.f32 %v4340_v45, %v9536_v12  ;;  %v4346_v50 = vpop.f32.mrb[67].mxu0 }
 0x47d   : > { %10450 = vst [vmem:[#allocation51_spill] sm:$0xff] %v9737_v61  ;;  %10451 = vst [vmem:[#allocation52_spill] sm:$0xff] %v9740_v59  ;;  %v9744_v53 = vmul.f32 %v4340_v45, %v9520_v2  ;;  %v4651_v20 = vmul.f32 %v4429_v23, %v9532_v38  ;;  %v9750_v51 = vmul.f32 %v9516_v6, %v4429_v23  ;;  %v4433_v46 = vpop.f32.mrb[66].mxu1 }
 0x47e   : > { %v4771_v10 = vmul.f32 %v4429_v23, %v9540_v55  ;;  %v9754_v11 = vmul.f32 %v4429_v23, %v9524_v28  ;;  %v4664_v19 = vmul.f32 %v4344_v49, %v9534_v8  ;;  %v9760_v62 = vmul.f32 %v9500_v14, %v4344_v49  ;;  %v4435_v59 = vpop.f32.mrb[67].mxu1 }
 0x47f   : > { %10452 = vst [vmem:[#allocation53_spill] sm:$0xff] %v9750_v51  ;;  %v4659_v45 = vadd.f32 %v4651_v20, %v4643_v57  ;;  %v4760_v3 = vmul.f32 %v4344_v49, %v9526_v41  ;;  %v4800_v61 = vmul.f32 %v4344_v49, %v9518_v4  ;;  %v4666_v23 = vmul.f32 %v4433_v46, %v9538_v33  ;;  %v10455_v49 = vld [vmem:[#allocation39_spill] sm:$0xff] }
 0x480   : > { %v4672_v51 = vadd.f32 %v4664_v19, %v4656_v40  ;;  %v9768_v30 = vmul.f32 %v9512_v18, %v4433_v46  ;;  %v4762_v20 = vmul.f32 %v4433_v46, %v9530_v0  ;;  %v4802_v8 = vmul.f32 %v4433_v46, %v9522_v35 }
 0x481   : > { %v4776_v14 = vsub.f32 %v4760_v3, %v9721_v21  ;;  %v4808_v57 = vsub.f32 %v9672_v37, %v4800_v61  ;;  %v4674_v60 = vadd.f32 %v4666_v23, %v4658_v34  ;;  %v4665_v17 = vmul.f32 %v4346_v50, %v9536_v12 }
 0x482   : > { %v4778_v41 = vsub.f32 %v4762_v20, %v9732_v63  ;;  %v4810_v4 = vsub.f32 %v9692_v54, %v4802_v8  ;;  %v9778_v40 = vmul.f32 %v9508_v22, %v4346_v50  ;;  %v4761_v18 = vmul.f32 %v4346_v50, %v9528_v56  ;;  %v10459_v46 = vld [vmem:[#allocation48_spill] sm:$0xff] }
 0x483   : > { %v4673_v33 = vadd.f32 %v4665_v17, %v4657_v48  ;;  %v4801_v0 = vmul.f32 %v4346_v50, %v9520_v2  ;;  %v4667_v35 = vmul.f32 %v4435_v59, %v9540_v55  ;;  %v9784_v3 = vmul.f32 %v9516_v6, %v4435_v59 }
 0x484   : > { %v4777_v61 = vsub.f32 %v4761_v18, %v4769_v9  ;;  %v4763_v37 = vmul.f32 %v4435_v59, %v9532_v38  ;;  %v4803_v19 = vmul.f32 %v4435_v59, %v9524_v28  ;;  %v4680_v63 = vmul.f32 %v4672_v51, %v9618_v36 }
 0x485   : > { %v4809_v22 = vsub.f32 %v9701_v43, %v4801_v0  ;;  %v4675_v54 = vadd.f32 %v4667_v35, %v4659_v45  ;;  %v4681_v21 = vmul.f32 %v4673_v33, %v9620_v44  ;;  %v4682_v17 = vmul.f32 %v4674_v60, %v9626_v15  ;;  %v10460_v60 = vld [vmem:[#allocation50_spill] sm:$0xff] }
 0x486   : > { %v4779_v2 = vsub.f32 %v4763_v37, %v4771_v10  ;;  %v4811_v50 = vsub.f32 %v9711_v16, %v4803_v19  ;;  %v7040_v6 = vpack.c.bf16 %v4680_v63, %v9635_v25  ;;  %v7042_v9 = vpack.c.bf16 %v9665_v1, %v9698_v42  ;;  %v10454_v1 = vld [vmem:[#allocation38_spill] sm:$0xff]  ;;  %v10463_v37 = vld [vmem:[#allocation41_spill] sm:$0xff] }
 0x487   : > { %v7038_v48 = vpack.c.bf16 %v4681_v21, %v9642_v29  ;;  %v4683_v59 = vmul.f32 %v4675_v54, %v9628_v47  ;;  %v7064_v36 = vpack.c.bf16 %v4682_v17, %v9656_v27  ;;  %v4731_v43 = vmul.f32 %v9661_v24, %v9524_v28  ;;  %v10453_v29 = vld [vmem:[#allocation47_spill] sm:$0xff]  ;;  %v10456_v28 = vld [vmem:[#allocation52_spill] sm:$0xff]  ;;  %v10461_v33 = vld [vmem:[#allocation42_spill] sm:$0xff] }
 0x488   : > { %v7044_v44 = vpack.c.bf16 %v9647_v7, %v9669_v39  ;;  %v7068_v16 = vpack.c.bf16 %v9678_v13, %v9689_v58  ;;  %v4785_v15 = vmul.f32 %v4777_v61, %v9632_v32  ;;  %v4787_v25 = vmul.f32 %v4779_v2, %v9639_v31  ;;  %v10457_v7 = vld [vmem:[#allocation53_spill] sm:$0xff]  ;;  %v10458_v58 = vld [vmem:[#allocation40_spill] sm:$0xff]  ;;  %v10468_v54 = vld [vmem:[#allocation43_spill] sm:$0xff] }
 0x489   : > { %7039 = vmatprep.subr.bf16.mxu0 %v7038_v48  ;;  %v7062_v42 = vpack.c.bf16 %v4683_v59, %v9659_v52  ;;  %v7066_v47 = vpack.c.bf16 %v4731_v43, %v10453_v29  ;;  %v4784_v27 = vmul.f32 %v4776_v14, %v10454_v1  ;;  %v4786_v34 = vmul.f32 %v4778_v41, %v10455_v49  ;;  %v10470_v2 = vld [vmem:[#allocation51_spill] sm:$0xff]  ;;  %v10477_v59 = vld [vmem:[#allocation6_spill] sm:$0xff]  ;;  %v10482_v29 = vld [vmem:[#allocation13_spill] sm:$0xff] }
 0x48a   : > { %7041 = vmatpush1.bf16.msra.mxu0 %v7040_v6  ;;  %v7046_v51 = vpack.c.bf16 %v10456_v28, %v4785_v15  ;;  %v7070_v39 = vpack.c.bf16 %v10457_v7, %v4787_v25  ;;  %v4737_v13 = vmul.f32 %v10458_v58, %v9528_v56  ;;  %v4817_v10 = vmul.f32 %v4809_v22, %v9632_v32  ;;  %v10467_v22 = vld [vmem:[#allocation49_spill] sm:$0xff]  ;;  %v9877_v48 = vld [vmem:[%s10269_s10 + $0x10] sm:$0xff]  ;;  %v9892_v15 = vld [vmem:[%s10269_s10 + $0x18] sm:$0xff] }
 0x48b   : > { %7063 = vmatprep.subr.bf16.mxu1 %v7062_v42  ;;  %7043 = vmatprep.subr.bf16.mxu0 %v7042_v9  ;;  %v7048_v52 = vpack.c.bf16 %v10459_v46, %v4784_v27  ;;  %v7072_v45 = vpack.c.bf16 %v10460_v60, %v4786_v34  ;;  %v4739_v23 = vmul.f32 %v9661_v24, %v9532_v38  ;;  %v10462_v38 = vld [vmem:[#allocation45_spill] sm:$0xff]  ;;  %v10474_v6 = vmov 0.0   ;;  %v9866_v9 = vld [vmem:[%s10269_s10 + $0x8] sm:$0xff]  ;;  %v10481_v25 = vld [vmem:[#allocation11_spill] sm:$0xff] }
 0x48c   : > { %7065 = vmatpush1.bf16.msra.mxu1 %v7064_v36  ;;  %v7050_v20 = vpack.c.bf16 %v4817_v10, %v4737_v13  ;;  %v4819_v8 = vmul.f32 %v4811_v50, %v9639_v31  ;;  %v4816_v14 = vmul.f32 %v4808_v57, %v10454_v1  ;;  %v4818_v41 = vmul.f32 %v4810_v4, %v10455_v49  ;;  %v10464_v57 = vld [vmem:[#allocation44_spill] sm:$0xff]  ;;  %v9858_v50 = vld [vmem:[%s10269_s10] sm:$0xff]  ;;  %v10478_v36 = vld [vmem:[#allocation10_spill] sm:$0xff] }
 0x48d   : > { %7067 = vmatprep.subr.bf16.mxu1 %v7066_v47  ;;  %v4745_v56 = vmul.f32 %v10458_v58, %v9536_v12  ;;  %v4747_v18 = vmul.f32 %v9661_v24, %v9540_v55  ;;  %v7056_v0 = vpack.c.bf16 %v10461_v33, %v9760_v62  ;;  %v7080_v35 = vpack.c.bf16 %v10462_v38, %v9768_v30  ;;  %v10486_v13 = vld [vmem:[#allocation18_spill] sm:$0xff]  ;;  %v10487_v46 = vld [vmem:[#allocation9_spill] sm:$0xff] }
 0x48e   : > { %7045 = vmatpush1.bf16.msra.mxu0 %v7044_v44  ;;  %v7074_v61 = vpack.c.bf16 %v4819_v8, %v4739_v23  ;;  %v7052_v19 = vpack.c.bf16 %v4816_v14, %v10463_v37  ;;  %v7076_v63 = vpack.c.bf16 %v4818_v41, %v10464_v57  ;;  %v10465_v4 = vsub.f32 %v9744_v53, %v9704_v5  ;;  %v10471_v5 = vld [vmem:[#allocation46_spill] sm:$0xff]  ;;  %v10479_v44 = vld [vmem:[#allocation8_spill] sm:$0xff] }
 0x48f   : > { %7047 = vmatprep.subr.bf16.mxu0 %v7046_v51  ;;  %v7054_v55 = vpack.c.bf16 %v4745_v56, %v9778_v40  ;;  %v7078_v24 = vpack.c.bf16 %v4747_v18, %v9784_v3  ;;  %v10466_v62 = vsub.f32 %v9754_v11, %v9714_v26  ;;  %v10469_v21 = vsub.f32 %v10467_v22, %v10468_v54  ;;  %v10483_v51 = vld [vmem:[#allocation14_spill] sm:$0xff]  ;;  %v10491_v41 = vld [vmem:[#allocation20_spill] sm:$0xff] }
 0x490   : > { %v4849_v12 = vmul.f32 %v10465_v4, %v9632_v32  ;;  %7069 = vmatpush1.bf16.msra.mxu1 %v7068_v16  ;;  %v10472_v32 = vsub.f32 %v10470_v2, %v10471_v5  ;;  %10473 = vst [vmem:[#allocation47_spill] sm:$0xff] %v9858_v50  ;;  %10475 = vst [vmem:[#allocation38_spill] sm:$0xff] %v9866_v9  ;;  %v2742_v43 = vadd.f32 %v10478_v36, %v10477_v59  ;;  %v10492_v18 = vld [vmem:[#allocation12_spill] sm:$0xff]  ;;  %v10497_v37 = vld [vmem:[#allocation34_spill] sm:$0xff] }
 0x491   : > { %v4851_v30 = vmul.f32 %v10466_v62, %v9639_v31  ;;  %v4848_v17 = vmul.f32 %v10469_v21, %v10454_v1  ;;  %7071 = vmatprep.subr.bf16.mxu1 %v7070_v39  ;;  %v10316_v31 = vmov 1.0   ;;  %10476 = vst [vmem:[#allocation39_spill] sm:$0xff] %v9877_v48  ;;  %v2744_v16 = vadd.f32 %v10479_v44, %v10477_v59  ;;  %10480 = vst [vmem:[#allocation52_spill] sm:$0xff] %v9892_v15  ;;  %v10485_v39 = vld [vmem:[#allocation15_spill] sm:$0xff]  ;;  %v10499_v57 = vld [vmem:[#allocation22_spill] sm:$0xff] }
 0x492   : > { %v4850_v53 = vmul.f32 %v10472_v32, %v10455_v49  ;;  %7049 = vmatpush1.bf16.msra.mxu0 %v7048_v52  ;;  %v7058_v26 = vpack.c.bf16 %v10316_v31, %v4849_v12  ;;  %v2837_v42 = vadd.f32 %v10481_v25, %v10477_v59  ;;  %v2839_v47 = vadd.f32 %v10482_v29, %v10477_v59  ;;  %v10500_v12 = vld [vmem:[#allocation5_spill] sm:$0xff]  ;;  %v10503_v21 = vld [vmem:[#allocation27_spill] sm:$0xff]  ;;  %v10507_v59 = vld [vmem:[#allocation32_spill] sm:$0xff] }
 0x493   : > { %7051 = vmatprep.subr.bf16.mxu0 %v7050_v20  ;;  %v7082_v11 = vpack.c.bf16 %v10316_v31, %v4851_v30  ;;  %v7060_v40 = vpack.c.bf16 %v10316_v31, %v4848_v17  ;;  %v9903_v1 = vmul.f32 0.57735026, %v2742_v43  ;;  %v9905_v27 = vmul.f32 0.57735026, %v2744_v16  ;;  %v10490_v20 = vld [vmem:[#allocation17_spill] sm:$0xff]  ;;  %v10502_v30 = vld [vmem:[#allocation7_spill] sm:$0xff] }
 0x494   : > { %7073 = vmatpush1.bf16.msra.mxu1 %v7072_v45  ;;  %v7084_v3 = vpack.c.bf16 %v10316_v31, %v4850_v53  ;;  %v9908_v49 = vmul.f32 0.57735026, %v2837_v42  ;;  %v9910_v34 = vmul.f32 0.57735026, %v2839_v47  ;;  %v9915_v7 = vmul.f32 0.70710677, %v10483_v51 }
 0x495   : > { %7075 = vmatprep.subr.bf16.mxu1 %v7074_v61  ;;  %v9918_v58 = vmul.f32 0.70710677, %v10485_v39  ;;  %v10488_v45 = vld [vmem:[#allocation16_spill] sm:$0xff]  ;;  %v9929_v8 = vmul.f32 0.70710677, %v10490_v20  ;;  %v10504_v5 = vld [vmem:[#allocation19_spill] sm:$0xff] }
 0x496   : > { %7053 = vmatpush1.bf16.msra.mxu0 %v7052_v19  ;;  %10484 = vst [vmem:[#allocation53_spill] sm:$0xff] %v9915_v7  ;;  %v9926_v23 = vmul.f32 0.70710677, %v10488_v45  ;;  %v10509_v43 = vld [vmem:[#allocation36_spill] sm:$0xff]  ;;  %v10511_v29 = vld [vmem:[#allocation23_spill] sm:$0xff] }
 0x497   : > { %7055 = vmatprep.subr.bf16.mxu0 %v7054_v55  ;;  %v10515_v45 = vld [vmem:[#allocation31_spill] sm:$0xff] }
 0x498   : > { %7077 = vmatpush1.bf16.msra.mxu1 %v7076_v63  ;;  %10489 = vst [vmem:[#allocation40_spill] sm:$0xff] %v9926_v23 }
 0x499   : > { %7079 = vmatprep.subr.bf16.mxu1 %v7078_v24  ;;  %v10501_v24 = vld [vmem:[#allocation24_spill] sm:$0xff] }
 0x49a   : > { %7057 = vmatpush1.bf16.msra.mxu0 %v7056_v0  ;;  %v10494_v0 = vld [vmem:[#allocation26_spill] sm:$0xff] }
 0x49b   : > { %7059 = vmatprep.subr.bf16.mxu0 %v7058_v26 }
 0x49c   : > { %7081 = vmatpush1.bf16.msra.mxu1 %v7080_v35  ;;  %v10495_v35 = vld [vmem:[#allocation30_spill] sm:$0xff] }
 0x49d   : > { %7083 = vmatprep.subr.bf16.mxu1 %v7082_v11 }
 0x49e   : > { %7061 = vmatpush1.bf16.msra.mxu0 %v7060_v40  ;;  %v10506_v40 = vld [vmem:[#allocation28_spill] sm:$0xff] }
 0x4a0   : > { %7085 = vmatpush1.bf16.msra.mxu1 %v7084_v3 }
 0x4a1   : > { %5864 = vmatmul.mubr.msk.f32.vlgmr.msra.gmra.mrb[76].mxu0 %vm4860_vm6, %v9858_v50 }
 0x4a2   : > { %4943 = vmatprep.mubr.f32.mxu0 %v10474_v6 }
 0x4a3   : > { %5868 = vmatmul.mubr.msk.f32.vlgmr.msra.gmra.mrb[76].mxu1 %vm4860_vm6, %v9858_v50 }
 0x4a4   : > { %5032 = vmatprep.mubr.f32.mxu1 %v10474_v6 }
 0x4a5   : > { %5865 = vmatmul.mubr.msk.f32.gmra.mrb[78].mxu0 %vm4860_vm6, %v9866_v9 }
 0x4a6   : > { %4949 = vmatprep.mubr.f32.mxu0 %v10474_v6 }
 0x4a7   : > { %5869 = vmatmul.mubr.msk.f32.gmra.mrb[78].mxu1 %vm4860_vm6, %v9866_v9 }
 0x4a8   : > { %5038 = vmatprep.mubr.f32.mxu1 %v10474_v6 }
 0x4a9   : > { %5866 = vmatmul.mubr.msk.f32.gmra.mrb[80].mxu0 %vm4860_vm6, %v9877_v48 }
 0x4aa   : > { %4955 = vmatprep.mubr.f32.mxu0 %v10474_v6 }
 0x4ab   : > { %5870 = vmatmul.mubr.msk.f32.gmra.mrb[80].mxu1 %vm4860_vm6, %v9877_v48 }
 0x4ac   : > { %5044 = vmatprep.mubr.f32.mxu1 %v10474_v6 }
 0x4ad   : > { %5867 = vmatmul.mubr.msk.f32.gmra.mrb[82].mxu0 %vm4860_vm6, %v9892_v15 }
 0x4ae   : > { %5115 = vmatprep.mubr.f32.mxu0 %v10474_v6 }
 0x4af   : > { %v4504_v28 = vpop.f32.mrb[68].mxu0  ;;  %5871 = vmatmul.mubr.msk.f32.gmra.mrb[82].mxu1 %vm4860_vm6, %v9892_v15 }
 0x4b0   : > { %v9921_v10 = vmul.f32 %v10486_v13, %v4504_v28  ;;  %v4724_v52 = vmul.f32 %v4504_v28, %v10487_v46  ;;  %v4506_v60 = vpop.f32.mrb[69].mxu0  ;;  %5204 = vmatprep.mubr.f32.mxu1 %v10474_v6  ;;  %v10513_v13 = vld [vmem:[#allocation21_spill] sm:$0xff] }
 0x4b1   : > { %v4593_v14 = vpop.f32.mrb[68].mxu1  ;;  %v9932_v56 = vmul.f32 %v10491_v41, %v4506_v60  ;;  %v9935_v33 = vmul.f32 %v4506_v60, %v10492_v18 }
 0x4b2   : > { %v9938_v38 = vmul.f32 %v4724_v52, %v10494_v0  ;;  %v9941_v61 = vmul.f32 %v4724_v52, %v10495_v35  ;;  %v9944_v19 = vmul.f32 %v4724_v52, %v10497_v37  ;;  %v9947_v63 = vmul.f32 %v10499_v57, %v4593_v14  ;;  %v4595_v4 = vpop.f32.mrb[69].mxu1  ;;  %v10514_v52 = vld [vmem:[#allocation35_spill] sm:$0xff]  ;;  %v10517_v57 = vld [vmem:[#allocation25_spill] sm:$0xff] }
 0x4b3   : > { %10493 = vst [vmem:[#allocation48_spill] sm:$0xff] %v9935_v33  ;;  %v4726_v55 = vmul.f32 %v4593_v14, %v10500_v12  ;;  %v9951_v62 = vmul.f32 %v10501_v24, %v4595_v4  ;;  %v9954_v22 = vmul.f32 %v4595_v4, %v10502_v30  ;;  %v4510_v54 = vpop.f32.mrb[70].mxu0  ;;  %v9958_v17 = vmul.f32 %v9935_v33, %v10503_v21  ;;  %v10516_v14 = vld [vmem:[#allocation29_spill] sm:$0xff] }
 0x4b4   : > { %10496 = vst [vmem:[#allocation50_spill] sm:$0xff] %v9941_v61  ;;  %10498 = vst [vmem:[#allocation42_spill] sm:$0xff] %v9944_v19  ;;  %v4644_v2 = vmul.f32 %v4510_v54, %v10494_v0  ;;  %v9962_v32 = vmul.f32 %v10504_v5, %v4510_v54  ;;  %v9965_v53 = vmul.f32 %v4510_v54, %v10497_v37  ;;  %v4512_v11 = vpop.f32.mrb[71].mxu0  ;;  %v10519_v12 = vld [vmem:[#allocation37_spill] sm:$0xff] }
 0x4b5   : > { %v9968_v26 = vmul.f32 %v4510_v54, %v10495_v35  ;;  %v9971_v3 = vmul.f32 %v4726_v55, %v10506_v40  ;;  %v9974_v36 = vmul.f32 %v4726_v55, %v10507_v59  ;;  %v9977_v44 = vmul.f32 %v4726_v55, %v10509_v43  ;;  %v4599_v16 = vpop.f32.mrb[70].mxu1  ;;  %v10520_v24 = vld [vmem:[#allocation33_spill] sm:$0xff] }
 0x4b6   : > { %v4645_v25 = vmul.f32 %v4512_v11, %v10503_v21  ;;  %v4646_v42 = vmul.f32 %v4599_v16, %v10506_v40  ;;  %v9982_v47 = vmul.f32 %v10511_v29, %v4599_v16  ;;  %v9985_v28 = vmul.f32 %v4599_v16, %v10509_v43  ;;  %v4601_v39 = vpop.f32.mrb[71].mxu1 }
 0x4b7   : > { %10505 = vst [vmem:[#allocation45_spill] sm:$0xff] %v9968_v26  ;;  %10508 = vst [vmem:[#allocation41_spill] sm:$0xff] %v9974_v36  ;;  %v9988_v51 = vmul.f32 %v4599_v16, %v10507_v59  ;;  %v9991_v46 = vmul.f32 %v10513_v13, %v4512_v11  ;;  %v9994_v60 = vmul.f32 %v4512_v11, %v10514_v52  ;;  %v4516_v18 = vpop.f32.mrb[72].mxu0 }
 0x4b8   : > { %10510 = vst [vmem:[#allocation44_spill] sm:$0xff] %v9977_v44  ;;  %v9997_v20 = vmul.f32 %v4512_v11, %v10515_v45  ;;  %v4647_v41 = vmul.f32 %v4601_v39, %v10516_v14  ;;  %v10001_v4 = vmul.f32 %v10517_v57, %v4601_v39  ;;  %v10004_v55 = vmul.f32 %v4601_v39, %v10519_v12  ;;  %v4518_v16 = vpop.f32.mrb[73].mxu0 }
 0x4b9   : > { %10512 = vst [vmem:[#allocation49_spill] sm:$0xff] %v9988_v51  ;;  %v10007_v30 = vmul.f32 %v4601_v39, %v10520_v24  ;;  %v4652_v54 = vmul.f32 %v4516_v18, %v10495_v35  ;;  %v10011_v31 = vmul.f32 %v10504_v5, %v4516_v18  ;;  %v10014_v11 = vmul.f32 %v4516_v18, %v10497_v37  ;;  %v4605_v48 = vpop.f32.mrb[72].mxu1 }
 0x4ba   : > { %10518 = vst [vmem:[#allocation43_spill] sm:$0xff] %v10001_v4  ;;  %v10017_v15 = vmul.f32 %v4516_v18, %v10494_v0  ;;  %v4653_v9 = vmul.f32 %v4518_v16, %v10515_v45  ;;  %v4654_v50 = vmul.f32 %v4605_v48, %v10507_v59  ;;  %v10022_v39 = vmul.f32 %v10511_v29, %v4605_v48  ;;  %v4607_v61 = vpop.f32.mrb[73].mxu1 }
 0x4bb   : > { %10521 = vst [vmem:[#allocation51_spill] sm:$0xff] %v10011_v31  ;;  %v4660_v6 = vadd.f32 %v4652_v54, %v4644_v2  ;;  %v10025_v36 = vmul.f32 %v4605_v48, %v10509_v43  ;;  %v10030_v19 = vmul.f32 %v4605_v48, %v10506_v40  ;;  %v10033_v31 = vmul.f32 %v10513_v13, %v4518_v16  ;;  %v4522_v2 = vpop.f32.mrb[74].mxu0 }
 0x4bc   : > { %10522 = vst [vmem:[#allocation46_spill] sm:$0xff] %v10017_v15  ;;  %10523 = vst [vmem:[#allocation6_spill] sm:$0xff] %v10022_v39  ;;  %v4661_v18 = vadd.f32 %v4653_v9, %v4645_v25  ;;  %v4662_v54 = vadd.f32 %v4654_v50, %v4646_v42  ;;  %v4773_v33 = vmul.f32 %v4518_v16, %v10514_v52  ;;  %v4524_v7 = vpop.f32.mrb[75].mxu0 }
 0x4bd   : > { %10524 = vst [vmem:[#allocation10_spill] sm:$0xff] %v10030_v19  ;;  %10525 = vst [vmem:[#allocation8_spill] sm:$0xff] %v10033_v31  ;;  %v10037_v39 = vmul.f32 %v4518_v16, %v10503_v21  ;;  %v4655_v23 = vmul.f32 %v4607_v61, %v10520_v24  ;;  %v10043_v48 = vmul.f32 %v10517_v57, %v4607_v61  ;;  %v4611_v50 = vpop.f32.mrb[74].mxu1 }
 0x4be   : > { %v4775_v9 = vmul.f32 %v4607_v61, %v10519_v12  ;;  %v10047_v25 = vmul.f32 %v4607_v61, %v10516_v14  ;;  %v4668_v26 = vmul.f32 %v4522_v2, %v10497_v37  ;;  %v10053_v15 = vmul.f32 %v10504_v5, %v4522_v2  ;;  %v4613_v31 = vpop.f32.mrb[75].mxu1 }
 0x4bf   : > { %10526 = vst [vmem:[#allocation11_spill] sm:$0xff] %v10043_v48  ;;  %v4663_v16 = vadd.f32 %v4655_v23, %v4647_v41  ;;  %v4764_v51 = vmul.f32 %v4522_v2, %v10495_v35  ;;  %v4804_v19 = vmul.f32 %v4522_v2, %v10494_v0  ;;  %v4670_v61 = vmul.f32 %v4611_v50, %v10509_v43  ;;  %v10529_v2 = vld [vmem:[#allocation40_spill] sm:$0xff] }
 0x4c0   : > { %v4676_v48 = vadd.f32 %v4668_v26, %v4660_v6  ;;  %v10061_v4 = vmul.f32 %v10511_v29, %v4611_v50  ;;  %v4766_v23 = vmul.f32 %v4611_v50, %v10507_v59  ;;  %v4806_v37 = vmul.f32 %v4611_v50, %v10506_v40 }
 0x4c1   : > { %v4780_v5 = vsub.f32 %v4764_v51, %v10014_v11  ;;  %v4812_v41 = vsub.f32 %v9965_v53, %v4804_v19  ;;  %v4678_v42 = vadd.f32 %v4670_v61, %v4662_v54  ;;  %v4669_v44 = vmul.f32 %v4524_v7, %v10514_v52 }
 0x4c2   : > { %v4782_v35 = vsub.f32 %v4766_v23, %v10025_v36  ;;  %v4814_v0 = vsub.f32 %v9985_v28, %v4806_v37  ;;  %v10071_v6 = vmul.f32 %v10513_v13, %v4524_v7  ;;  %v4765_v26 = vmul.f32 %v4524_v7, %v10515_v45  ;;  %v10533_v50 = vld [vmem:[#allocation51_spill] sm:$0xff] }
 0x4c3   : > { %v4677_v43 = vadd.f32 %v4669_v44, %v4661_v18  ;;  %v4805_v59 = vmul.f32 %v4524_v7, %v10503_v21  ;;  %v4671_v40 = vmul.f32 %v4613_v31, %v10519_v12  ;;  %v10077_v29 = vmul.f32 %v10517_v57, %v4613_v31 }
 0x4c4   : > { %v4781_v19 = vsub.f32 %v4765_v26, %v4773_v33  ;;  %v4767_v53 = vmul.f32 %v4613_v31, %v10520_v24  ;;  %v4807_v36 = vmul.f32 %v4613_v31, %v10516_v14  ;;  %v4684_v28 = vmul.f32 %v4676_v48, %v9903_v1 }
 0x4c5   : > { %v4813_v51 = vsub.f32 %v9994_v60, %v4805_v59  ;;  %v4679_v13 = vadd.f32 %v4671_v40, %v4663_v16  ;;  %v4685_v11 = vmul.f32 %v4677_v43, %v9905_v27  ;;  %v4686_v44 = vmul.f32 %v4678_v42, %v9908_v49  ;;  %v10534_v42 = vld [vmem:[#allocation6_spill] sm:$0xff] }
 0x4c6   : > { %v4783_v7 = vsub.f32 %v4767_v53, %v4775_v9  ;;  %v4815_v21 = vsub.f32 %v10004_v55, %v4807_v36  ;;  %v7088_v57 = vpack.c.bf16 %v4684_v28, %v9921_v10  ;;  %v7090_v33 = vpack.c.bf16 %v9958_v17, %v9991_v46  ;;  %v10527_v17 = vld [vmem:[#allocation43_spill] sm:$0xff]  ;;  %v10528_v46 = vld [vmem:[#allocation53_spill] sm:$0xff]  ;;  %v10535_v43 = vld [vmem:[#allocation42_spill] sm:$0xff] }
 0x4c7   : > { %v7086_v18 = vpack.c.bf16 %v4685_v11, %v9932_v56  ;;  %v4687_v31 = vmul.f32 %v4679_v13, %v9910_v34  ;;  %v7112_v1 = vpack.c.bf16 %v4686_v44, %v9947_v63  ;;  %v4735_v60 = vmul.f32 %v9954_v22, %v10516_v14  ;;  %v10530_v14 = vld [vmem:[#allocation8_spill] sm:$0xff]  ;;  %v10537_v53 = vld [vmem:[#allocation50_spill] sm:$0xff]  ;;  %v10542_v13 = vld [vmem:[#allocation45_spill] sm:$0xff] }
 0x4c8   : > { %v7092_v27 = vpack.c.bf16 %v9938_v38, %v9962_v32  ;;  %v7116_v49 = vpack.c.bf16 %v9971_v3, %v9982_v47  ;;  %v4789_v10 = vmul.f32 %v4781_v19, %v9918_v58  ;;  %v4791_v55 = vmul.f32 %v4783_v7, %v9929_v8  ;;  %v10531_v38 = vld [vmem:[#allocation11_spill] sm:$0xff]  ;;  %v10532_v3 = vld [vmem:[#allocation48_spill] sm:$0xff]  ;;  %v10544_v7 = vld [vmem:[#allocation10_spill] sm:$0xff] }
 0x4c9   : > { %7087 = vmatprep.subr.bf16.mxu0 %v7086_v18  ;;  %v7110_v56 = vpack.c.bf16 %v4687_v31, %v9951_v62  ;;  %v7114_v34 = vpack.c.bf16 %v4735_v60, %v10527_v17  ;;  %v4788_v63 = vmul.f32 %v4780_v5, %v10528_v46  ;;  %v4790_v54 = vmul.f32 %v4782_v35, %v10529_v2  ;;  %v10551_v18 = vld [vmem:[#allocation39_spill] sm:$0xff]  ;;  %v10552_v31 = vld [vmem:[#allocation52_spill] sm:$0xff] }
 0x4ca   : > { %7089 = vmatpush1.bf16.msra.mxu0 %v7088_v57  ;;  %v7094_v48 = vpack.c.bf16 %v10530_v14, %v4789_v10  ;;  %v7118_v32 = vpack.c.bf16 %v10531_v38, %v4791_v55  ;;  %v4741_v47 = vmul.f32 %v10532_v3, %v10515_v45  ;;  %v4821_v9 = vmul.f32 %v4813_v51, %v9918_v58  ;;  %v10541_v51 = vld [vmem:[#allocation46_spill] sm:$0xff] }
 0x4cb   : > { %7111 = vmatprep.subr.bf16.mxu1 %v7110_v56  ;;  %7091 = vmatprep.subr.bf16.mxu0 %v7090_v33  ;;  %v7096_v62 = vpack.c.bf16 %v10533_v50, %v4788_v63  ;;  %v7120_v16 = vpack.c.bf16 %v10534_v42, %v4790_v54  ;;  %v4743_v61 = vmul.f32 %v9954_v22, %v10520_v24  ;;  %v10536_v24 = vld [vmem:[#allocation44_spill] sm:$0xff]  ;;  %v10549_v57 = vmov 0.0   ;;  %v10550_v33 = vld [vmem:[#allocation38_spill] sm:$0xff] }
 0x4cc   : > { %7113 = vmatpush1.bf16.msra.mxu1 %v7112_v1  ;;  %v7098_v23 = vpack.c.bf16 %v4821_v9, %v4741_v47  ;;  %v4823_v37 = vmul.f32 %v4815_v21, %v9929_v8  ;;  %v4820_v5 = vmul.f32 %v4812_v41, %v10528_v46  ;;  %v4822_v35 = vmul.f32 %v4814_v0, %v10529_v2  ;;  %v10538_v41 = vld [vmem:[#allocation41_spill] sm:$0xff]  ;;  %v10548_v21 = vld [vmem:[#allocation47_spill] sm:$0xff] }
 0x4cd   : > { %7115 = vmatprep.subr.bf16.mxu1 %v7114_v34  ;;  %v4749_v45 = vmul.f32 %v10532_v3, %v10514_v52  ;;  %v4751_v26 = vmul.f32 %v9954_v22, %v10519_v12  ;;  %v7104_v59 = vpack.c.bf16 %v10535_v43, %v10053_v15  ;;  %v7128_v40 = vpack.c.bf16 %v10536_v24, %v10061_v4 }
 0x4ce   : > { %7093 = vmatpush1.bf16.msra.mxu0 %v7092_v27  ;;  %v7122_v19 = vpack.c.bf16 %v4823_v37, %v4743_v61  ;;  %v7100_v36 = vpack.c.bf16 %v4820_v5, %v10537_v53  ;;  %v7124_v28 = vpack.c.bf16 %v4822_v35, %v10538_v41  ;;  %v10539_v0 = vsub.f32 %v10037_v39, %v9997_v20  ;;  %v10545_v20 = vld [vmem:[#allocation49_spill] sm:$0xff] }
 0x4cf   : > { %7095 = vmatprep.subr.bf16.mxu0 %v7094_v48  ;;  %v7102_v22 = vpack.c.bf16 %v4749_v45, %v10071_v6  ;;  %v7126_v12 = vpack.c.bf16 %v4751_v26, %v10077_v29  ;;  %v10540_v15 = vsub.f32 %v10047_v25, %v10007_v30  ;;  %v10543_v11 = vsub.f32 %v10541_v51, %v10542_v13 }
 0x4d0   : > { %v4853_v52 = vmul.f32 %v10539_v0, %v9918_v58  ;;  %7117 = vmatpush1.bf16.msra.mxu1 %v7116_v49  ;;  %v10546_v58 = vsub.f32 %v10544_v7, %v10545_v20 }
 0x4d1   : > { %v4855_v4 = vmul.f32 %v10540_v15, %v9929_v8  ;;  %v4852_v44 = vmul.f32 %v10543_v11, %v10528_v46  ;;  %7119 = vmatprep.subr.bf16.mxu1 %v7118_v32  ;;  %v10547_v8 = vmov 1.0  }
 0x4d2   : > { %v4854_v39 = vmul.f32 %v10546_v58, %v10529_v2  ;;  %7097 = vmatpush1.bf16.msra.mxu0 %v7096_v62  ;;  %v7106_v30 = vpack.c.bf16 %v10547_v8, %v4853_v52 }
 0x4d3   : > { %7099 = vmatprep.subr.bf16.mxu0 %v7098_v23  ;;  %v7130_v25 = vpack.c.bf16 %v10547_v8, %v4855_v4  ;;  %v7108_v6 = vpack.c.bf16 %v10547_v8, %v4852_v44 }
 0x4d4   : > { %7121 = vmatpush1.bf16.msra.mxu1 %v7120_v16  ;;  %v7132_v29 = vpack.c.bf16 %v10547_v8, %v4854_v39 }
 0x4d5   : > { %7123 = vmatprep.subr.bf16.mxu1 %v7122_v19 }
 0x4d6   : > { %7101 = vmatpush1.bf16.msra.mxu0 %v7100_v36 }
 0x4d7   : > { %7103 = vmatprep.subr.bf16.mxu0 %v7102_v22 }
 0x4d8   : > { %7125 = vmatpush1.bf16.msra.mxu1 %v7124_v28 }
 0x4d9   : > { %7127 = vmatprep.subr.bf16.mxu1 %v7126_v12 }
 0x4da   : > { %7105 = vmatpush1.bf16.msra.mxu0 %v7104_v59 }
 0x4db   : > { %7107 = vmatprep.subr.bf16.mxu0 %v7106_v30 }
 0x4dc   : > { %7129 = vmatpush1.bf16.msra.mxu1 %v7128_v40 }
 0x4dd   : > { %7131 = vmatprep.subr.bf16.mxu1 %v7130_v25 }
 0x4de   : > { %7109 = vmatpush1.bf16.msra.mxu0 %v7108_v6 }
 0x4e0   : > { %7133 = vmatpush1.bf16.msra.mxu1 %v7132_v29 }
 0x4e1   : > { %5872 = vmatmul.mubr.msk.f32.vlgmr.msra.gmra.mrb[84].mxu0 %vm4860_vm6, %v10548_v21 }
 0x4e2   : > { %5121 = vmatprep.mubr.f32.mxu0 %v10549_v57 }
 0x4e3   : > { %5876 = vmatmul.mubr.msk.f32.vlgmr.msra.gmra.mrb[84].mxu1 %vm4860_vm6, %v10548_v21 }
 0x4e4   : > { %5210 = vmatprep.mubr.f32.mxu1 %v10549_v57 }
 0x4e5   : > { %5873 = vmatmul.mubr.msk.f32.gmra.mrb[86].mxu0 %vm4860_vm6, %v10550_v33 }
 0x4e6   : > { %5127 = vmatprep.mubr.f32.mxu0 %v10549_v57 }
 0x4e7   : > { %5877 = vmatmul.mubr.msk.f32.gmra.mrb[86].mxu1 %vm4860_vm6, %v10550_v33 }
 0x4e8   : > { %5216 = vmatprep.mubr.f32.mxu1 %v10549_v57 }
 0x4e9   : > { %5874 = vmatmul.mubr.msk.f32.gmra.mrb[88].mxu0 %vm4860_vm6, %v10551_v18 }
 0x4ea   : > { %5133 = vmatprep.mubr.f32.mxu0 %v10549_v57 }
 0x4eb   : > { %5878 = vmatmul.mubr.msk.f32.gmra.mrb[88].mxu1 %vm4860_vm6, %v10551_v18 }
 0x4ec   : > { %5222 = vmatprep.mubr.f32.mxu1 %v10549_v57 }
 0x4ed   : > { %5875 = vmatmul.mubr.msk.f32.gmra.mrb[90].mxu0 %vm4860_vm6, %v10552_v31 }
 0x4ef   : > { %5879 = vmatmul.mubr.msk.f32.gmra.mrb[90].mxu1 %vm4860_vm6, %v10552_v31 }
 0x574   : > { %v4939_v1 = vpop.f32.mrb[76].mxu0 }
 0x575   : > { %5229 = vst [vmem:[%s10173_s29] sm:$0xff] %v4939_v1  ;;  %v4941_v60 = vpop.f32.mrb[77].mxu0 }
 0x576   : > { %v5028_v27 = vpop.f32.mrb[76].mxu1  ;;  %5230 = vst [vmem:[%s10173_s29 + $0x8] sm:$0xff] %v4941_v60 }
 0x577   : > { %5231 = vst [vmem:[%s10173_s29 + $0x10] sm:$0xff] %v5028_v27  ;;  %v5030_v49 = vpop.f32.mrb[77].mxu1 }
 0x578   : > { %5232 = vst [vmem:[%s10173_s29 + $0x18] sm:$0xff] %v5030_v49  ;;  %v4945_v10 = vpop.f32.mrb[78].mxu0 }
 0x579   : > { %5237 = vst [vmem:[%s10173_s29 + $0x40] sm:$0xff] %v4945_v10  ;;  %v4947_v55 = vpop.f32.mrb[79].mxu0 }
 0x57a   : > { %v5034_v56 = vpop.f32.mrb[78].mxu1  ;;  %5238 = vst [vmem:[%s10173_s29 + $0x48] sm:$0xff] %v4947_v55 }
 0x57b   : > { %5239 = vst [vmem:[%s10173_s29 + $0x50] sm:$0xff] %v5034_v56  ;;  %v5036_v17 = vpop.f32.mrb[79].mxu1 }
 0x57c   : > { %5240 = vst [vmem:[%s10173_s29 + $0x58] sm:$0xff] %v5036_v17  ;;  %v4951_v34 = vpop.f32.mrb[80].mxu0 }
 0x57d   : > { %5245 = vst [vmem:[%s10173_s29 + $0x80] sm:$0xff] %v4951_v34  ;;  %v4953_v46 = vpop.f32.mrb[81].mxu0 }
 0x57e   : > { %v5040_v63 = vpop.f32.mrb[80].mxu1  ;;  %5246 = vst [vmem:[%s10173_s29 + $0x88] sm:$0xff] %v4953_v46 }
 0x57f   : > { %5247 = vst [vmem:[%s10173_s29 + $0x90] sm:$0xff] %v5040_v63  ;;  %v5042_v2 = vpop.f32.mrb[81].mxu1 }
 0x580   : > { %5248 = vst [vmem:[%s10173_s29 + $0x98] sm:$0xff] %v5042_v2  ;;  %v4957_v54 = vpop.f32.mrb[82].mxu0 }
 0x581   : > { %5253 = vst [vmem:[%s10173_s29 + $0xc0] sm:$0xff] %v4957_v54  ;;  %v4959_v14 = vpop.f32.mrb[83].mxu0 }
 0x582   : > { %v5046_v48 = vpop.f32.mrb[82].mxu1  ;;  %5254 = vst [vmem:[%s10173_s29 + $0xc8] sm:$0xff] %v4959_v14 }
 0x583   : > { %5255 = vst [vmem:[%s10173_s29 + $0xd0] sm:$0xff] %v5046_v48  ;;  %v5048_v38 = vpop.f32.mrb[83].mxu1 }
 0x584   : > { %5256 = vst [vmem:[%s10173_s29 + $0xd8] sm:$0xff] %v5048_v38 }
 0x5b4   : > { %v5117_v32 = vpop.f32.mrb[84].mxu0 }
 0x5b5   : > { %5233 = vst [vmem:[%s10173_s29 + $0x20] sm:$0xff] %v5117_v32  ;;  %v5119_v3 = vpop.f32.mrb[85].mxu0 }
 0x5b6   : > { %v5206_v47 = vpop.f32.mrb[84].mxu1  ;;  %5234 = vst [vmem:[%s10173_s29 + $0x28] sm:$0xff] %v5119_v3 }
 0x5b7   : > { %5235 = vst [vmem:[%s10173_s29 + $0x30] sm:$0xff] %v5206_v47  ;;  %v5208_v9 = vpop.f32.mrb[85].mxu1 }
 0x5b8   : > { %5236 = vst [vmem:[%s10173_s29 + $0x38] sm:$0xff] %v5208_v9  ;;  %v5123_v50 = vpop.f32.mrb[86].mxu0 }
 0x5b9   : > { %5241 = vst [vmem:[%s10173_s29 + $0x60] sm:$0xff] %v5123_v50  ;;  %v5125_v62 = vpop.f32.mrb[87].mxu0 }
 0x5ba   : > { %v5212_v42 = vpop.f32.mrb[86].mxu1  ;;  %5242 = vst [vmem:[%s10173_s29 + $0x68] sm:$0xff] %v5125_v62 }
 0x5bb   : > { %5243 = vst [vmem:[%s10173_s29 + $0x70] sm:$0xff] %v5212_v42  ;;  %v5214_v16 = vpop.f32.mrb[87].mxu1 }
 0x5bc   : > { %5244 = vst [vmem:[%s10173_s29 + $0x78] sm:$0xff] %v5214_v16  ;;  %v5129_v61 = vpop.f32.mrb[88].mxu0 }
 0x5bd   : > { %5249 = vst [vmem:[%s10173_s29 + $0xa0] sm:$0xff] %v5129_v61  ;;  %v5131_v23 = vpop.f32.mrb[89].mxu0 }
 0x5be   : > { %v5218_v37 = vpop.f32.mrb[88].mxu1  ;;  %5250 = vst [vmem:[%s10173_s29 + $0xa8] sm:$0xff] %v5131_v23 }
 0x5bf   : > { %5251 = vst [vmem:[%s10173_s29 + $0xb0] sm:$0xff] %v5218_v37  ;;  %v5220_v5 = vpop.f32.mrb[89].mxu1 }
 0x5c0   : > { %5252 = vst [vmem:[%s10173_s29 + $0xb8] sm:$0xff] %v5220_v5  ;;  %v5135_v35 = vpop.f32.mrb[90].mxu0 }
 0x5c1   : > { %5257 = vst [vmem:[%s10173_s29 + $0xe0] sm:$0xff] %v5135_v35  ;;  %v5137_v45 = vpop.f32.mrb[91].mxu0 }
 0x5c2   : > { %v5224_v26 = vpop.f32.mrb[90].mxu1  ;;  %5258 = vst [vmem:[%s10173_s29 + $0xe8] sm:$0xff] %v5137_v45 }
 0x5c3   : > { %5259 = vst [vmem:[%s10173_s29 + $0xf0] sm:$0xff] %v5224_v26  ;;  %v5226_v43 = vpop.f32.mrb[91].mxu1 }
 0x5c4   : > { %5260 = vst [vmem:[%s10173_s29 + $0xf8] sm:$0xff] %v5226_v43 }
 0x5c5   : > { %7339 = shalt.err (!%p7336_p3)
}
 0x5c6   : > { %s7340_s24 = scalar_lea.hbm %s10208_s12, 4096  ;;  %s7344_s15 = scalar_lea.hbm %s10270_s11, 8192 }
 0x5c7   : > { %p7341_p4 = scmp.ne.s32.totalorder %s10208_s12, %s7340_s24  ;;  %p7345_p9 = scmp.lt.u32.totalorder %s10208_s12, %s10270_s11 }
 0x5c8   : > { %p7346_p10 = scmp.lt.u32.totalorder %s7344_s15, %s7340_s24  ;;  %p7348_p12 = scmp.lt.u32.totalorder %s7340_s24, %s10208_s12 }
 0x5c9   : > { %p7342_p7 = pnand %p7341_p4, %p7496_p5 }
 0x5ca   : > { %p7347_p11 = por %p7346_p10, %p7345_p9 }
 0x5cb   : > { %p7343_p8 = pneg %p7342_p7 }
 0x5cc   : > { %p7349_p13 = por %p7348_p12, %p7347_p11 }
 0x5ce   : > { %p7350_p0 = pnand %p7349_p13, %p7343_p8 }
 0x5d0   : > { %7353 = shalt.err (!%p7350_p0)
}
 0x5d1   : > { %s7395_s16 = smov 1024   ;;  %s7396_s22 = smov 2048  }
 0x5d2   : > { %s7397_s25 = smov 64  }
 0x5d3   : > { %7134 = dma.vmem_to_hbm [thread:$0]  (%p7496_p5), %s10211_s14, 4096, %s10208_s12, %s10218_s21, %s7395_s16, %s7396_s22, %s7397_s25  }
 0x5d4 PF: > { %p7140_p1 = scmp.ge.s32.totalorder %s7388_s20, 2  ;;  %s5290_s29 = sand.u32 1, %s7376_s17  }
 0x5d5   : > { %s5291_s24 = scalar_lea.sflag [#allocation3], %s5290_s29 }
 0x5d6   : > { %p7137_p2 = pnand %p7140_p1, %p7500_p6 }
 0x5d8   : > { %7371 = dma.done.wait (!%p7137_p2), %s5291_s24, 4096  }
 0x5d9   : > { %7373 = vsyncadd (!%p7137_p2), %s5291_s24, 4294963200  ;;  %p21_p3 = scmp.ge.s32.totalorder %s7483_s23, 4   ;;  %s10553_s17 = smov %s7380_s18 }
 0x5da   : > { %s10554_s18 = smov %s7384_s19  ;;  %s10555_s19 = smov %s7494_s26 }
 0x5db   : > { %s10556_s20 = smov %s7483_s23  ;;  %23 = sbr.rel (!%p21_p3) target bundleno = 5 (0x5), region = 105 }
 0x5e2   :  { %5296 = vsyncpa [#allocation3], 1 }
 0x5e3   :  { %5298 = vsyncpa [#allocation3 + $0x1], 1 }

</bundles_post_ra>
